<compile_context>
chip_gen: v5e
topology: v5e:2x2
jax: 0.10.0
libtpu: 0.0.40
codegen_flags: <defaults>
</compile_context>

<pallas_src>
import jax
import jax.numpy as jnp
import numpy as np
from jax.experimental import pallas as pl
from jax.experimental.pallas import tpu as pltpu  # noqa: F401  (kept for parity / future use)

# ---- small synthetic shapes consistent with TransformerMapper ----
B = 2                       # batch
DIM_CLIP = 16               # dim_clip
CLIP_LEN = 4                # clip_length
PREFIX_LEN = 8              # prefix_length (rows of prefix_const)
DIM_EMB = 32                # dim_embedding
NUM_HEADS = 8               # Transformer(dim_embedding, 8, num_layers)
HEAD_DIM = DIM_EMB // NUM_HEADS
NUM_LAYERS = 2              # (module default is 8; kept small for the synthetic test)
HIDDEN = int(DIM_EMB * 2.0) # mlp_ratio = 2.0 (Transformer default)
SEQ = CLIP_LEN + PREFIX_LEN # 12 real tokens
SEQ_P = 16                  # padded sequence length (multiple of 8 sublanes)
PAD = SEQ_P - SEQ
EPS = 1e-5                  # nn.LayerNorm default
SCALE = HEAD_DIM ** -0.5
NEG_INF = -1e30


# ------------------------------------------------------------------
# Fused kernel: mapper linear + prefix concat + all transformer layers
# ------------------------------------------------------------------
def _layernorm2d(x, gamma, beta):
    # single-pass LN: the two reductions are independent (no serial dep through mu).
    mu = jnp.mean(x, axis=-1, keepdims=True)
    msq = jnp.mean(x * x, axis=-1, keepdims=True)
    inv = jax.lax.rsqrt(msq - mu * mu + EPS)
    return (x - mu) * (inv * gamma) + beta


def _mapper_kernel(x_ref, head_ref, wqkv_ref, wpw2_ref, w1vec_ref, o_ref):
    f32 = jnp.float32
    D, H, Hd = DIM_EMB, NUM_HEADS, HEAD_DIM
    N = B * SEQ_P

    # ---- unpack the mapper-head slab: rows [0:8) prefix | [8:24) w_lin | [24] b_lin ----
    prefix = head_ref[0:PREFIX_LEN, :D]                                    # (8, 32)
    w_lin = head_ref[PREFIX_LEN:PREFIX_LEN + DIM_CLIP, :]                  # (16, 128)
    b_lin = head_ref[PREFIX_LEN + DIM_CLIP:PREFIX_LEN + DIM_CLIP + 1, :]   # (1, 128)

    # ---- 1) clip -> clip_length tokens (still packed along lanes): (B, CLIP_LEN*D) ----
    h = jnp.dot(x_ref[...], w_lin, preferred_element_type=f32) + b_lin

    # ---- 2) assemble the padded, 8-aligned sequence state fully in registers ----
    #   per batch: rows [0:8) = prefix_const, rows [8:12) = clip tokens, rows [12:16) = pad(0)
    clip_tok = jnp.concatenate(
        [h[:, t * D:(t + 1) * D][:, None, :] for t in range(CLIP_LEN)], axis=1)  # (B, 4, D)
    prefix_b = jnp.broadcast_to(prefix[None], (B, PREFIX_LEN, D))                # (B, 8, D)
    pad_b = jnp.zeros((B, PAD, D), f32)                                          # (B, 4, D)
    x2d = jnp.concatenate([prefix_b, clip_tok, pad_b], axis=1).reshape(N, D)     # (32, 32)

    # additive key mask: pad key columns get -1e30 before softmax in every layer (hoisted)
    key_pos = jax.lax.broadcasted_iota(jnp.int32, (H * B, SEQ_P, SEQ_P), 2)
    key_bias = jnp.where(key_pos < SEQ, 0.0, NEG_INF).astype(f32)

    # ---- 3) transformer layers (statically unrolled; weights resident in VMEM) ----
    for l in range(NUM_LAYERS):
        wqkv_l = wqkv_ref[l]                       # (H, D, 3*Hd)  per-head [q|k|v] columns
        wpw2 = wpw2_ref[l]                         # (D + HIDDEN, D)
        wp, w2 = wpw2[:D, :], wpw2[D:, :]          # (D, D), (HIDDEN, D)
        w1v = w1vec_ref[l]                         # (D + 8, HIDDEN)
        w1 = w1v[:D, :]                            # (D, HIDDEN)
        g1 = w1v[D + 0:D + 1, :D]
        be1 = w1v[D + 1:D + 2, :D]
        g2 = w1v[D + 2:D + 3, :D]
        be2 = w1v[D + 3:D + 4, :D]
        bp = w1v[D + 4:D + 5, :D]
        bb2 = w1v[D + 5:D + 6, :D]
        bb1 = w1v[D + 6:D + 7, :]                  # (1, HIDDEN)

        # attention block: x = x + project(MHA(norm1(x)))
        hn = _layernorm2d(x2d, g1, be1)                                      # (N, D)
        hn_b = jnp.broadcast_to(hn[None], (H, N, D))                         # heads as batch
        qkv = jnp.einsum('hnd,hdk->hnk', hn_b, wqkv_l,
                         preferred_element_type=f32)                         # (H, N, 3*Hd)
        qkv = qkv.reshape(H * B, SEQ_P, 3 * Hd)    # (16, 16, 12) leading-dim reshape only
        q = qkv[:, :, :Hd]
        k = qkv[:, :, Hd:2 * Hd]
        v = qkv[:, :, 2 * Hd:]
        s = jnp.einsum('bnd,bmd->bnm', q, k, preferred_element_type=f32) * SCALE
        s = s + key_bias                                                     # mask pad keys
        s = s - jnp.max(s, axis=-1, keepdims=True)
        p = jnp.exp(s)
        p = p * pl.reciprocal(jnp.sum(p, axis=-1, keepdims=True), approx=True)
        o = jnp.einsum('bnm,bmd->bnd', p, v, preferred_element_type=f32)     # (H*B, S, Hd)
        o = o.reshape(H, N, Hd)
        attn2d = jnp.concatenate([o[hh] for hh in range(H)], axis=-1)        # (N, D)
        x2d = x2d + jnp.dot(attn2d, wp, preferred_element_type=f32) + bp

        # mlp block: x = x + fc2(relu(fc1(norm2(x))))   (dropout p=0 -> no-op)
        h2 = _layernorm2d(x2d, g2, be2)
        m = jnp.dot(h2, w1, preferred_element_type=f32) + bb1
        m = jnp.maximum(m, 0.0)
        m = jnp.dot(m, w2, preferred_element_type=f32) + bb2
        x2d = x2d + m

    # ---- 4) emit only the prefix rows (8-aligned rows 0..7 of every 16-row batch group) ----
    x3 = x2d.reshape(B, SEQ_P, D)
    o_ref[...] = x3[:, :PREFIX_LEN, :].reshape(B * PREFIX_LEN, D)


# ------------------------------------------------------------------
# Wrapper: pack the 15 logical params into 4 slabs (+ x) and call the kernel
# ------------------------------------------------------------------
def _pack_params(params):
    L, D, H, Hd = NUM_LAYERS, DIM_EMB, NUM_HEADS, HEAD_DIM
    W = CLIP_LEN * D
    # mapper-head slab: rows [0:8) prefix | [8:24) w_lin | [24] b_lin, width = CLIP_LEN*D = 128
    head = jnp.zeros((PREFIX_LEN + DIM_CLIP + 1, W), jnp.float32)
    head = head.at[0:PREFIX_LEN, :D].set(params["prefix_const"])
    head = head.at[PREFIX_LEN:PREFIX_LEN + DIM_CLIP, :].set(params["w_lin"])
    head = head.at[PREFIX_LEN + DIM_CLIP, :].set(params["b_lin"][0])

    # per-head QKV weights: (L, H, D, 3*Hd), lane layout per head = [q | k | v]
    wq = params["wq"].reshape(L, D, H, Hd).transpose(0, 2, 1, 3)
    wk = params["wkv"][:, :, :D].reshape(L, D, H, Hd).transpose(0, 2, 1, 3)
    wv = params["wkv"][:, :, D:].reshape(L, D, H, Hd).transpose(0, 2, 1, 3)
    wqkv_h = jnp.concatenate([wq, wk, wv], axis=-1)

    # wp (D,D) row-stacked over w2 (HIDDEN,D): (L, D+HIDDEN, D)
    wpw2 = jnp.concatenate([params["wp"], params["w2"]], axis=1)

    # w1 (D,HIDDEN) row-stacked over the small per-layer vectors: (L, D+8, HIDDEN)
    vec = jnp.zeros((L, 8, HIDDEN), jnp.float32)
    vec = vec.at[:, 0, :D].set(params["g1"][:, 0])
    vec = vec.at[:, 1, :D].set(params["be1"][:, 0])
    vec = vec.at[:, 2, :D].set(params["g2"][:, 0])
    vec = vec.at[:, 3, :D].set(params["be2"][:, 0])
    vec = vec.at[:, 4, :D].set(params["bp"][:, 0])
    vec = vec.at[:, 5, :D].set(params["bb2"][:, 0])
    vec = vec.at[:, 6, :].set(params["bb1"][:, 0])
    w1vec = jnp.concatenate([params["w1"], vec], axis=1)
    return head, wqkv_h, wpw2, w1vec


@jax.jit
def transformer_mapper_forward(x, params):
    head, wqkv_h, wpw2, w1vec = _pack_params(params)
    out2d = pl.pallas_call(
        _mapper_kernel,
        out_shape=jax.ShapeDtypeStruct((B * PREFIX_LEN, DIM_EMB), jnp.float32),
    )(x, head, wqkv_h, wpw2, w1vec)
    return out2d.reshape(B, PREFIX_LEN, DIM_EMB)


# ------------------------------------------------------------------
# Pure-JAX reference (matches the PyTorch module semantics)
# ------------------------------------------------------------------
def _layernorm_ref(x, g, b):
    mu = x.mean(-1, keepdims=True)
    var = ((x - mu) ** 2).mean(-1, keepdims=True)
    return (x - mu) / jnp.sqrt(var + EPS) * g + b


def reference_forward(x, params):
    h = x @ params["w_lin"] + params["b_lin"]
    h = h.reshape(B, CLIP_LEN, DIM_EMB)
    prefix = jnp.broadcast_to(params["prefix_const"][None], (B, PREFIX_LEN, DIM_EMB))
    z = jnp.concatenate([h, prefix], axis=1)
    for l in range(NUM_LAYERS):
        ln1 = _layernorm_ref(z, params["g1"][l], params["be1"][l])
        q = ln1 @ params["wq"][l]
        kv = ln1 @ params["wkv"][l]
        k, v = kv[..., :DIM_EMB], kv[..., DIM_EMB:]
        qh = q.reshape(B, SEQ, NUM_HEADS, HEAD_DIM)
        kh = k.reshape(B, SEQ, NUM_HEADS, HEAD_DIM)
        vh = v.reshape(B, SEQ, NUM_HEADS, HEAD_DIM)
        att = jnp.einsum("bnhd,bmhd->bnmh", qh, kh) * SCALE
        att = jax.nn.softmax(att, axis=2)
        o = jnp.einsum("bnmh,bmhd->bnhd", att, vh).reshape(B, SEQ, DIM_EMB)
        o = o @ params["wp"][l] + params["bp"][l]
        z = z + o
        ln2 = _layernorm_ref(z, params["g2"][l], params["be2"][l])
        m = jax.nn.relu(ln2 @ params["w1"][l] + params["bb1"][l])
        m = m @ params["w2"][l] + params["bb2"][l]
        z = z + m
    return z[:, CLIP_LEN:]


# ------------------------------------------------------------------
# Deterministic parameter init (synthetic; shapes match the nn.Module)
# ------------------------------------------------------------------
def init_params(key):
    ks = jax.random.split(key, 16)
    std = 0.02
    return {
        # mapper linear: nn.Linear(dim_clip, clip_length * dim_embedding)
        "w_lin": jax.random.normal(ks[0], (DIM_CLIP, CLIP_LEN * DIM_EMB), jnp.float32) * std,
        "b_lin": jax.random.normal(ks[1], (1, CLIP_LEN * DIM_EMB), jnp.float32) * std,
        # prefix_const: randn(prefix_length, dim_embedding)
        "prefix_const": jax.random.normal(ks[2], (PREFIX_LEN, DIM_EMB), jnp.float32),
        # per-layer params, stacked with leading L axis; 1-D params stored as (L, 1, dim)
        # (norm affine params randomized slightly so the in-kernel packing layout is exercised)
        "g1":  1.0 + 0.1 * jax.random.normal(ks[11], (NUM_LAYERS, 1, DIM_EMB), jnp.float32),
        "be1": 0.1 * jax.random.normal(ks[12], (NUM_LAYERS, 1, DIM_EMB), jnp.float32),
        "wq":  jax.random.normal(ks[3], (NUM_LAYERS, DIM_EMB, DIM_EMB), jnp.float32) * std,
        "wkv": jax.random.normal(ks[4], (NUM_LAYERS, DIM_EMB, 2 * DIM_EMB), jnp.float32) * std,
        "wp":  jax.random.normal(ks[5], (NUM_LAYERS, DIM_EMB, DIM_EMB), jnp.float32) * std,
        "bp":  jax.random.normal(ks[6], (NUM_LAYERS, 1, DIM_EMB), jnp.float32) * std,
        "g2":  1.0 + 0.1 * jax.random.normal(ks[13], (NUM_LAYERS, 1, DIM_EMB), jnp.float32),
        "be2": 0.1 * jax.random.normal(ks[14], (NUM_LAYERS, 1, DIM_EMB), jnp.float32),
        "w1":  jax.random.normal(ks[7], (NUM_LAYERS, DIM_EMB, HIDDEN), jnp.float32) * std,
        "bb1": jax.random.normal(ks[8], (NUM_LAYERS, 1, HIDDEN), jnp.float32) * std,
        "w2":  jax.random.normal(ks[9], (NUM_LAYERS, HIDDEN, DIM_EMB), jnp.float32) * std,
        "bb2": jax.random.normal(ks[10], (NUM_LAYERS, 1, DIM_EMB), jnp.float32) * std,
    }


if __name__ == "__main__":
    key = jax.random.PRNGKey(0)
    k_param, k_x = jax.random.split(key)
    params = init_params(k_param)
    x = jax.random.normal(k_x, (B, DIM_CLIP), jnp.float32)   # clip embedding input

    out = jax.block_until_ready(transformer_mapper_forward(x, params))
    ref = jax.block_until_ready(reference_forward(x, params))

    assert out.shape == (B, PREFIX_LEN, DIM_EMB), out.shape
    # tolerance slightly loosened vs 1e-4 because the softmax denominator uses the
    # EUP approximate reciprocal (~bf16-accurate); everything else stays f32.
    np.testing.assert_allclose(np.asarray(out), np.asarray(ref), rtol=2e-3, atol=2e-3)
    print("KERNEL_OK")
</pallas_src>

<mosaic_0001>
module attributes {stable_mosaic.version = 11 : i64} {
  func.func @_mapper_kernel(%arg0: memref<2x16xf32, #tpu.memory_space<vmem>>, %arg1: memref<25x128xf32, #tpu.memory_space<vmem>>, %arg2: memref<2x8x32x12xf32, #tpu.memory_space<vmem>>, %arg3: memref<2x96x32xf32, #tpu.memory_space<vmem>>, %arg4: memref<2x40x64xf32, #tpu.memory_space<vmem>>, %arg5: memref<16x32xf32, #tpu.memory_space<vmem>>) attributes {dimension_semantics = [], scalar_prefetch = 0 : i64, scratch_operands = 0 : i64, tpu.core_type = #tpu.core_type<tc>} {
    %c0 = arith.constant 0 : index
    %c0_0 = arith.constant 0 : index
    %0 = vector.load %arg1[%c0, %c0_0] : memref<25x128xf32, #tpu.memory_space<vmem>>, vector<8x32xf32>
    %c8 = arith.constant 8 : index
    %c0_1 = arith.constant 0 : index
    %1 = vector.load %arg1[%c8, %c0_1] : memref<25x128xf32, #tpu.memory_space<vmem>>, vector<16x128xf32>
    %c24 = arith.constant 24 : index
    %c0_2 = arith.constant 0 : index
    %2 = vector.load %arg1[%c24, %c0_2] : memref<25x128xf32, #tpu.memory_space<vmem>>, vector<1x128xf32>
    %c0_3 = arith.constant 0 : index
    %c0_4 = arith.constant 0 : index
    %3 = vector.load %arg0[%c0_3, %c0_4] : memref<2x16xf32, #tpu.memory_space<vmem>>, vector<2x16xf32>
    %cst = arith.constant dense<0.000000e+00> : vector<2x128xf32>
    %4 = tpu.matmul %3, %1, %cst {dimension_numbers = #tpu.dot_dimension_numbers<[1], [0], [0], [1], [0, 0, 1, 1], [], []>} : vector<2x16xf32>, vector<16x128xf32>, vector<2x128xf32> -> vector<2x128xf32>
    %5 = vector.broadcast %2 : vector<1x128xf32> to vector<2x128xf32>
    %6 = arith.addf %4, %5 : vector<2x128xf32>
    %7 = vector.extract_strided_slice %6 {offsets = [0, 0], sizes = [2, 32], strides = [1, 1]} : vector<2x128xf32> to vector<2x32xf32>
    %8 = vector.shape_cast %7 : vector<2x32xf32> to vector<2x1x32xf32>
    %9 = vector.extract_strided_slice %6 {offsets = [0, 32], sizes = [2, 32], strides = [1, 1]} : vector<2x128xf32> to vector<2x32xf32>
    %10 = vector.shape_cast %9 : vector<2x32xf32> to vector<2x1x32xf32>
    %11 = vector.extract_strided_slice %6 {offsets = [0, 64], sizes = [2, 32], strides = [1, 1]} : vector<2x128xf32> to vector<2x32xf32>
    %12 = vector.shape_cast %11 : vector<2x32xf32> to vector<2x1x32xf32>
    %13 = vector.extract_strided_slice %6 {offsets = [0, 96], sizes = [2, 32], strides = [1, 1]} : vector<2x128xf32> to vector<2x32xf32>
    %14 = vector.shape_cast %13 : vector<2x32xf32> to vector<2x1x32xf32>
    %15 = tpu.concatenate %8, %10, %12, %14 in 1 : vector<2x1x32xf32>, vector<2x1x32xf32>, vector<2x1x32xf32>, vector<2x1x32xf32> -> vector<2x4x32xf32>
    %16 = vector.shape_cast %0 : vector<8x32xf32> to vector<1x8x32xf32>
    %17 = vector.shape_cast %16 : vector<1x8x32xf32> to vector<1x8x32xf32>
    %18 = vector.broadcast %17 : vector<1x8x32xf32> to vector<2x8x32xf32>
    %cst_5 = arith.constant 0.000000e+00 : f32
    %19 = vector.broadcast %cst_5 : f32 to vector<2x4x32xf32>
    %20 = tpu.concatenate %18, %15, %19 in 1 : vector<2x8x32xf32>, vector<2x4x32xf32>, vector<2x4x32xf32> -> vector<2x16x32xf32>
    %21 = vector.shape_cast %20 : vector<2x16x32xf32> to vector<32x32xf32>
    %22 = tpu.iota {dimensions = array<i32: 2>} : vector<16x16x16xi32>
    %c12_i32 = arith.constant 12 : i32
    %23 = vector.broadcast %c12_i32 : i32 to vector<16x16x16xi32>
    %24 = arith.cmpi slt, %22, %23 : vector<16x16x16xi32>
    %cst_6 = arith.constant 0.000000e+00 : f32
    %cst_7 = arith.constant -1.000000e+30 : f32
    %25 = vector.broadcast %cst_6 : f32 to vector<16x16x16xf32>
    %26 = vector.broadcast %cst_7 : f32 to vector<16x16x16xf32>
    %27 = arith.select %24, %25, %26 : vector<16x16x16xi1>, vector<16x16x16xf32>
    %c0_8 = arith.constant 0 : index
    %c0_9 = arith.constant 0 : index
    %c0_10 = arith.constant 0 : index
    %c0_11 = arith.constant 0 : index
    %28 = vector.load %arg2[%c0_8, %c0_9, %c0_10, %c0_11] : memref<2x8x32x12xf32, #tpu.memory_space<vmem>>, vector<1x8x32x12xf32>
    %29 = vector.shape_cast %28 : vector<1x8x32x12xf32> to vector<8x32x12xf32>
    %c0_12 = arith.constant 0 : index
    %c0_13 = arith.constant 0 : index
    %c0_14 = arith.constant 0 : index
    %30 = vector.load %arg3[%c0_12, %c0_13, %c0_14] : memref<2x96x32xf32, #tpu.memory_space<vmem>>, vector<1x96x32xf32>
    %31 = vector.shape_cast %30 : vector<1x96x32xf32> to vector<96x32xf32>
    %32 = vector.extract_strided_slice %31 {offsets = [0, 0], sizes = [32, 32], strides = [1, 1]} : vector<96x32xf32> to vector<32x32xf32>
    %33 = vector.extract_strided_slice %31 {offsets = [32, 0], sizes = [64, 32], strides = [1, 1]} : vector<96x32xf32> to vector<64x32xf32>
    %c0_15 = arith.constant 0 : index
    %c0_16 = arith.constant 0 : index
    %c0_17 = arith.constant 0 : index
    %34 = vector.load %arg4[%c0_15, %c0_16, %c0_17] : memref<2x40x64xf32, #tpu.memory_space<vmem>>, vector<1x40x64xf32>
    %35 = vector.shape_cast %34 : vector<1x40x64xf32> to vector<40x64xf32>
    %36 = vector.extract_strided_slice %35 {offsets = [0, 0], sizes = [32, 64], strides = [1, 1]} : vector<40x64xf32> to vector<32x64xf32>
    %37 = vector.extract_strided_slice %35 {offsets = [32, 0], sizes = [1, 32], strides = [1, 1]} : vector<40x64xf32> to vector<1x32xf32>
    %38 = vector.extract_strided_slice %35 {offsets = [33, 0], sizes = [1, 32], strides = [1, 1]} : vector<40x64xf32> to vector<1x32xf32>
    %39 = vector.extract_strided_slice %35 {offsets = [34, 0], sizes = [1, 32], strides = [1, 1]} : vector<40x64xf32> to vector<1x32xf32>
    %40 = vector.extract_strided_slice %35 {offsets = [35, 0], sizes = [1, 32], strides = [1, 1]} : vector<40x64xf32> to vector<1x32xf32>
    %41 = vector.extract_strided_slice %35 {offsets = [36, 0], sizes = [1, 32], strides = [1, 1]} : vector<40x64xf32> to vector<1x32xf32>
    %42 = vector.extract_strided_slice %35 {offsets = [37, 0], sizes = [1, 32], strides = [1, 1]} : vector<40x64xf32> to vector<1x32xf32>
    %43 = vector.extract_strided_slice %35 {offsets = [38, 0], sizes = [1, 64], strides = [1, 1]} : vector<40x64xf32> to vector<1x64xf32>
    %cst_18 = arith.constant dense<0.000000e+00> : vector<32xf32>
    %44 = vector.multi_reduction <add>, %21, %cst_18 [1] : vector<32x32xf32> to vector<32xf32>
    %45 = vector.shape_cast %44 : vector<32xf32> to vector<32x1xf32>
    %cst_19 = arith.constant 3.200000e+01 : f32
    %46 = vector.broadcast %cst_19 : f32 to vector<32x1xf32>
    %47 = arith.divf %45, %46 : vector<32x1xf32>
    %48 = arith.mulf %21, %21 : vector<32x32xf32>
    %cst_20 = arith.constant dense<0.000000e+00> : vector<32xf32>
    %49 = vector.multi_reduction <add>, %48, %cst_20 [1] : vector<32x32xf32> to vector<32xf32>
    %50 = vector.shape_cast %49 : vector<32xf32> to vector<32x1xf32>
    %cst_21 = arith.constant 3.200000e+01 : f32
    %51 = vector.broadcast %cst_21 : f32 to vector<32x1xf32>
    %52 = arith.divf %50, %51 : vector<32x1xf32>
    %53 = arith.mulf %47, %47 : vector<32x1xf32>
    %54 = arith.subf %52, %53 : vector<32x1xf32>
    %cst_22 = arith.constant 9.99999974E-6 : f32
    %55 = vector.broadcast %cst_22 : f32 to vector<32x1xf32>
    %56 = arith.addf %54, %55 : vector<32x1xf32>
    %57 = math.rsqrt %56 : vector<32x1xf32>
    %58 = vector.broadcast %47 : vector<32x1xf32> to vector<32x32xf32>
    %59 = arith.subf %21, %58 : vector<32x32xf32>
    %60 = vector.broadcast %57 : vector<32x1xf32> to vector<32x32xf32>
    %61 = vector.broadcast %37 : vector<1x32xf32> to vector<32x32xf32>
    %62 = arith.mulf %60, %61 : vector<32x32xf32>
    %63 = arith.mulf %59, %62 : vector<32x32xf32>
    %64 = vector.broadcast %38 : vector<1x32xf32> to vector<32x32xf32>
    %65 = arith.addf %63, %64 : vector<32x32xf32>
    %66 = vector.shape_cast %65 : vector<32x32xf32> to vector<1x32x32xf32>
    %67 = vector.shape_cast %66 : vector<1x32x32xf32> to vector<1x32x32xf32>
    %68 = vector.broadcast %67 : vector<1x32x32xf32> to vector<8x32x32xf32>
    "tpu.trace_start"() <{level = 10 : i32, message = "hnd,hdk->hnk"}> : () -> ()
    %cst_23 = arith.constant dense<0.000000e+00> : vector<8x32x12xf32>
    %69 = tpu.matmul %68, %29, %cst_23 {dimension_numbers = #tpu.dot_dimension_numbers<[2], [1], [1], [2], [0, 0, 0, 1, 1, 2], [0], [0]>} : vector<8x32x32xf32>, vector<8x32x12xf32>, vector<8x32x12xf32> -> vector<8x32x12xf32>
    "tpu.trace_stop"() : () -> ()
    %70 = vector.shape_cast %69 : vector<8x32x12xf32> to vector<16x16x12xf32>
    %71 = vector.extract_strided_slice %70 {offsets = [0, 0, 0], sizes = [16, 16, 4], strides = [1, 1, 1]} : vector<16x16x12xf32> to vector<16x16x4xf32>
    %72 = vector.extract_strided_slice %70 {offsets = [0, 0, 4], sizes = [16, 16, 4], strides = [1, 1, 1]} : vector<16x16x12xf32> to vector<16x16x4xf32>
    %73 = vector.extract_strided_slice %70 {offsets = [0, 0, 8], sizes = [16, 16, 4], strides = [1, 1, 1]} : vector<16x16x12xf32> to vector<16x16x4xf32>
    "tpu.trace_start"() <{level = 10 : i32, message = "bnd,bmd->bnm"}> : () -> ()
    %cst_24 = arith.constant dense<0.000000e+00> : vector<16x16x16xf32>
    %74 = tpu.matmul %71, %72, %cst_24 {dimension_numbers = #tpu.dot_dimension_numbers<[2], [2], [1], [1], [0, 0, 0, 1, 1, 1], [0], [0]>} : vector<16x16x4xf32>, vector<16x16x4xf32>, vector<16x16x16xf32> -> vector<16x16x16xf32>
    "tpu.trace_stop"() : () -> ()
    %cst_25 = arith.constant 5.000000e-01 : f32
    %75 = vector.broadcast %cst_25 : f32 to vector<16x16x16xf32>
    %76 = arith.mulf %74, %75 : vector<16x16x16xf32>
    %77 = arith.addf %76, %27 : vector<16x16x16xf32>
    %cst_26 = arith.constant dense<0xFF800000> : vector<16x16xf32>
    %78 = vector.multi_reduction <maximumf>, %77, %cst_26 [2] : vector<16x16x16xf32> to vector<16x16xf32>
    %79 = vector.shape_cast %78 : vector<16x16xf32> to vector<16x16x1xf32>
    %80 = vector.broadcast %79 : vector<16x16x1xf32> to vector<16x16x16xf32>
    %81 = arith.subf %77, %80 : vector<16x16x16xf32>
    %82 = math.exp %81 : vector<16x16x16xf32>
    %cst_27 = arith.constant dense<0.000000e+00> : vector<16x16xf32>
    %83 = vector.multi_reduction <add>, %82, %cst_27 [2] : vector<16x16x16xf32> to vector<16x16xf32>
    %84 = vector.shape_cast %83 : vector<16x16xf32> to vector<16x16x1xf32>
    %85 = tpu.reciprocal %84 {approx = true} : vector<16x16x1xf32> -> vector<16x16x1xf32>
    %86 = vector.broadcast %85 : vector<16x16x1xf32> to vector<16x16x16xf32>
    %87 = arith.mulf %82, %86 : vector<16x16x16xf32>
    "tpu.trace_start"() <{level = 10 : i32, message = "bnm,bmd->bnd"}> : () -> ()
    %cst_28 = arith.constant dense<0.000000e+00> : vector<16x16x4xf32>
    %88 = tpu.matmul %87, %73, %cst_28 {dimension_numbers = #tpu.dot_dimension_numbers<[2], [1], [1], [2], [0, 0, 0, 1, 1, 2], [0], [0]>} : vector<16x16x16xf32>, vector<16x16x4xf32>, vector<16x16x4xf32> -> vector<16x16x4xf32>
    "tpu.trace_stop"() : () -> ()
    %89 = vector.shape_cast %88 : vector<16x16x4xf32> to vector<8x32x4xf32>
    %90 = vector.extract_strided_slice %89 {offsets = [0, 0, 0], sizes = [1, 32, 4], strides = [1, 1, 1]} : vector<8x32x4xf32> to vector<1x32x4xf32>
    %91 = vector.shape_cast %90 : vector<1x32x4xf32> to vector<32x4xf32>
    %92 = vector.extract_strided_slice %89 {offsets = [1, 0, 0], sizes = [1, 32, 4], strides = [1, 1, 1]} : vector<8x32x4xf32> to vector<1x32x4xf32>
    %93 = vector.shape_cast %92 : vector<1x32x4xf32> to vector<32x4xf32>
    %94 = vector.extract_strided_slice %89 {offsets = [2, 0, 0], sizes = [1, 32, 4], strides = [1, 1, 1]} : vector<8x32x4xf32> to vector<1x32x4xf32>
    %95 = vector.shape_cast %94 : vector<1x32x4xf32> to vector<32x4xf32>
    %96 = vector.extract_strided_slice %89 {offsets = [3, 0, 0], sizes = [1, 32, 4], strides = [1, 1, 1]} : vector<8x32x4xf32> to vector<1x32x4xf32>
    %97 = vector.shape_cast %96 : vector<1x32x4xf32> to vector<32x4xf32>
    %98 = vector.extract_strided_slice %89 {offsets = [4, 0, 0], sizes = [1, 32, 4], strides = [1, 1, 1]} : vector<8x32x4xf32> to vector<1x32x4xf32>
    %99 = vector.shape_cast %98 : vector<1x32x4xf32> to vector<32x4xf32>
    %100 = vector.extract_strided_slice %89 {offsets = [5, 0, 0], sizes = [1, 32, 4], strides = [1, 1, 1]} : vector<8x32x4xf32> to vector<1x32x4xf32>
    %101 = vector.shape_cast %100 : vector<1x32x4xf32> to vector<32x4xf32>
    %102 = vector.extract_strided_slice %89 {offsets = [6, 0, 0], sizes = [1, 32, 4], strides = [1, 1, 1]} : vector<8x32x4xf32> to vector<1x32x4xf32>
    %103 = vector.shape_cast %102 : vector<1x32x4xf32> to vector<32x4xf32>
    %104 = vector.extract_strided_slice %89 {offsets = [7, 0, 0], sizes = [1, 32, 4], strides = [1, 1, 1]} : vector<8x32x4xf32> to vector<1x32x4xf32>
    %105 = vector.shape_cast %104 : vector<1x32x4xf32> to vector<32x4xf32>
    %106 = tpu.concatenate %91, %93, %95, %97, %99, %101, %103, %105 in 1 : vector<32x4xf32>, vector<32x4xf32>, vector<32x4xf32>, vector<32x4xf32>, vector<32x4xf32>, vector<32x4xf32>, vector<32x4xf32>, vector<32x4xf32> -> vector<32x32xf32>
    %cst_29 = arith.constant dense<0.000000e+00> : vector<32x32xf32>
    %107 = tpu.matmul %106, %32, %cst_29 {dimension_numbers = #tpu.dot_dimension_numbers<[1], [0], [0], [1], [0, 0, 1, 1], [], []>} : vector<32x32xf32>, vector<32x32xf32>, vector<32x32xf32> -> vector<32x32xf32>
    %108 = arith.addf %21, %107 : vector<32x32xf32>
    %109 = vector.broadcast %41 : vector<1x32xf32> to vector<32x32xf32>
    %110 = arith.addf %108, %109 : vector<32x32xf32>
    %cst_30 = arith.constant dense<0.000000e+00> : vector<32xf32>
    %111 = vector.multi_reduction <add>, %110, %cst_30 [1] : vector<32x32xf32> to vector<32xf32>
    %112 = vector.shape_cast %111 : vector<32xf32> to vector<32x1xf32>
    %cst_31 = arith.constant 3.200000e+01 : f32
    %113 = vector.broadcast %cst_31 : f32 to vector<32x1xf32>
    %114 = arith.divf %112, %113 : vector<32x1xf32>
    %115 = arith.mulf %110, %110 : vector<32x32xf32>
    %cst_32 = arith.constant dense<0.000000e+00> : vector<32xf32>
    %116 = vector.multi_reduction <add>, %115, %cst_32 [1] : vector<32x32xf32> to vector<32xf32>
    %117 = vector.shape_cast %116 : vector<32xf32> to vector<32x1xf32>
    %cst_33 = arith.constant 3.200000e+01 : f32
    %118 = vector.broadcast %cst_33 : f32 to vector<32x1xf32>
    %119 = arith.divf %117, %118 : vector<32x1xf32>
    %120 = arith.mulf %114, %114 : vector<32x1xf32>
    %121 = arith.subf %119, %120 : vector<32x1xf32>
    %cst_34 = arith.constant 9.99999974E-6 : f32
    %122 = vector.broadcast %cst_34 : f32 to vector<32x1xf32>
    %123 = arith.addf %121, %122 : vector<32x1xf32>
    %124 = math.rsqrt %123 : vector<32x1xf32>
    %125 = vector.broadcast %114 : vector<32x1xf32> to vector<32x32xf32>
    %126 = arith.subf %110, %125 : vector<32x32xf32>
    %127 = vector.broadcast %124 : vector<32x1xf32> to vector<32x32xf32>
    %128 = vector.broadcast %39 : vector<1x32xf32> to vector<32x32xf32>
    %129 = arith.mulf %127, %128 : vector<32x32xf32>
    %130 = arith.mulf %126, %129 : vector<32x32xf32>
    %131 = vector.broadcast %40 : vector<1x32xf32> to vector<32x32xf32>
    %132 = arith.addf %130, %131 : vector<32x32xf32>
    %cst_35 = arith.constant dense<0.000000e+00> : vector<32x64xf32>
    %133 = tpu.matmul %132, %36, %cst_35 {dimension_numbers = #tpu.dot_dimension_numbers<[1], [0], [0], [1], [0, 0, 1, 1], [], []>} : vector<32x32xf32>, vector<32x64xf32>, vector<32x64xf32> -> vector<32x64xf32>
    %134 = vector.broadcast %43 : vector<1x64xf32> to vector<32x64xf32>
    %135 = arith.addf %133, %134 : vector<32x64xf32>
    %cst_36 = arith.constant 0.000000e+00 : f32
    %136 = vector.broadcast %cst_36 : f32 to vector<32x64xf32>
    %137 = arith.maximumf %135, %136 : vector<32x64xf32>
    %cst_37 = arith.constant dense<0.000000e+00> : vector<32x32xf32>
    %138 = tpu.matmul %137, %33, %cst_37 {dimension_numbers = #tpu.dot_dimension_numbers<[1], [0], [0], [1], [0, 0, 1, 1], [], []>} : vector<32x64xf32>, vector<64x32xf32>, vector<32x32xf32> -> vector<32x32xf32>
    %139 = vector.broadcast %42 : vector<1x32xf32> to vector<32x32xf32>
    %140 = arith.addf %138, %139 : vector<32x32xf32>
    %141 = arith.addf %110, %140 : vector<32x32xf32>
    %c1 = arith.constant 1 : index
    %c0_38 = arith.constant 0 : index
    %c0_39 = arith.constant 0 : index
    %c0_40 = arith.constant 0 : index
    %142 = vector.load %arg2[%c1, %c0_38, %c0_39, %c0_40] : memref<2x8x32x12xf32, #tpu.memory_space<vmem>>, vector<1x8x32x12xf32>
    %143 = vector.shape_cast %142 : vector<1x8x32x12xf32> to vector<8x32x12xf32>
    %c1_41 = arith.constant 1 : index
    %c0_42 = arith.constant 0 : index
    %c0_43 = arith.constant 0 : index
    %144 = vector.load %arg3[%c1_41, %c0_42, %c0_43] : memref<2x96x32xf32, #tpu.memory_space<vmem>>, vector<1x96x32xf32>
    %145 = vector.shape_cast %144 : vector<1x96x32xf32> to vector<96x32xf32>
    %146 = vector.extract_strided_slice %145 {offsets = [0, 0], sizes = [32, 32], strides = [1, 1]} : vector<96x32xf32> to vector<32x32xf32>
    %147 = vector.extract_strided_slice %145 {offsets = [32, 0], sizes = [64, 32], strides = [1, 1]} : vector<96x32xf32> to vector<64x32xf32>
    %c1_44 = arith.constant 1 : index
    %c0_45 = arith.constant 0 : index
    %c0_46 = arith.constant 0 : index
    %148 = vector.load %arg4[%c1_44, %c0_45, %c0_46] : memref<2x40x64xf32, #tpu.memory_space<vmem>>, vector<1x40x64xf32>
    %149 = vector.shape_cast %148 : vector<1x40x64xf32> to vector<40x64xf32>
    %150 = vector.extract_strided_slice %149 {offsets = [0, 0], sizes = [32, 64], strides = [1, 1]} : vector<40x64xf32> to vector<32x64xf32>
    %151 = vector.extract_strided_slice %149 {offsets = [32, 0], sizes = [1, 32], strides = [1, 1]} : vector<40x64xf32> to vector<1x32xf32>
    %152 = vector.extract_strided_slice %149 {offsets = [33, 0], sizes = [1, 32], strides = [1, 1]} : vector<40x64xf32> to vector<1x32xf32>
    %153 = vector.extract_strided_slice %149 {offsets = [34, 0], sizes = [1, 32], strides = [1, 1]} : vector<40x64xf32> to vector<1x32xf32>
    %154 = vector.extract_strided_slice %149 {offsets = [35, 0], sizes = [1, 32], strides = [1, 1]} : vector<40x64xf32> to vector<1x32xf32>
    %155 = vector.extract_strided_slice %149 {offsets = [36, 0], sizes = [1, 32], strides = [1, 1]} : vector<40x64xf32> to vector<1x32xf32>
    %156 = vector.extract_strided_slice %149 {offsets = [37, 0], sizes = [1, 32], strides = [1, 1]} : vector<40x64xf32> to vector<1x32xf32>
    %157 = vector.extract_strided_slice %149 {offsets = [38, 0], sizes = [1, 64], strides = [1, 1]} : vector<40x64xf32> to vector<1x64xf32>
    %cst_47 = arith.constant dense<0.000000e+00> : vector<32xf32>
    %158 = vector.multi_reduction <add>, %141, %cst_47 [1] : vector<32x32xf32> to vector<32xf32>
    %159 = vector.shape_cast %158 : vector<32xf32> to vector<32x1xf32>
    %cst_48 = arith.constant 3.200000e+01 : f32
    %160 = vector.broadcast %cst_48 : f32 to vector<32x1xf32>
    %161 = arith.divf %159, %160 : vector<32x1xf32>
    %162 = arith.mulf %141, %141 : vector<32x32xf32>
    %cst_49 = arith.constant dense<0.000000e+00> : vector<32xf32>
    %163 = vector.multi_reduction <add>, %162, %cst_49 [1] : vector<32x32xf32> to vector<32xf32>
    %164 = vector.shape_cast %163 : vector<32xf32> to vector<32x1xf32>
    %cst_50 = arith.constant 3.200000e+01 : f32
    %165 = vector.broadcast %cst_50 : f32 to vector<32x1xf32>
    %166 = arith.divf %164, %165 : vector<32x1xf32>
    %167 = arith.mulf %161, %161 : vector<32x1xf32>
    %168 = arith.subf %166, %167 : vector<32x1xf32>
    %cst_51 = arith.constant 9.99999974E-6 : f32
    %169 = vector.broadcast %cst_51 : f32 to vector<32x1xf32>
    %170 = arith.addf %168, %169 : vector<32x1xf32>
    %171 = math.rsqrt %170 : vector<32x1xf32>
    %172 = vector.broadcast %161 : vector<32x1xf32> to vector<32x32xf32>
    %173 = arith.subf %141, %172 : vector<32x32xf32>
    %174 = vector.broadcast %171 : vector<32x1xf32> to vector<32x32xf32>
    %175 = vector.broadcast %151 : vector<1x32xf32> to vector<32x32xf32>
    %176 = arith.mulf %174, %175 : vector<32x32xf32>
    %177 = arith.mulf %173, %176 : vector<32x32xf32>
    %178 = vector.broadcast %152 : vector<1x32xf32> to vector<32x32xf32>
    %179 = arith.addf %177, %178 : vector<32x32xf32>
    %180 = vector.shape_cast %179 : vector<32x32xf32> to vector<1x32x32xf32>
    %181 = vector.shape_cast %180 : vector<1x32x32xf32> to vector<1x32x32xf32>
    %182 = vector.broadcast %181 : vector<1x32x32xf32> to vector<8x32x32xf32>
    "tpu.trace_start"() <{level = 10 : i32, message = "hnd,hdk->hnk"}> : () -> ()
    %cst_52 = arith.constant dense<0.000000e+00> : vector<8x32x12xf32>
    %183 = tpu.matmul %182, %143, %cst_52 {dimension_numbers = #tpu.dot_dimension_numbers<[2], [1], [1], [2], [0, 0, 0, 1, 1, 2], [0], [0]>} : vector<8x32x32xf32>, vector<8x32x12xf32>, vector<8x32x12xf32> -> vector<8x32x12xf32>
    "tpu.trace_stop"() : () -> ()
    %184 = vector.shape_cast %183 : vector<8x32x12xf32> to vector<16x16x12xf32>
    %185 = vector.extract_strided_slice %184 {offsets = [0, 0, 0], sizes = [16, 16, 4], strides = [1, 1, 1]} : vector<16x16x12xf32> to vector<16x16x4xf32>
    %186 = vector.extract_strided_slice %184 {offsets = [0, 0, 4], sizes = [16, 16, 4], strides = [1, 1, 1]} : vector<16x16x12xf32> to vector<16x16x4xf32>
    %187 = vector.extract_strided_slice %184 {offsets = [0, 0, 8], sizes = [16, 16, 4], strides = [1, 1, 1]} : vector<16x16x12xf32> to vector<16x16x4xf32>
    "tpu.trace_start"() <{level = 10 : i32, message = "bnd,bmd->bnm"}> : () -> ()
    %cst_53 = arith.constant dense<0.000000e+00> : vector<16x16x16xf32>
    %188 = tpu.matmul %185, %186, %cst_53 {dimension_numbers = #tpu.dot_dimension_numbers<[2], [2], [1], [1], [0, 0, 0, 1, 1, 1], [0], [0]>} : vector<16x16x4xf32>, vector<16x16x4xf32>, vector<16x16x16xf32> -> vector<16x16x16xf32>
    "tpu.trace_stop"() : () -> ()
    %cst_54 = arith.constant 5.000000e-01 : f32
    %189 = vector.broadcast %cst_54 : f32 to vector<16x16x16xf32>
    %190 = arith.mulf %188, %189 : vector<16x16x16xf32>
    %191 = arith.addf %190, %27 : vector<16x16x16xf32>
    %cst_55 = arith.constant dense<0xFF800000> : vector<16x16xf32>
    %192 = vector.multi_reduction <maximumf>, %191, %cst_55 [2] : vector<16x16x16xf32> to vector<16x16xf32>
    %193 = vector.shape_cast %192 : vector<16x16xf32> to vector<16x16x1xf32>
    %194 = vector.broadcast %193 : vector<16x16x1xf32> to vector<16x16x16xf32>
    %195 = arith.subf %191, %194 : vector<16x16x16xf32>
    %196 = math.exp %195 : vector<16x16x16xf32>
    %cst_56 = arith.constant dense<0.000000e+00> : vector<16x16xf32>
    %197 = vector.multi_reduction <add>, %196, %cst_56 [2] : vector<16x16x16xf32> to vector<16x16xf32>
    %198 = vector.shape_cast %197 : vector<16x16xf32> to vector<16x16x1xf32>
    %199 = tpu.reciprocal %198 {approx = true} : vector<16x16x1xf32> -> vector<16x16x1xf32>
    %200 = vector.broadcast %199 : vector<16x16x1xf32> to vector<16x16x16xf32>
    %201 = arith.mulf %196, %200 : vector<16x16x16xf32>
    "tpu.trace_start"() <{level = 10 : i32, message = "bnm,bmd->bnd"}> : () -> ()
    %cst_57 = arith.constant dense<0.000000e+00> : vector<16x16x4xf32>
    %202 = tpu.matmul %201, %187, %cst_57 {dimension_numbers = #tpu.dot_dimension_numbers<[2], [1], [1], [2], [0, 0, 0, 1, 1, 2], [0], [0]>} : vector<16x16x16xf32>, vector<16x16x4xf32>, vector<16x16x4xf32> -> vector<16x16x4xf32>
    "tpu.trace_stop"() : () -> ()
    %203 = vector.shape_cast %202 : vector<16x16x4xf32> to vector<8x32x4xf32>
    %204 = vector.extract_strided_slice %203 {offsets = [0, 0, 0], sizes = [1, 32, 4], strides = [1, 1, 1]} : vector<8x32x4xf32> to vector<1x32x4xf32>
    %205 = vector.shape_cast %204 : vector<1x32x4xf32> to vector<32x4xf32>
    %206 = vector.extract_strided_slice %203 {offsets = [1, 0, 0], sizes = [1, 32, 4], strides = [1, 1, 1]} : vector<8x32x4xf32> to vector<1x32x4xf32>
    %207 = vector.shape_cast %206 : vector<1x32x4xf32> to vector<32x4xf32>
    %208 = vector.extract_strided_slice %203 {offsets = [2, 0, 0], sizes = [1, 32, 4], strides = [1, 1, 1]} : vector<8x32x4xf32> to vector<1x32x4xf32>
    %209 = vector.shape_cast %208 : vector<1x32x4xf32> to vector<32x4xf32>
    %210 = vector.extract_strided_slice %203 {offsets = [3, 0, 0], sizes = [1, 32, 4], strides = [1, 1, 1]} : vector<8x32x4xf32> to vector<1x32x4xf32>
    %211 = vector.shape_cast %210 : vector<1x32x4xf32> to vector<32x4xf32>
    %212 = vector.extract_strided_slice %203 {offsets = [4, 0, 0], sizes = [1, 32, 4], strides = [1, 1, 1]} : vector<8x32x4xf32> to vector<1x32x4xf32>
    %213 = vector.shape_cast %212 : vector<1x32x4xf32> to vector<32x4xf32>
    %214 = vector.extract_strided_slice %203 {offsets = [5, 0, 0], sizes = [1, 32, 4], strides = [1, 1, 1]} : vector<8x32x4xf32> to vector<1x32x4xf32>
    %215 = vector.shape_cast %214 : vector<1x32x4xf32> to vector<32x4xf32>
    %216 = vector.extract_strided_slice %203 {offsets = [6, 0, 0], sizes = [1, 32, 4], strides = [1, 1, 1]} : vector<8x32x4xf32> to vector<1x32x4xf32>
    %217 = vector.shape_cast %216 : vector<1x32x4xf32> to vector<32x4xf32>
    %218 = vector.extract_strided_slice %203 {offsets = [7, 0, 0], sizes = [1, 32, 4], strides = [1, 1, 1]} : vector<8x32x4xf32> to vector<1x32x4xf32>
    %219 = vector.shape_cast %218 : vector<1x32x4xf32> to vector<32x4xf32>
    %220 = tpu.concatenate %205, %207, %209, %211, %213, %215, %217, %219 in 1 : vector<32x4xf32>, vector<32x4xf32>, vector<32x4xf32>, vector<32x4xf32>, vector<32x4xf32>, vector<32x4xf32>, vector<32x4xf32>, vector<32x4xf32> -> vector<32x32xf32>
    %cst_58 = arith.constant dense<0.000000e+00> : vector<32x32xf32>
    %221 = tpu.matmul %220, %146, %cst_58 {dimension_numbers = #tpu.dot_dimension_numbers<[1], [0], [0], [1], [0, 0, 1, 1], [], []>} : vector<32x32xf32>, vector<32x32xf32>, vector<32x32xf32> -> vector<32x32xf32>
    %222 = arith.addf %141, %221 : vector<32x32xf32>
    %223 = vector.broadcast %155 : vector<1x32xf32> to vector<32x32xf32>
    %224 = arith.addf %222, %223 : vector<32x32xf32>
    %cst_59 = arith.constant dense<0.000000e+00> : vector<32xf32>
    %225 = vector.multi_reduction <add>, %224, %cst_59 [1] : vector<32x32xf32> to vector<32xf32>
    %226 = vector.shape_cast %225 : vector<32xf32> to vector<32x1xf32>
    %cst_60 = arith.constant 3.200000e+01 : f32
    %227 = vector.broadcast %cst_60 : f32 to vector<32x1xf32>
    %228 = arith.divf %226, %227 : vector<32x1xf32>
    %229 = arith.mulf %224, %224 : vector<32x32xf32>
    %cst_61 = arith.constant dense<0.000000e+00> : vector<32xf32>
    %230 = vector.multi_reduction <add>, %229, %cst_61 [1] : vector<32x32xf32> to vector<32xf32>
    %231 = vector.shape_cast %230 : vector<32xf32> to vector<32x1xf32>
    %cst_62 = arith.constant 3.200000e+01 : f32
    %232 = vector.broadcast %cst_62 : f32 to vector<32x1xf32>
    %233 = arith.divf %231, %232 : vector<32x1xf32>
    %234 = arith.mulf %228, %228 : vector<32x1xf32>
    %235 = arith.subf %233, %234 : vector<32x1xf32>
    %cst_63 = arith.constant 9.99999974E-6 : f32
    %236 = vector.broadcast %cst_63 : f32 to vector<32x1xf32>
    %237 = arith.addf %235, %236 : vector<32x1xf32>
    %238 = math.rsqrt %237 : vector<32x1xf32>
    %239 = vector.broadcast %228 : vector<32x1xf32> to vector<32x32xf32>
    %240 = arith.subf %224, %239 : vector<32x32xf32>
    %241 = vector.broadcast %238 : vector<32x1xf32> to vector<32x32xf32>
    %242 = vector.broadcast %153 : vector<1x32xf32> to vector<32x32xf32>
    %243 = arith.mulf %241, %242 : vector<32x32xf32>
    %244 = arith.mulf %240, %243 : vector<32x32xf32>
    %245 = vector.broadcast %154 : vector<1x32xf32> to vector<32x32xf32>
    %246 = arith.addf %244, %245 : vector<32x32xf32>
    %cst_64 = arith.constant dense<0.000000e+00> : vector<32x64xf32>
    %247 = tpu.matmul %246, %150, %cst_64 {dimension_numbers = #tpu.dot_dimension_numbers<[1], [0], [0], [1], [0, 0, 1, 1], [], []>} : vector<32x32xf32>, vector<32x64xf32>, vector<32x64xf32> -> vector<32x64xf32>
    %248 = vector.broadcast %157 : vector<1x64xf32> to vector<32x64xf32>
    %249 = arith.addf %247, %248 : vector<32x64xf32>
    %cst_65 = arith.constant 0.000000e+00 : f32
    %250 = vector.broadcast %cst_65 : f32 to vector<32x64xf32>
    %251 = arith.maximumf %249, %250 : vector<32x64xf32>
    %cst_66 = arith.constant dense<0.000000e+00> : vector<32x32xf32>
    %252 = tpu.matmul %251, %147, %cst_66 {dimension_numbers = #tpu.dot_dimension_numbers<[1], [0], [0], [1], [0, 0, 1, 1], [], []>} : vector<32x64xf32>, vector<64x32xf32>, vector<32x32xf32> -> vector<32x32xf32>
    %253 = vector.broadcast %156 : vector<1x32xf32> to vector<32x32xf32>
    %254 = arith.addf %252, %253 : vector<32x32xf32>
    %255 = arith.addf %224, %254 : vector<32x32xf32>
    %256 = vector.shape_cast %255 : vector<32x32xf32> to vector<2x16x32xf32>
    %257 = vector.extract_strided_slice %256 {offsets = [0, 0, 0], sizes = [2, 8, 32], strides = [1, 1, 1]} : vector<2x16x32xf32> to vector<2x8x32xf32>
    %258 = vector.shape_cast %257 : vector<2x8x32xf32> to vector<16x32xf32>
    %c0_67 = arith.constant 0 : index
    %c0_68 = arith.constant 0 : index
    %259 = vector.load %arg5[%c0_67, %c0_68] : memref<16x32xf32, #tpu.memory_space<vmem>>, vector<16x32xf32>
    tpu.vector_store %arg5[%c0_67, %c0_68], %258 {strides = array<i32>} : memref<16x32xf32, #tpu.memory_space<vmem>>, vector<16x32xf32>,
    return
  }
}

</mosaic_0001>

<bundles_post_ra>
// kernel: transformer_mapper_forward.1
= control target key start
LH: loop header
LB: loop body
LE: loop exit
PB: predicated region body
PF: predicated region fallthrough
CT: control target
= control target key end

     0   :  { %vm27_vm0 = vcmask 130048   ;;  %s7916_s0 = inlined_call_operand.vmem [shape: f32[2,16], index: 0, kind: input, shape index: {}]   ;;  %s7917_s1 = inlined_call_operand.vmem [shape: f32[25,128], index: 1, kind: input, shape index: {}]   ;;  %s7918_s2 = inlined_call_operand.vmem [shape: f32[2,8,32,12], index: 2, kind: input, shape index: {}]   ;;  %s7919_s3 = inlined_call_operand.vmem [shape: f32[2,96,32], index: 3, kind: input, shape index: {}]   ;;  %s7920_s4 = inlined_call_operand.vmem [shape: f32[2,40,64], index: 4, kind: input, shape index: {}]   ;;  %s7921_s5 = inlined_call_operand.hbm [shape: f32[16,32], index: 5, kind: output, shape index: {}]  }
   0x1   :  { %v23_v0 = vld [vmem:[%s7917_s1 + $0x10] sm:$0xff]  ;;  %v22_v1 = vld [vmem:[%s7917_s1 + $0x8] sm:$0xff]  ;;  %v25_v2 = vld [vmem:[%s7916_s0] sm:$0x3] }
   0x2   :  { %45 = vmatpush.msra.mxu0 %v23_v0 }
   0x3   :  { %10 = vsyncpa [#allocation3], 0  ;;  %v5311_v3 = vld [vmem:[%s7917_s1 + $0x18] ss:$0 sm:$0xff]  ;;  %s5629_s26 = smov 32   ;;  %s5630_s27 = smov 96  }
   0x4   :  { %46 = vmatpush.msra.mxu0 %v22_v1  ;;  %s5631_s0 = smov 64   ;;  %v5691_v9 = vld [vmem:[%s7917_s1] sm:$0xff]  ;;  %vm139_vm1 = vcmask 261120   ;;  %vm74_vm2 = vcmask 1040384   ;;  %vm77_vm3 = vcmask 1041408   ;;  %vm80_vm4 = vcmask 1042432  }
   0x5   :  { %4805 = vmatmul.msk.f32.vlgmr.msra.gmra.mxu0 %vm27_vm0, %v25_v2  ;;  %v140_v10 = vsel %vm139_vm1, %v5691_v9, 0.0  ;;  %v159_v11 = vmul.f32 %v5691_v9, %v5691_v9  ;;  %vm83_vm5 = vcmask 1043456   ;;  %v5632_v33 = vmov 32.0   ;;  %v105_v42 = vld [vmem:[%s7918_s2 + $0x78] sm:$0xff]  ;;  %v104_v46 = vld [vmem:[%s7918_s2 + $0x70] sm:$0xff]  ;;  %v138_v55 = vld [vmem:[%s7920_s4 + $0x20] sm:$0xff] }
   0x6   :  { %5312 = vrcp.f32 %v5632_v33  ;;  %v93_v43 = vld [vmem:[%s7918_s2 + $0x18] sm:$0xff]  ;;  %335 = vmatpush.msrb.mxu0 %v105_v42  ;;  %v5734_v58 = vperm.slane %v138_v55, 0  ;;  %v5737_v62 = vperm.slane %v138_v55, 1  ;;  %v92_v1 = vld [vmem:[%s7918_s2 + $0x10] sm:$0xff]  ;;  %s5633_s19 = smov 124   ;;  %s5634_s20 = smov 120  }
   0x7   :  { %v162_v12 = vsel %vm139_vm1, %v159_v11, 0.0  ;;  %v97_v44 = vld [vmem:[%s7918_s2 + $0x38] sm:$0xff]  ;;  %248 = vmatpush.msra.mxu1 %v93_v43  ;;  %v96_v2 = vld [vmem:[%s7918_s2 + $0x30] sm:$0xff]  ;;  %v94_v11 = vld [vmem:[%s7918_s2 + $0x20] sm:$0xff]  ;;  %s5636_s21 = smov 4   ;;  %s5637_s22 = smov 8  }
   0x8   :  { %v101_v45 = vld [vmem:[%s7918_s2 + $0x58] sm:$0xff]  ;;  %277 = vmatpush.msra.mxu2 %v97_v44  ;;  %336 = vmatpush.msrb.mxu0 %v104_v46  ;;  %v116_v43 = vld [vmem:[%s7918_s2 + $0xd0] sm:$0xff]  ;;  %v111_v46 = vld [vmem:[%s7918_s2 + $0xa8] sm:$0xff]  ;;  %s5638_s23 = smov 12   ;;  %s5639_s24 = smov 16  }
   0x9   :  { %306 = vmatpush.msra.mxu3 %v101_v45  ;;  %249 = vmatpush.msra.mxu1 %v92_v1  ;;  %v120_v44 = vld [vmem:[%s7918_s2 + $0xf0] sm:$0xff]  ;;  %v107_v45 = vld [vmem:[%s7918_s2 + $0x88] sm:$0xff]  ;;  %s5640_s25 = smov 20   ;;  %s5644_s14 = smov 128  }
   0xa   :  { %278 = vmatpush.msra.mxu2 %v96_v2 }
   0xc   :  { %v5313_v34 = vpop.eup %5312 }
   0xd   :  { %v150_v35 = vmul.f32 32.0, %v5313_v34  ;;  %vm154_vm6 = vweird.f32 %v5313_v34 }
   0xf   :  { %v151_v36 = vsub.f32 1.0, %v150_v35  ;;  %v113_v35 = vld [vmem:[%s7918_s2 + $0xb8] sm:$0xff] }
  0x11   :  { %v152_v37 = vmul.f32 %v5313_v34, %v151_v36  ;;  %v117_v36 = vld [vmem:[%s7918_s2 + $0xd8] sm:$0xff] }
  0x13   :  { %v153_v38 = vadd.f32 %v5313_v34, %v152_v37  ;;  %v121_v37 = vld [vmem:[%s7918_s2 + $0xf8] sm:$0xff] }
  0x15   :  { %v5712_v39 = vsel %vm154_vm6, %v5313_v34, %v153_v38  ;;  %v109_v34 = vld [vmem:[%s7918_s2 + $0x98] sm:$0xff]  ;;  %v108_v38 = vld [vmem:[%s7918_s2 + $0x90] sm:$0xff]  ;;  %vm2167_vm6 = vcmask 162816  }
  0x82   :  { %v48_v4 = vpop.f32.mrf.mxu0 }
  0x83   :  { %v49_v5 = vadd.f32 %v5311_v3, %v48_v4  ;;  %v100_v3 = vld [vmem:[%s7918_s2 + $0x50] sm:$0xff]  ;;  %v103_v4 = vld [vmem:[%s7918_s2 + $0x68] sm:$0xff] }
  0x84   :  { %307 = vmatpush.msra.mxu3 %v100_v3  ;;  %337 = vmatpush.msrb.mxu0 %v103_v4 }
  0x85   :  { %v54_v6 = vperm.slane %v49_v5, 0  ;;  %v52_v7 = vrot.slane %v49_v5, 1 }
  0x87   :  { %68 = vrot.lane.b32.xlu1 %v54_v6, %s5629_s26  ;;  %56 = vrot.lane.b32.xlu0 %v54_v6, %s5630_s27  ;;  %v55_v8 = vperm.slane %v52_v7, 0 }
  0x89   :  { %64 = vrot.lane.b32.xlu2 %v55_v8, %s5631_s0 }
  0x8f   :  { %62 = vrot.lane.b32.xlu0 %v54_v6, %s5631_s0  ;;  %58 = vrot.lane.b32.xlu1 %v55_v8, %s5630_s27  ;;  %v91_v6 = vld [vmem:[%s7918_s2 + $0x8] sm:$0xff]  ;;  %s5642_s27 = smov 28  }
  0x90   :  { %250 = vmatpush.msra.mxu1 %v91_v6 }
  0x91   :  { %70 = vrot.lane.b32.xlu2 %v55_v8, %s5629_s26  ;;  %v99_v8 = vld [vmem:[%s7918_s2 + $0x48] sm:$0xff]  ;;  %s5641_s26 = smov 24  }
  0x92   :  { %308 = vmatpush.msra.mxu3 %v99_v8 }
  0xb9   :  { %141 = vadd.xlane.f32.xlu0 %v140_v10  ;;  %163 = vadd.xlane.f32.xlu1 %v162_v12  ;;  %v90_v10 = vld [vmem:[%s7918_s2] sm:$0xff] }
  0xba   :  { %v98_v12 = vld [vmem:[%s7918_s2 + $0x40] sm:$0xff]  ;;  %251 = vmatpush.msra.mxu1 %v90_v10 }
  0xbb   :  { %309 = vmatpush.msra.mxu3 %v98_v12 }
  0xbc   :  { %364 = vmatpush.msrb.mxu1 %v109_v34 }
  0xbd   :  { %422 = vmatpush.msrb.mxu3 %v117_v36 }
  0xbe   :  { %365 = vmatpush.msrb.mxu1 %v108_v38 }
  0xbf   :  { %423 = vmatpush.msrb.mxu3 %v116_v43 }
  0xc0   :  { %366 = vmatpush.msrb.mxu1 %v107_v45 }
  0xe3   :  { %v65_v13 = vpop.permute.xlu2 %64 }
  0xeb   :  { %v71_v21 = vpop.permute.xlu2 %70 }
  0xf9   :  { %v69_v14 = vpop.permute.xlu1 %68  ;;  %v57_v15 = vpop.permute.xlu0 %56 }
  0xfa   :  { %v75_v16 = vsel %vm74_vm2, %v49_v5, %v57_v15 }
 0x101   :  { %v63_v17 = vpop.permute.xlu0 %62  ;;  %v59_v18 = vpop.permute.xlu1 %58 }
 0x102   :  { %v78_v19 = vsel %vm77_vm3, %v75_v16, %v63_v17  ;;  %v76_v20 = vsel %vm74_vm2, %v52_v7, %v59_v18  ;;  %v95_v7 = vld [vmem:[%s7918_s2 + $0x28] sm:$0xff]  ;;  %vm474_vm2 = vcmask 31744  }
 0x103   :  { %v81_v22 = vsel %vm80_vm4, %v78_v19, %v69_v14  ;;  %v79_v23 = vsel %vm77_vm3, %v76_v20, %v65_v13  ;;  %279 = vmatpush.msra.mxu2 %v95_v7 }
 0x104   :  { %v5698_v24 = vsel %vm83_vm5, %v81_v22, 0.0  ;;  %v82_v25 = vsel %vm80_vm4, %v79_v23, %v71_v21  ;;  %vm2153_vm4 = vcmask 64512  }
 0x105   :  { %v143_v26 = vsel %vm139_vm1, %v5698_v24, 0.0  ;;  %v5702_v27 = vsel %vm83_vm5, %v82_v25, 0.0  ;;  %v160_v31 = vmul.f32 %v5698_v24, %v5698_v24  ;;  %280 = vmatpush.msra.mxu2 %v94_v11  ;;  %vm2158_vm5 = vcmask 97280  }
 0x106   :  { %144 = vadd.xlane.f32.xlu2 %v143_v26  ;;  %v146_v28 = vsel %vm139_vm1, %v5702_v27, 0.0  ;;  %v161_v29 = vmul.f32 %v5702_v27, %v5702_v27 }
 0x107   :  { %147 = vadd.xlane.f32.xlu0 %v146_v28  ;;  %v165_v32 = vsel %vm139_vm1, %v160_v31, 0.0  ;;  %393 = vmatpush.msrb.mxu2 %v113_v35 }
 0x108   :  { %v168_v30 = vsel %vm139_vm1, %v161_v29, 0.0 }
 0x109   :  { %169 = vadd.xlane.f32.xlu1 %v168_v30 }
 0x10e   :  { %166 = vadd.xlane.f32.xlu2 %v165_v32 }
 0x12c   :  { %v142_v40 = vpop.xlane.xlu0 %141  ;;  %v164_v48 = vpop.xlane.xlu1 %163 }
 0x12d   :  { %v156_v41 = vmul.f32 %v5712_v39, %v142_v40  ;;  %v171_v49 = vmul.f32 %v164_v48, %v5712_v39  ;;  %v112_v40 = vld [vmem:[%s7918_s2 + $0xb0] sm:$0xff]  ;;  %v119_v48 = vld [vmem:[%s7918_s2 + $0xe8] sm:$0xff] }
 0x12e   :  { %394 = vmatpush.msrb.mxu2 %v112_v40 }
 0x12f   :  { %v174_v47 = vmul.f32 %v156_v41, %v156_v41  ;;  %v213_v60 = vsub.f32 %v5691_v9, %v156_v41  ;;  %v102_v9 = vld [vmem:[%s7918_s2 + $0x60] sm:$0xff] }
 0x130   :  { %338 = vmatpush.msrb.mxu0 %v102_v9  ;;  %395 = vmatpush.msrb.mxu2 %v111_v46 }
 0x131   :  { %v177_v50 = vsub.f32 %v171_v49, %v174_v47  ;;  %v115_v47 = vld [vmem:[%s7918_s2 + $0xc8] sm:$0xff] }
 0x132   :  { %451 = vmatpush.msra.mxu0 %v121_v37  ;;  %424 = vmatpush.msrb.mxu3 %v115_v47 }
 0x133   :  { %v180_v51 = vadd.f32 1e-05, %v177_v50  ;;  %v106_v50 = vld [vmem:[%s7918_s2 + $0x80] sm:$0xff] }
 0x134   :  { %452 = vmatpush.msra.mxu0 %v120_v44  ;;  %367 = vmatpush.msrb.mxu1 %v106_v50 }
 0x135   :  { %5314 = vrsqrt.f32 %v180_v51  ;;  %vm189_vm7 = vweird.f32 %v180_v51 }
 0x136   :  { %453 = vmatpush.msra.mxu0 %v119_v48 }
 0x13b   :  { %v5315_v52 = vpop.eup %5314 }
 0x13c   :  { %v184_v53 = vmul.f32 %v5315_v52, %v180_v51  ;;  %vm190_vm8 = vweird.f32 %v5315_v52  ;;  %v110_v51 = vld [vmem:[%s7918_s2 + $0xa0] sm:$0xff] }
 0x13d   :  { %vm191_vm9 = vmor %vm189_vm7, %vm190_vm8  ;;  %396 = vmatpush.msrb.mxu2 %v110_v51  ;;  %vm2172_vm7 = vcmask 195584   ;;  %vm2177_vm8 = vcmask 228352  }
 0x13e   :  { %v185_v54 = vmul.f32 %v5315_v52, %v184_v53  ;;  %v118_v53 = vld [vmem:[%s7918_s2 + $0xe0] sm:$0xff] }
 0x13f   :  { %454 = vmatpush.msra.mxu0 %v118_v53 }
 0x140   :  { %v186_v56 = vmul.f32 0.5, %v185_v54 }
 0x142   :  { %v187_v57 = vsub.f32 1.5, %v186_v56 }
 0x144   :  { %v188_v59 = vmul.f32 %v5315_v52, %v187_v57 }
 0x146   :  { %v192_v61 = vsel %vm191_vm9, %v5315_v52, %v188_v59  ;;  %v114_v52 = vld [vmem:[%s7918_s2 + $0xc0] sm:$0xff] }
 0x147   :  { %v217_v63 = vmul.f32 %v5734_v58, %v192_v61  ;;  %425 = vmatpush.msrb.mxu3 %v114_v52 }
 0x149   :  { %v220_v0 = vmul.f32 %v217_v63, %v213_v60 }
 0x14b   :  { %v5753_v5 = vadd.f32 %v5737_v62, %v220_v0 }
 0x14d   :  { %4818 = vmatmul.msk.f32.vlgmr.msrb.gmra.mxu0 %vm139_vm1, %v5753_v5  ;;  %4806 = vmatmul.msk.f32.vlgmr.msra.gmra.mxu1 %vm139_vm1, %v5753_v5 }
 0x14e   :  { %4810 = vmatmul.msk.f32.vlgmr.msra.gmra.mxu2 %vm139_vm1, %v5753_v5  ;;  %4814 = vmatmul.msk.f32.vlgmr.msra.gmra.mxu3 %vm139_vm1, %v5753_v5 }
 0x179   :  { %v145_v13 = vpop.xlane.xlu2 %144 }
 0x17a   :  { %v148_v14 = vpop.xlane.xlu0 %147  ;;  %v157_v19 = vmul.f32 %v5712_v39, %v145_v13 }
 0x17b   :  { %v5785_v15 = vmul.f32 %v5712_v39, %v148_v14 }
 0x17c   :  { %v170_v16 = vpop.xlane.xlu1 %169  ;;  %v175_v22 = vmul.f32 %v157_v19, %v157_v19  ;;  %v214_v57 = vsub.f32 %v5698_v24, %v157_v19 }
 0x17d   :  { %v176_v17 = vmul.f32 %v5785_v15, %v5785_v15  ;;  %v173_v18 = vmul.f32 %v170_v16, %v5712_v39  ;;  %v215_v3 = vsub.f32 %v5702_v27, %v5785_v15 }
 0x17f   :  { %v179_v20 = vsub.f32 %v173_v18, %v176_v17 }
 0x181   :  { %v167_v21 = vpop.xlane.xlu2 %166  ;;  %v5791_v23 = vadd.f32 1e-05, %v179_v20 }
 0x182   :  { %v172_v25 = vmul.f32 %v167_v21, %v5712_v39 }
 0x183   :  { %5316 = vrsqrt.f32 %v5791_v23  ;;  %vm209_vm14 = vweird.f32 %v5791_v23 }
 0x184   :  { %v178_v26 = vsub.f32 %v172_v25, %v175_v22 }
 0x186   :  { %v181_v28 = vadd.f32 1e-05, %v178_v26 }
 0x188   :  { %5318 = vrsqrt.f32 %v181_v28  ;;  %vm199_vm11 = vweird.f32 %v181_v28 }
 0x189   :  { %v5317_v29 = vpop.eup %5316 }
 0x18a   :  { %v204_v31 = vmul.f32 %v5317_v29, %v5791_v23  ;;  %vm210_vm13 = vweird.f32 %v5317_v29 }
 0x18b   :  { %vm211_vm15 = vmor %vm209_vm14, %vm210_vm13 }
 0x18c   :  { %v205_v41 = vmul.f32 %v5317_v29, %v204_v31 }
 0x18e   :  { %v5319_v30 = vpop.eup %5318  ;;  %v206_v54 = vmul.f32 0.5, %v205_v41 }
 0x18f   :  { %v194_v32 = vmul.f32 %v5319_v30, %v181_v28  ;;  %vm200_vm10 = vweird.f32 %v5319_v30 }
 0x190   :  { %vm201_vm12 = vmor %vm199_vm11, %vm200_vm10  ;;  %v207_v60 = vsub.f32 1.5, %v206_v54 }
 0x191   :  { %v195_v33 = vmul.f32 %v5319_v30, %v194_v32 }
 0x192   :  { %v208_v0 = vmul.f32 %v5317_v29, %v207_v60 }
 0x193   :  { %v196_v42 = vmul.f32 0.5, %v195_v33 }
 0x194   :  { %v212_v1 = vsel %vm211_vm15, %v5317_v29, %v208_v0 }
 0x195   :  { %v197_v49 = vsub.f32 1.5, %v196_v42  ;;  %v219_v2 = vmul.f32 %v5734_v58, %v212_v1 }
 0x197   :  { %v198_v55 = vmul.f32 %v5319_v30, %v197_v49  ;;  %v222_v4 = vmul.f32 %v219_v2, %v215_v3 }
 0x199   :  { %v202_v56 = vsel %vm201_vm12, %v5319_v30, %v198_v55  ;;  %v226_v6 = vadd.f32 %v5737_v62, %v222_v4 }
 0x19a   :  { %v218_v59 = vmul.f32 %v5734_v58, %v202_v56 }
 0x19c   :  { %v221_v61 = vmul.f32 %v218_v59, %v214_v57 }
 0x19e   :  { %v225_v63 = vadd.f32 %v5737_v62, %v221_v61 }
 0x1a0   :  { %4807 = vmatmul.msk.f32.gmra.mxu1 %vm139_vm1, %v225_v63  ;;  %4811 = vmatmul.msk.f32.gmra.mxu2 %vm139_vm1, %v225_v63 }
 0x1a1   :  { %4815 = vmatmul.msk.f32.gmra.mxu3 %vm139_vm1, %v225_v63  ;;  %4819 = vmatmul.msk.f32.gmra.mxu0 %vm139_vm1, %v225_v63 }
 0x1a8   :  { %4808 = vmatmul.msk.f32.gmra.mxu1 %vm139_vm1, %v5753_v5  ;;  %4812 = vmatmul.msk.f32.gmra.mxu2 %vm139_vm1, %v5753_v5 }
 0x1a9   :  { %4816 = vmatmul.msk.f32.gmra.mxu3 %vm139_vm1, %v5753_v5  ;;  %4820 = vmatmul.msk.f32.gmra.mxu0 %vm139_vm1, %v5753_v5 }
 0x1b0   :  { %4809 = vmatmul.msk.f32.gmra.mxu1 %vm139_vm1, %v226_v6  ;;  %4813 = vmatmul.msk.f32.gmra.mxu2 %vm139_vm1, %v226_v6 }
 0x1b1   :  { %4817 = vmatmul.msk.f32.gmra.mxu3 %vm139_vm1, %v226_v6  ;;  %4821 = vmatmul.msk.f32.gmra.mxu0 %vm139_vm1, %v226_v6 }
 0x1b8   :  { %4822 = vmatmul.msk.f32.vlgmr.msrb.gmra.mxu1 %vm139_vm1, %v5753_v5  ;;  %4826 = vmatmul.msk.f32.vlgmr.msrb.gmra.mxu2 %vm139_vm1, %v5753_v5 }
 0x1b9   :  { %4830 = vmatmul.msk.f32.vlgmr.msrb.gmra.mxu3 %vm139_vm1, %v5753_v5  ;;  %4834 = vmatmul.msk.f32.vlgmr.msra.gmra.mxu0 %vm139_vm1, %v5753_v5 }
 0x1c0   :  { %4823 = vmatmul.msk.f32.gmra.mxu1 %vm139_vm1, %v225_v63  ;;  %4827 = vmatmul.msk.f32.gmra.mxu2 %vm139_vm1, %v225_v63 }
 0x1c1   :  { %4831 = vmatmul.msk.f32.gmra.mxu3 %vm139_vm1, %v225_v63  ;;  %4835 = vmatmul.msk.f32.gmra.mxu0 %vm139_vm1, %v225_v63 }
 0x1c8   :  { %4824 = vmatmul.msk.f32.gmra.mxu1 %vm139_vm1, %v5753_v5  ;;  %4828 = vmatmul.msk.f32.gmra.mxu2 %vm139_vm1, %v5753_v5 }
 0x1c9   :  { %4832 = vmatmul.msk.f32.gmra.mxu3 %vm139_vm1, %v5753_v5  ;;  %4836 = vmatmul.msk.f32.gmra.mxu0 %vm139_vm1, %v5753_v5 }
 0x1ca   :  { %v5892_v58 = vpop.f32.mrf.mxu0  ;;  %v5896_v62 = vpop.f32.mrf.mxu1 }
 0x1cb   :  { %693 = vrot.lane.b32.xlu2 %v5892_v58, %s5633_s19  ;;  %470 = vrot.lane.b32.xlu1 %v5896_v62, %s5633_s19 }
 0x1d0   :  { %4825 = vmatmul.msk.f32.gmra.mxu1 %vm139_vm1, %v226_v6  ;;  %4829 = vmatmul.msk.f32.gmra.mxu2 %vm139_vm1, %v226_v6 }
 0x1d1   :  { %4833 = vmatmul.msk.f32.gmra.mxu3 %vm139_vm1, %v226_v6  ;;  %4837 = vmatmul.msk.f32.gmra.mxu0 %vm139_vm1, %v226_v6  ;;  %v5900_v5 = vpop.f32.mrf.mxu2  ;;  %v5902_v7 = vpop.f32.mrf.mxu3 }
 0x1d2   :  { %545 = vrot.lane.b32.xlu0 %v5900_v5, %s5633_s19 }
 0x1d3   :  { %619 = vrot.lane.b32.xlu2 %v5902_v7, %s5633_s19 }
 0x21d   :  { %v5908_v8 = vpop.f32.mrf.mxu1 }
 0x21e   :  { %v5910_v9 = vpop.f32.mrf.mxu0  ;;  %472 = vrot.lane.b32.xlu2 %v5908_v8, %s5633_s19  ;;  %v5151_v11 = vpack.i.bf16 %v5896_v62, %v5908_v8 }
 0x21f   :  { %695 = vrot.lane.b32.xlu1 %v5910_v9, %s5633_s19 }
 0x223   :  { %v5916_v10 = vpop.f32.mrf.mxu2 }
 0x224   :  { %547 = vrot.lane.b32.xlu0 %v5916_v10, %s5633_s19  ;;  %v5924_v13 = vpop.f32.mrf.mxu3  ;;  %v5156_v14 = vpack.i.bf16 %v5900_v5, %v5916_v10 }
 0x225   :  { %v5922_v12 = vpop.f32.mrf.mxu1  ;;  %v694_v41 = vpop.permute.xlu2 %693 }
 0x226   :  { %5152 = vrot.lane.b32.xlu2 %v5151_v11, %s5634_s20  ;;  %v5936_v17 = vpop.f32.mrf.mxu0  ;;  %v5161_v20 = vpack.i.bf16 %v5892_v58, %v5922_v12 }
 0x227   :  { %621 = vrot.lane.b32.xlu1 %v5924_v13, %s5633_s19 }
 0x22b   :  { %v5931_v15 = vpop.f32.mrf.mxu2 }
 0x22c   :  { %5157 = vrot.lane.b32.xlu0 %v5156_v14, %s5634_s20  ;;  %v5946_v19 = vpop.f32.mrf.mxu3  ;;  %v5166_v29 = vpack.i.bf16 %v5931_v15, %v5902_v7 }
 0x22d   :  { %v5934_v16 = vpop.f32.mrf.mxu1  ;;  %v620_v44 = vpop.permute.xlu2 %619 }
 0x22e   :  { %510 = vrot.lane.b32.xlu2 %v5934_v16, %s5633_s19  ;;  %v5959_v25 = vpop.f32.mrf.mxu0  ;;  %v5171_v28 = vpack.i.bf16 %v5910_v9, %v5934_v16 }
 0x22f   :  { %730 = vrot.lane.b32.xlu1 %v5936_v17, %s5633_s19 }
 0x233   :  { %v5942_v18 = vpop.f32.mrf.mxu2 }
 0x234   :  { %508 = vrot.lane.b32.xlu0 %v5922_v12, %s5633_s19  ;;  %v5978_v31 = vpop.f32.mrf.mxu3  ;;  %v5176_v34 = vpack.i.bf16 %v5942_v18, %v5924_v13 }
 0x235   :  { %v5952_v21 = vpop.f32.mrf.mxu1 }
 0x236   :  { %v5984_v32 = vpop.f32.mrf.mxu0  ;;  %v5196_v46 = vpack.i.bf16 %v5936_v17, %v5952_v21 }
 0x237   :  { %656 = vrot.lane.b32.xlu1 %v5946_v19, %s5633_s19 }
 0x23b   :  { %v5954_v22 = vpop.f32.mrf.mxu2 }
 0x23c   :  { %5162 = vrot.lane.b32.xlu0 %v5161_v20, %s5634_s20  ;;  %v5181_v23 = vpack.i.bf16 %v5954_v22, %v5946_v19  ;;  %v5994_v35 = vpop.f32.mrf.mxu3 }
 0x23d   :  { %v5966_v26 = vpop.f32.mrf.mxu1  ;;  %v471_v49 = vpop.permute.xlu1 %470 }
 0x23e   :  { %5182 = vrot.lane.b32.xlu2 %v5181_v23, %s5634_s20  ;;  %v5996_v36 = vpop.f32.mrf.mxu0  ;;  %v5191_v54 = vpack.i.bf16 %v5959_v25, %v5966_v26 }
 0x23f   :  { %732 = vrot.lane.b32.xlu1 %v5959_v25, %s5633_s19 }
 0x243   :  { %v5976_v30 = vpop.f32.mrf.mxu2 }
 0x244   :  { %582 = vrot.lane.b32.xlu0 %v5931_v15, %s5633_s19  ;;  %v5186_v33 = vpack.i.bf16 %v5976_v30, %v5978_v31  ;;  %v6006_v38 = vpop.f32.mrf.mxu3  ;;  %v546_v55 = vpop.permute.xlu0 %545 }
 0x245   :  { %v6000_v37 = vpop.f32.mrf.mxu1 }
 0x246   :  { %769 = vrot.lane.b32.xlu2 %v5966_v26, %s5633_s19  ;;  %v6010_v40 = vpop.f32.mrf.mxu0 }
 0x247   :  { %5172 = vrot.lane.b32.xlu1 %v5171_v28, %s5634_s20 }
 0x24b   :  { %v6018_v42 = vpop.f32.mrf.mxu2 }
 0x24c   :  { %5167 = vrot.lane.b32.xlu0 %v5166_v29, %s5634_s20  ;;  %v6020_v43 = vpop.f32.mrf.mxu3 }
 0x24d   :  { %v6028_v45 = vpop.f32.mrf.mxu1 }
 0x24e   :  { %843 = vrot.lane.b32.xlu2 %v5976_v30, %s5633_s19  ;;  %v6036_v48 = vpop.f32.mrf.mxu0  ;;  %v5201_v57 = vpack.i.bf16 %v5996_v36, %v6028_v45 }
 0x24f   :  { %658 = vrot.lane.b32.xlu1 %v5978_v31, %s5633_s19 }
 0x253   :  { %v6040_v50 = vpop.f32.mrf.mxu2 }
 0x254   :  { %584 = vrot.lane.b32.xlu0 %v5942_v18, %s5633_s19  ;;  %v6049_v52 = vpop.f32.mrf.mxu3 }
 0x256   :  { %5187 = vrot.lane.b32.xlu2 %v5186_v33, %s5634_s20 }
 0x257   :  { %5177 = vrot.lane.b32.xlu1 %v5176_v34, %s5634_s20 }
 0x25c   :  { %767 = vrot.lane.b32.xlu0 %v5952_v21, %s5633_s19 }
 0x25e   :  { %804 = vrot.lane.b32.xlu2 %v6000_v37, %s5633_s19 }
 0x25f   :  { %989 = vrot.lane.b32.xlu1 %v5984_v32, %s5633_s19 }
 0x264   :  { %841 = vrot.lane.b32.xlu0 %v5954_v22, %s5633_s19 }
 0x266   :  { %1026 = vrot.lane.b32.xlu2 %v6010_v40, %s5633_s19 }
 0x267   :  { %915 = vrot.lane.b32.xlu1 %v5994_v35, %s5633_s19 }
 0x26c   :  { %991 = vrot.lane.b32.xlu0 %v5996_v36, %s5633_s19 }
 0x26e   :  { %878 = vrot.lane.b32.xlu2 %v6018_v42, %s5633_s19 }
 0x26f   :  { %952 = vrot.lane.b32.xlu1 %v6020_v43, %s5633_s19 }
 0x274   :  { %917 = vrot.lane.b32.xlu0 %v6006_v38, %s5633_s19 }
 0x276   :  { %806 = vrot.lane.b32.xlu2 %v6028_v45, %s5633_s19 }
 0x277   :  { %5197 = vrot.lane.b32.xlu1 %v5196_v46, %s5634_s20 }
 0x278   :  { %v473_v47 = vpop.permute.xlu2 %472 }
 0x279   :  { %4838 = vmatpush.xpose.msk.msra.mxu2 %vm474_vm2, %v473_v47  ;;  %v86_v47 = vlaneseq }
 0x27c   :  { %1028 = vrot.lane.b32.xlu0 %v6036_v48, %s5633_s19 }
 0x27d   :  { %4839 = vmatpush.xpose.msk.msra.mxu2 %vm474_vm2, %v471_v49  ;;  %v87_v49 = vand.u32 127, %v86_v47 }
 0x27e   :  { %880 = vrot.lane.b32.xlu2 %v6040_v50, %s5633_s19 }
 0x27f   :  { %vm88_vm3 = vcmp.lt.s32.totalorder %v87_v49, 12 }
 0x280   :  { %v6045_v51 = vpop.permute.xlu2 %5152  ;;  %4840 = vmatmul.msk.f32.vlgmr.msra.gmra.mxu2 %vm474_vm2, %v5896_v62 }
 0x281   :  { %v5154_v28 = vunpack.i.l.bf16 %v6045_v51 }
 0x284   :  { %954 = vrot.lane.b32.xlu0 %v6049_v52, %s5633_s19 }
 0x288   :  { %4841 = vmatmul.msk.f32.gmra.mxu2 %vm474_vm2, %v5908_v8  ;;  %v511_v53 = vpop.permute.xlu2 %510 }
 0x289   :  { %4842 = vmatpush.xpose.msk.msrb.mxu2 %vm474_vm2, %v511_v53 }
 0x28c   :  { %5192 = vrot.lane.b32.xlu0 %v5191_v54, %s5634_s20 }
 0x291   :  { %v696_v56 = vpop.permute.xlu1 %695 }
 0x294   :  { %5202 = vrot.lane.b32.xlu0 %v5201_v57, %s5634_s20 }
 0x296   :  { %v548_v59 = vpop.permute.xlu0 %547 }
 0x297   :  { %4846 = vmatpush.xpose.msk.msra.mxu3 %vm474_vm2, %v548_v59 }
 0x298   :  { %v6063_v60 = vpop.permute.xlu2 %5182 }
 0x299   :  { %v622_v61 = vpop.permute.xlu1 %621  ;;  %v5184_v57 = vunpack.i.l.bf16 %v6063_v60 }
 0x29a   :  { %4854 = vmatpush.xpose.msk.msra.mxu1 %vm474_vm2, %v622_v61 }
 0x29b   :  { %4847 = vmatpush.xpose.msk.msra.mxu3 %vm474_vm2, %v546_v55 }
 0x29e   :  { %4855 = vmatpush.xpose.msk.msra.mxu1 %vm474_vm2, %v620_v44  ;;  %4848 = vmatmul.msk.f32.vlgmr.msra.gmra.mxu3 %vm474_vm2, %v5900_v5  ;;  %v6071_v63 = vpop.permute.xlu0 %5157 }
 0x29f   :  { %4862 = vmatpush.xpose.msk.msrb.mxu3 %vm474_vm2, %v696_v56  ;;  %v5159_v23 = vunpack.i.l.bf16 %v6071_v63 }
 0x2a0   :  { %v770_v0 = vpop.permute.xlu2 %769 }
 0x2a1   :  { %v731_v1 = vpop.permute.xlu1 %730  ;;  %4856 = vmatmul.msk.f32.vlgmr.msra.gmra.mxu1 %vm474_vm2, %v5902_v7 }
 0x2a2   :  { %4870 = vmatpush.xpose.msk.msrb.mxu1 %vm474_vm2, %v770_v0 }
 0x2a3   :  { %4863 = vmatpush.xpose.msk.msrb.mxu3 %vm474_vm2, %v694_v41 }
 0x2a6   :  { %4849 = vmatmul.msk.f32.gmra.mxu3 %vm474_vm2, %v5916_v10  ;;  %v509_v2 = vpop.permute.xlu0 %508 }
 0x2a7   :  { %4843 = vmatpush.xpose.msk.msrb.mxu2 %vm474_vm2, %v509_v2 }
 0x2a8   :  { %v844_v3 = vpop.permute.xlu2 %843 }
 0x2a9   :  { %v657_v4 = vpop.permute.xlu1 %656  ;;  %4857 = vmatmul.msk.f32.gmra.mxu1 %vm474_vm2, %v5924_v13  ;;  %4878 = vmatpush.xpose.msk.msra.mxu3 %vm474_vm2, %v844_v3 }
 0x2aa   :  { %4844 = vmatmul.msk.f32.vlgmr.msrb.gmra.mxu2 %vm474_vm2, %v5922_v12 }
 0x2ae   :  { %4864 = vmatmul.msk.f32.vlgmr.msrb.gmra.mxu3 %vm474_vm2, %v5892_v58  ;;  %v6087_v6 = vpop.permute.xlu0 %5162 }
 0x2b0   :  { %v6089_v62 = vpop.permute.xlu2 %5187 }
 0x2b1   :  { %v733_v5 = vpop.permute.xlu1 %732  ;;  %v5189_v53 = vunpack.i.l.bf16 %v6089_v62 }
 0x2b2   :  { %4845 = vmatmul.msk.f32.gmra.mxu2 %vm474_vm2, %v5934_v16 }
 0x2b6   :  { %4865 = vmatmul.msk.f32.gmra.mxu3 %vm474_vm2, %v5910_v9  ;;  %v583_v7 = vpop.permute.xlu0 %582 }
 0x2b8   :  { %v805_v8 = vpop.permute.xlu2 %804 }
 0x2b9   :  { %v6095_v10 = vpop.permute.xlu1 %5172 }
 0x2be   :  { %v6097_v11 = vpop.permute.xlu0 %5167 }
 0x2bf   :  { %v5169_v34 = vunpack.i.l.bf16 %v6097_v11 }
 0x2c0   :  { %v6099_v12 = vpop.permute.xlu2 %1026 }
 0x2c1   :  { %v659_v58 = vpop.permute.xlu1 %658 }
 0x2c2   :  { %4858 = vmatpush.xpose.msk.msra.mxu2 %vm474_vm2, %v659_v58 }
 0x2c6   :  { %4859 = vmatpush.xpose.msk.msra.mxu2 %vm474_vm2, %v657_v4  ;;  %v585_v13 = vpop.permute.xlu0 %584 }
 0x2c7   :  { %4850 = vmatpush.xpose.msk.msrb.mxu0 %vm474_vm2, %v585_v13 }
 0x2c8   :  { %v879_v14 = vpop.permute.xlu2 %878 }
 0x2c9   :  { %4860 = vmatmul.msk.f32.vlgmr.msra.gmra.mxu2 %vm474_vm2, %v5946_v19  ;;  %v5178_v19 = vpop.permute.xlu1 %5177 }
 0x2ca   :  { %v5180_v41 = vunpack.i.h.bf16 %v5178_v19 }
 0x2cb   :  { %4851 = vmatpush.xpose.msk.msrb.mxu0 %vm474_vm2, %v583_v7 }
 0x2ce   :  { %4852 = vmatmul.msk.f32.vlgmr.msrb.gmra.mxu0 %vm474_vm2, %v5931_v15  ;;  %v768_v9 = vpop.permute.xlu0 %767 }
 0x2cf   :  { %4866 = vmatpush.xpose.msk.msra.mxu0 %vm474_vm2, %v733_v5  ;;  %4871 = vmatpush.xpose.msk.msrb.mxu1 %vm474_vm2, %v768_v9 }
 0x2d0   :  { %v807_v16 = vpop.permute.xlu2 %806 }
 0x2d1   :  { %4861 = vmatmul.msk.f32.gmra.mxu2 %vm474_vm2, %v5978_v31  ;;  %v5179_v31 = vunpack.i.l.bf16 %v5178_v19 }
 0x2d2   :  { %4874 = vmatpush.xpose.msk.msrb.mxu2 %vm474_vm2, %v807_v16  ;;  %4872 = vmatmul.msk.f32.vlgmr.msrb.gmra.mxu1 %vm474_vm2, %v5952_v21  ;;  %v990_v21 = vpop.permute.xlu1 %989 }
 0x2d3   :  { %4867 = vmatpush.xpose.msk.msra.mxu0 %vm474_vm2, %v731_v1 }
 0x2d6   :  { %4875 = vmatpush.xpose.msk.msrb.mxu2 %vm474_vm2, %v805_v8  ;;  %4853 = vmatmul.msk.f32.gmra.mxu0 %vm474_vm2, %v5942_v18  ;;  %v842_v15 = vpop.permute.xlu0 %841 }
 0x2d7   :  { %4879 = vmatpush.xpose.msk.msra.mxu3 %vm474_vm2, %v842_v15 }
 0x2d8   :  { %v881_v20 = vpop.permute.xlu2 %880 }
 0x2d9   :  { %4876 = vmatmul.msk.f32.vlgmr.msrb.gmra.mxu2 %vm474_vm2, %v6000_v37  ;;  %4882 = vmatpush.xpose.msk.msrb.mxu0 %vm474_vm2, %v881_v20 }
 0x2da   :  { %4873 = vmatmul.msk.f32.gmra.mxu1 %vm474_vm2, %v5966_v26  ;;  %4880 = vmatmul.msk.f32.vlgmr.msra.gmra.mxu3 %vm474_vm2, %v5954_v22  ;;  %v5160_v22 = vunpack.i.h.bf16 %v6071_v63  ;;  %v5175_v26 = vunpack.i.h.bf16 %v6095_v10  ;;  %v916_v29 = vpop.permute.xlu1 %915  ;;  %v5635_v63 = vmov -1e+30  }
 0x2db   :  { %v6180_v0 = vsel %vm88_vm3, 0.0, %v5635_v63 }
 0x2dd   :  { %4883 = vmatpush.xpose.msk.msrb.mxu0 %vm474_vm2, %v879_v14 }
 0x2de   :  { %4868 = vmatmul.msk.f32.vlgmr.msra.gmra.mxu0 %vm474_vm2, %v5936_v17  ;;  %v992_v18 = vpop.permute.xlu0 %991 }
 0x2df   :  { %4894 = vmatpush.xpose.msk.msrb.mxu3 %vm474_vm2, %v992_v18 }
 0x2e1   :  { %4877 = vmatmul.msk.f32.gmra.mxu2 %vm474_vm2, %v6028_v45  ;;  %v5170_v45 = vunpack.i.h.bf16 %v6097_v11 }
 0x2e2   :  { %4881 = vmatmul.msk.f32.gmra.mxu3 %vm474_vm2, %v5976_v30  ;;  %v5165_v30 = vunpack.i.h.bf16 %v6087_v6  ;;  %v953_v44 = vpop.permute.xlu1 %952 }
 0x2e3   :  { %4895 = vmatpush.xpose.msk.msrb.mxu3 %vm474_vm2, %v990_v21 }
 0x2e6   :  { %4869 = vmatmul.msk.f32.gmra.mxu0 %vm474_vm2, %v5959_v25  ;;  %v918_v17 = vpop.permute.xlu0 %917  ;;  %v5155_v25 = vunpack.i.h.bf16 %v6045_v51  ;;  %v5164_v51 = vunpack.i.l.bf16 %v6087_v6 }
 0x2e7   :  { %1573 = vmatpush.msra.mxu3 %v5159_v23  ;;  %4886 = vmatpush.xpose.msk.msra.mxu1 %vm474_vm2, %v918_v17 }
 0x2e9   :  { %1574 = vmatpush.msra.mxu3 %v5160_v22 }
 0x2ea   :  { %4896 = vmatmul.msk.f32.vlgmr.msrb.gmra.mxu3 %vm474_vm2, %v5984_v32  ;;  %v6169_v54 = vpop.permute.xlu1 %5197 }
 0x2eb   :  { %1713 = vmatpush.msrb.mxu3 %v5175_v26  ;;  %4887 = vmatpush.xpose.msk.msra.mxu1 %vm474_vm2, %v916_v29  ;;  %v5200_v59 = vunpack.i.h.bf16 %v6169_v54 }
 0x2ed   :  { %1714 = vmatpush.msrb.mxu3 %v5165_v30 }
 0x2ee   :  { %4884 = vmatmul.msk.f32.vlgmr.msrb.gmra.mxu0 %vm474_vm2, %v6018_v42  ;;  %4888 = vmatmul.msk.f32.vlgmr.msra.gmra.mxu1 %vm474_vm2, %v5994_v35  ;;  %v1029_v33 = vpop.permute.xlu0 %1028 }
 0x2ef   :  { %1503 = vmatpush.msrb.mxu1 %v5154_v28  ;;  %4898 = vmatpush.xpose.msk.msra.mxu0 %vm474_vm2, %v1029_v33 }
 0x2f1   :  { %1504 = vmatpush.msrb.mxu1 %v5155_v25 }
 0x2f2   :  { %4897 = vmatmul.msk.f32.gmra.mxu3 %vm474_vm2, %v5996_v36  ;;  %v5174_v36 = vunpack.i.l.bf16 %v6095_v10 }
 0x2f3   :  { %1643 = vmatpush.msra.mxu1 %v5179_v31  ;;  %4899 = vmatpush.xpose.msk.msra.mxu0 %vm474_vm2, %v6099_v12 }
 0x2f5   :  { %1644 = vmatpush.msra.mxu1 %v5169_v34 }
 0x2f6   :  { %4885 = vmatmul.msk.f32.gmra.mxu0 %vm474_vm2, %v6040_v50  ;;  %4889 = vmatmul.msk.f32.gmra.mxu1 %vm474_vm2, %v6006_v38  ;;  %v955_v46 = vpop.permute.xlu0 %954 }
 0x2f7   :  { %1608 = vmatpush.msrb.mxu0 %v5180_v41  ;;  %4890 = vmatpush.xpose.msk.msra.mxu2 %vm474_vm2, %v955_v46 }
 0x2f9   :  { %1609 = vmatpush.msrb.mxu0 %v5170_v45 }
 0x2fb   :  { %4891 = vmatpush.xpose.msk.msra.mxu2 %vm474_vm2, %v953_v44 }
 0x2fe   :  { %4892 = vmatmul.msk.f32.vlgmr.msra.gmra.mxu2 %vm474_vm2, %v6020_v43  ;;  %4900 = vmatmul.msk.f32.vlgmr.msra.gmra.mxu0 %vm474_vm2, %v6010_v40  ;;  %v6175_v55 = vpop.permute.xlu0 %5192 }
 0x2ff   :  { %1538 = vmatpush.msrb.mxu2 %v5174_v36  ;;  %v5195_v56 = vunpack.i.h.bf16 %v6175_v55 }
 0x301   :  { %1539 = vmatpush.msrb.mxu2 %v5164_v51  ;;  %1748 = vmatpush.msra.mxu0 %v5195_v56 }
 0x303   :  { %1678 = vmatpush.msra.mxu2 %v5189_v53  ;;  %v500_v61 = vpop.f32.mrf.mxu2  ;;  %1749 = vmatpush.msra.mxu0 %v5200_v59 }
 0x304   :  { %v1061_v1 = vmul.f32 0.5, %v500_v61 }
 0x305   :  { %1679 = vmatpush.msra.mxu2 %v5184_v57 }
 0x306   :  { %4893 = vmatmul.msk.f32.gmra.mxu2 %vm474_vm2, %v6049_v52  ;;  %4901 = vmatmul.msk.f32.gmra.mxu0 %vm474_vm2, %v6036_v48  ;;  %v6187_v2 = vadd.f32 %v1061_v1, %v6180_v0 }
 0x308   :  { %v1125_v3 = vsel %vm27_vm0, %v6187_v2, -inf }
 0x309   :  { %1126 = vmax.xlane.f32.xlu0 %v1125_v3 }
 0x30b   :  { %v503_v11 = vpop.f32.mrf.mxu2 }
 0x30c   :  { %v1062_v19 = vmul.f32 0.5, %v503_v11 }
 0x30e   :  { %v6212_v17 = vadd.f32 %v1062_v19, %v6180_v0 }
 0x310   :  { %v1128_v25 = vsel %vm27_vm0, %v6212_v17, -inf }
 0x31e   :  { %v648_v4 = vpop.f32.mrf.mxu1 }
 0x31f   :  { %v1069_v6 = vmul.f32 0.5, %v648_v4 }
 0x321   :  { %v574_v5 = vpop.f32.mrf.mxu3  ;;  %v6192_v7 = vadd.f32 %v1069_v6, %v6180_v0 }
 0x322   :  { %v1065_v8 = vmul.f32 0.5, %v574_v5 }
 0x323   :  { %v1149_v10 = vsel %vm27_vm0, %v6192_v7, -inf }
 0x324   :  { %1150 = vmax.xlane.f32.xlu1 %v1149_v10  ;;  %v6197_v13 = vadd.f32 %v1065_v8, %v6180_v0 }
 0x326   :  { %v651_v12 = vpop.f32.mrf.mxu1  ;;  %v1137_v20 = vsel %vm27_vm0, %v6197_v13, -inf }
 0x327   :  { %v1070_v58 = vmul.f32 0.5, %v651_v12 }
 0x329   :  { %v577_v14 = vpop.f32.mrf.mxu3  ;;  %v6200_v9 = vadd.f32 %v1070_v58, %v6180_v0 }
 0x32a   :  { %v1066_v16 = vmul.f32 0.5, %v577_v14 }
 0x32b   :  { %v1152_v15 = vsel %vm27_vm0, %v6200_v9, -inf }
 0x32c   :  { %1153 = vmax.xlane.f32.xlu0 %v1152_v15  ;;  %1138 = vmax.xlane.f32.xlu1 %v1137_v20  ;;  %v6207_v18 = vadd.f32 %v1066_v16, %v6180_v0 }
 0x32d   :  { %v537_v21 = vpop.f32.mrf.mxu2 }
 0x32e   :  { %v1063_v23 = vmul.f32 0.5, %v537_v21  ;;  %v1140_v22 = vsel %vm27_vm0, %v6207_v18, -inf }
 0x32f   :  { %1141 = vmax.xlane.f32.xlu2 %v1140_v22 }
 0x330   :  { %v6215_v26 = vadd.f32 %v1063_v23, %v6180_v0 }
 0x331   :  { %v722_v28 = vpop.f32.mrf.mxu3 }
 0x332   :  { %v1073_v29 = vmul.f32 0.5, %v722_v28  ;;  %v1131_v30 = vsel %vm27_vm0, %v6215_v26, -inf }
 0x334   :  { %1129 = vmax.xlane.f32.xlu1 %v1128_v25  ;;  %1132 = vmax.xlane.f32.xlu0 %v1131_v30  ;;  %v6222_v31 = vadd.f32 %v1073_v29, %v6180_v0 }
 0x335   :  { %v540_v33 = vpop.f32.mrf.mxu2 }
 0x336   :  { %v1064_v34 = vmul.f32 0.5, %v540_v33  ;;  %v1161_v41 = vsel %vm27_vm0, %v6222_v31, -inf }
 0x337   :  { %1162 = vmax.xlane.f32.xlu2 %v1161_v41 }
 0x338   :  { %v6227_v46 = vadd.f32 %v1064_v34, %v6180_v0 }
 0x339   :  { %v725_v44 = vpop.f32.mrf.mxu3 }
 0x33a   :  { %v1074_v45 = vmul.f32 0.5, %v725_v44  ;;  %v1134_v49 = vsel %vm27_vm0, %v6227_v46, -inf }
 0x33c   :  { %v6230_v47 = vadd.f32 %v1074_v45, %v6180_v0 }
 0x33e   :  { %v1164_v36 = vsel %vm27_vm0, %v6230_v47, -inf }
 0x33f   :  { %1165 = vmax.xlane.f32.xlu1 %v1164_v36  ;;  %1135 = vmax.xlane.f32.xlu2 %v1134_v49 }
 0x34b   :  { %v611_v51 = vpop.f32.mrf.mxu0 }
 0x34c   :  { %v1067_v53 = vmul.f32 0.5, %v611_v51  ;;  %v685_v56 = vpop.f32.mrf.mxu2 }
 0x34d   :  { %v1071_v57 = vmul.f32 0.5, %v685_v56 }
 0x34e   :  { %v6237_v59 = vadd.f32 %v1067_v53, %v6180_v0 }
 0x34f   :  { %v6240_v61 = vadd.f32 %v1071_v57, %v6180_v0  ;;  %v796_v3 = vpop.f32.mrf.mxu1 }
 0x350   :  { %v1143_v63 = vsel %vm27_vm0, %v6237_v59, -inf  ;;  %v1077_v8 = vmul.f32 0.5, %v796_v3 }
 0x351   :  { %v1155_v1 = vsel %vm27_vm0, %v6240_v61, -inf  ;;  %1144 = vmax.xlane.f32.xlu0 %v1143_v63 }
 0x352   :  { %1156 = vmax.xlane.f32.xlu1 %v1155_v1  ;;  %v6252_v14 = vadd.f32 %v1077_v8, %v6180_v0 }
 0x353   :  { %v614_v4 = vpop.f32.mrf.mxu0 }
 0x354   :  { %v1068_v6 = vmul.f32 0.5, %v614_v4  ;;  %v688_v11 = vpop.f32.mrf.mxu2  ;;  %v1173_v22 = vsel %vm27_vm0, %v6252_v14, -inf }
 0x355   :  { %v1072_v29 = vmul.f32 0.5, %v688_v11 }
 0x356   :  { %v6247_v5 = vadd.f32 %v1068_v6, %v6180_v0 }
 0x357   :  { %v799_v16 = vpop.f32.mrf.mxu1  ;;  %v6270_v41 = vadd.f32 %v1072_v29, %v6180_v0 }
 0x358   :  { %v1146_v10 = vsel %vm27_vm0, %v6247_v5, -inf  ;;  %v1078_v21 = vmul.f32 0.5, %v799_v16 }
 0x359   :  { %1147 = vmax.xlane.f32.xlu2 %v1146_v10  ;;  %v1158_v49 = vsel %vm27_vm0, %v6270_v41, -inf }
 0x35a   :  { %v6267_v33 = vadd.f32 %v1078_v21, %v6180_v0 }
 0x35b   :  { %v759_v12 = vpop.f32.mrf.mxu0 }
 0x35c   :  { %v1075_v58 = vmul.f32 0.5, %v759_v12  ;;  %v833_v34 = vpop.f32.mrf.mxu2  ;;  %v1176_v44 = vsel %vm27_vm0, %v6267_v33, -inf }
 0x35d   :  { %v870_v19 = vpop.f32.mrf.mxu3 }
 0x35e   :  { %v1081_v15 = vmul.f32 0.5, %v870_v19  ;;  %v6255_v20 = vadd.f32 %v1075_v58, %v6180_v0 }
 0x360   :  { %v1167_v23 = vsel %vm27_vm0, %v6255_v20, -inf  ;;  %v6262_v28 = vadd.f32 %v1081_v15, %v6180_v0 }
 0x361   :  { %1168 = vmax.xlane.f32.xlu1 %v1167_v23  ;;  %1174 = vmax.xlane.f32.xlu2 %v1173_v22  ;;  %v1079_v22 = vmul.f32 0.5, %v833_v34 }
 0x362   :  { %v1185_v30 = vsel %vm27_vm0, %v6262_v28, -inf }
 0x363   :  { %v762_v25 = vpop.f32.mrf.mxu0  ;;  %1186 = vmax.xlane.f32.xlu0 %v1185_v30 }
 0x364   :  { %v1076_v45 = vmul.f32 0.5, %v762_v25  ;;  %v836_v4 = vpop.f32.mrf.mxu2 }
 0x365   :  { %v873_v36 = vpop.f32.mrf.mxu3  ;;  %v1080_v11 = vmul.f32 0.5, %v836_v4 }
 0x366   :  { %v6283_v3 = vadd.f32 %v1076_v45, %v6180_v0  ;;  %v1082_v6 = vmul.f32 0.5, %v873_v36  ;;  %v6306_v36 = vpop.permute.xlu0 %5202 }
 0x367   :  { %v6298_v23 = vadd.f32 %v1080_v11, %v6180_v0 }
 0x368   :  { %v1170_v12 = vsel %vm27_vm0, %v6283_v3, -inf  ;;  %v6292_v19 = vadd.f32 %v1082_v6, %v6180_v0 }
 0x369   :  { %1177 = vmax.xlane.f32.xlu1 %v1176_v44  ;;  %v1182_v44 = vsel %vm27_vm0, %v6298_v23, -inf }
 0x36a   :  { %v1188_v30 = vsel %vm27_vm0, %v6292_v19, -inf }
 0x36b   :  { %v907_v51 = vpop.f32.mrf.mxu0  ;;  %1159 = vmax.xlane.f32.xlu0 %v1158_v49  ;;  %v944_v53 = vpop.f32.mrf.mxu1  ;;  %v6309_v49 = vadd.f32 %v1079_v22, %v6180_v0 }
 0x36c   :  { %v1083_v56 = vmul.f32 0.5, %v907_v51  ;;  %v1085_v57 = vmul.f32 0.5, %v944_v53 }
 0x36d   :  { %v1018_v15 = vpop.f32.mrf.mxu3  ;;  %v1179_v53 = vsel %vm27_vm0, %v6309_v49, -inf }
 0x36e   :  { %v6277_v63 = vadd.f32 %v1083_v56, %v6180_v0  ;;  %v6280_v1 = vadd.f32 %v1085_v57, %v6180_v0  ;;  %v1089_v29 = vmul.f32 0.5, %v1018_v15 }
 0x370   :  { %v1191_v8 = vsel %vm27_vm0, %v6277_v63, -inf  ;;  %v1197_v10 = vsel %vm27_vm0, %v6280_v1, -inf  ;;  %v6312_v34 = vadd.f32 %v1089_v29, %v6180_v0 }
 0x371   :  { %1192 = vmax.xlane.f32.xlu1 %v1191_v8  ;;  %1198 = vmax.xlane.f32.xlu2 %v1197_v10 }
 0x372   :  { %v1209_v56 = vsel %vm27_vm0, %v6312_v34, -inf }
 0x373   :  { %1171 = vmax.xlane.f32.xlu0 %v1170_v12  ;;  %v947_v58 = vpop.f32.mrf.mxu1  ;;  %v910_v45 = vpop.f32.mrf.mxu0 }
 0x374   :  { %v1086_v16 = vmul.f32 0.5, %v947_v58  ;;  %v1084_v51 = vmul.f32 0.5, %v910_v45 }
 0x375   :  { %v1021_v11 = vpop.f32.mrf.mxu3 }
 0x376   :  { %v6295_v21 = vadd.f32 %v1086_v16, %v6180_v0  ;;  %v6319_v8 = vadd.f32 %v1084_v51, %v6180_v0  ;;  %v1090_v16 = vmul.f32 0.5, %v1021_v11 }
 0x378   :  { %v1200_v25 = vsel %vm27_vm0, %v6295_v21, -inf  ;;  %v1194_v22 = vsel %vm27_vm0, %v6319_v8, -inf }
 0x379   :  { %1189 = vmax.xlane.f32.xlu2 %v1188_v30  ;;  %1201 = vmax.xlane.f32.xlu1 %v1200_v25  ;;  %v6330_v25 = vadd.f32 %v1090_v16, %v6180_v0 }
 0x37b   :  { %1183 = vmax.xlane.f32.xlu0 %v1182_v44  ;;  %v1055_v12 = vpop.f32.mrf.mxu0  ;;  %v1212_v51 = vsel %vm27_vm0, %v6330_v25, -inf }
 0x37c   :  { %v1127_v6 = vpop.xlane.xlu0 %1126  ;;  %v1091_v15 = vmul.f32 0.5, %v1055_v12 }
 0x37d   :  { %v1221_v58 = vsub.f32 %v6187_v2, %v1127_v6 }
 0x37e   :  { %v6333_v44 = vadd.f32 %v1091_v15, %v6180_v0 }
 0x37f   :  { %v1253_v30 = vmul.f32 1.442695, %v1221_v58 }
 0x381   :  { %1180 = vmax.xlane.f32.xlu2 %v1179_v53  ;;  %1210 = vmax.xlane.f32.xlu1 %v1209_v56  ;;  %v981_v57 = vpop.f32.mrf.mxu2  ;;  %5320 = vpow2.f32 %v1253_v30  ;;  %v1215_v53 = vsel %vm27_vm0, %v6333_v44, -inf }
 0x382   :  { %v1087_v4 = vmul.f32 0.5, %v981_v57 }
 0x384   :  { %v6322_v10 = vadd.f32 %v1087_v4, %v6180_v0  ;;  %v1058_v4 = vpop.f32.mrf.mxu0 }
 0x385   :  { %v1092_v11 = vmul.f32 0.5, %v1058_v4 }
 0x386   :  { %v1203_v29 = vsel %vm27_vm0, %v6322_v10, -inf }
 0x387   :  { %v6342_v57 = vpop.eup %5320 }
 0x388   :  { %v1317_v16 = vsel %vm27_vm0, %v6342_v57, 0.0 }
 0x389   :  { %1195 = vmax.xlane.f32.xlu2 %v1194_v22  ;;  %1204 = vmax.xlane.f32.xlu1 %v1203_v29  ;;  %v984_v45 = vpop.f32.mrf.mxu2  ;;  %v6350_v22 = vadd.f32 %v1092_v11, %v6180_v0 }
 0x38a   :  { %v1088_v2 = vmul.f32 0.5, %v984_v45 }
 0x38c   :  { %v6340_v56 = vadd.f32 %v1088_v2, %v6180_v0 }
 0x38e   :  { %v1206_v58 = vsel %vm27_vm0, %v6340_v56, -inf }
 0x391   :  { %1213 = vmax.xlane.f32.xlu2 %v1212_v51  ;;  %1216 = vmax.xlane.f32.xlu1 %v1215_v53 }
 0x397   :  { %v1151_v6 = vpop.xlane.xlu1 %1150 }
 0x398   :  { %v1229_v12 = vsub.f32 %v6192_v7, %v1151_v6  ;;  %v1218_v7 = vsel %vm27_vm0, %v6350_v22, -inf }
 0x399   :  { %1207 = vmax.xlane.f32.xlu2 %v1206_v58  ;;  %1318 = vadd.xlane.f32.xlu1 %v1317_v16 }
 0x39a   :  { %v1269_v15 = vmul.f32 1.442695, %v1229_v12 }
 0x39c   :  { %5322 = vpow2.f32 %v1269_v15 }
 0x39f   :  { %v1139_v29 = vpop.xlane.xlu1 %1138  ;;  %v1154_v30 = vpop.xlane.xlu0 %1153 }
 0x3a0   :  { %v1225_v45 = vsub.f32 %v6197_v13, %v1139_v29  ;;  %v1230_v2 = vsub.f32 %v6200_v9, %v1154_v30 }
 0x3a1   :  { %1219 = vmax.xlane.f32.xlu2 %v1218_v7 }
 0x3a2   :  { %v6356_v51 = vpop.eup %5322  ;;  %v1261_v53 = vmul.f32 1.442695, %v1225_v45  ;;  %v1271_v4 = vmul.f32 1.442695, %v1230_v2  ;;  %v1142_v6 = vpop.xlane.xlu2 %1141 }
 0x3a3   :  { %v1226_v12 = vsub.f32 %v6207_v18, %v1142_v6  ;;  %v1341_v11 = vsel %vm27_vm0, %v6356_v51, 0.0 }
 0x3a4   :  { %5324 = vpow2.f32 %v1261_v53  ;;  %1342 = vadd.xlane.f32.xlu1 %v1341_v11 }
 0x3a5   :  { %5326 = vpow2.f32 %v1271_v4  ;;  %v1263_v13 = vmul.f32 1.442695, %v1226_v12 }
 0x3a7   :  { %v1130_v58 = vpop.xlane.xlu1 %1129  ;;  %v1133_v9 = vpop.xlane.xlu0 %1132  ;;  %5328 = vpow2.f32 %v1263_v13 }
 0x3a8   :  { %v1222_v16 = vsub.f32 %v6212_v17, %v1130_v58  ;;  %v1223_v15 = vsub.f32 %v6215_v26, %v1133_v9 }
 0x3aa   :  { %v6363_v29 = vpop.eup %5324  ;;  %v1255_v30 = vmul.f32 1.442695, %v1222_v16  ;;  %v1257_v45 = vmul.f32 1.442695, %v1223_v15  ;;  %v1163_v2 = vpop.xlane.xlu2 %1162 }
 0x3ab   :  { %v6365_v7 = vpop.eup %5326  ;;  %v1329_v18 = vsel %vm27_vm0, %v6363_v29, 0.0 }
 0x3ac   :  { %5330 = vpow2.f32 %v1255_v30  ;;  %1330 = vadd.xlane.f32.xlu0 %v1329_v18  ;;  %v1344_v53 = vsel %vm27_vm0, %v6365_v7, 0.0 }
 0x3ad   :  { %5332 = vpow2.f32 %v1257_v45  ;;  %1345 = vadd.xlane.f32.xlu2 %v1344_v53  ;;  %v6371_v17 = vpop.eup %5328 }
 0x3ae   :  { %v1332_v58 = vsel %vm27_vm0, %v6371_v17, 0.0 }
 0x3b2   :  { %v6373_v26 = vpop.eup %5330  ;;  %v1136_v4 = vpop.xlane.xlu2 %1135 }
 0x3b3   :  { %v6375_v6 = vpop.eup %5332  ;;  %v1166_v12 = vpop.xlane.xlu1 %1165  ;;  %v1224_v11 = vsub.f32 %v6227_v46, %v1136_v4  ;;  %v1320_v13 = vsel %vm27_vm0, %v6373_v26, 0.0 }
 0x3b4   :  { %1321 = vadd.xlane.f32.xlu0 %v1320_v13  ;;  %v1323_v9 = vsel %vm27_vm0, %v6375_v6, 0.0  ;;  %v1234_v15 = vsub.f32 %v6230_v47, %v1166_v12 }
 0x3b5   :  { %v1259_v16 = vmul.f32 1.442695, %v1224_v11  ;;  %1333 = vadd.xlane.f32.xlu2 %v1332_v58  ;;  %1324 = vadd.xlane.f32.xlu1 %v1323_v9  ;;  %v1233_v11 = vsub.f32 %v6222_v31, %v1163_v2 }
 0x3b6   :  { %v1279_v30 = vmul.f32 1.442695, %v1234_v15 }
 0x3b7   :  { %5334 = vpow2.f32 %v1259_v16  ;;  %v1277_v12 = vmul.f32 1.442695, %v1233_v11 }
 0x3b8   :  { %5336 = vpow2.f32 %v1279_v30 }
 0x3bd   :  { %v6385_v45 = vpop.eup %5334 }
 0x3be   :  { %v1326_v46 = vsel %vm27_vm0, %v6385_v45, 0.0  ;;  %v6389_v18 = vpop.eup %5336 }
 0x3bf   :  { %1327 = vadd.xlane.f32.xlu0 %v1326_v46  ;;  %v1356_v47 = vsel %vm27_vm0, %v6389_v18, 0.0 }
 0x3c4   :  { %v1145_v53 = vpop.xlane.xlu0 %1144 }
 0x3c5   :  { %v1227_v4 = vsub.f32 %v6237_v59, %v1145_v53  ;;  %v1157_v58 = vpop.xlane.xlu1 %1156 }
 0x3c7   :  { %v1265_v13 = vmul.f32 1.442695, %v1227_v4  ;;  %1357 = vadd.xlane.f32.xlu0 %v1356_v47  ;;  %v1231_v47 = vsub.f32 %v6240_v61, %v1157_v58 }
 0x3c9   :  { %5338 = vpow2.f32 %v1265_v13 }
 0x3ca   :  { %5340 = vpow2.f32 %v1277_v12 }
 0x3cc   :  { %v1148_v9 = vpop.xlane.xlu2 %1147 }
 0x3cd   :  { %v1228_v15 = vsub.f32 %v6247_v5, %v1148_v9  ;;  %v1273_v9 = vmul.f32 1.442695, %v1231_v47 }
 0x3cf   :  { %v6395_v16 = vpop.eup %5338  ;;  %v1267_v59 = vmul.f32 1.442695, %v1228_v15 }
 0x3d0   :  { %v1335_v30 = vsel %vm27_vm0, %v6395_v16, 0.0  ;;  %v6400_v46 = vpop.eup %5340 }
 0x3d1   :  { %1336 = vadd.xlane.f32.xlu1 %v1335_v30  ;;  %5342 = vpow2.f32 %v1267_v59  ;;  %v1353_v5 = vsel %vm27_vm0, %v6400_v46, 0.0 }
 0x3d4   :  { %v1169_v31 = vpop.xlane.xlu1 %1168  ;;  %v1175_v2 = vpop.xlane.xlu2 %1174 }
 0x3d5   :  { %v1237_v53 = vsub.f32 %v6252_v14, %v1175_v2  ;;  %v1235_v61 = vsub.f32 %v6255_v20, %v1169_v31 }
 0x3d6   :  { %v1187_v4 = vpop.xlane.xlu0 %1186 }
 0x3d7   :  { %v1285_v11 = vmul.f32 1.442695, %v1237_v53  ;;  %v1241_v13 = vsub.f32 %v6262_v28, %v1187_v4  ;;  %v6407_v30 = vpop.eup %5342 }
 0x3d8   :  { %v1338_v58 = vsel %vm27_vm0, %v6407_v30, 0.0 }
 0x3d9   :  { %v1293_v12 = vmul.f32 1.442695, %v1241_v13  ;;  %1354 = vadd.xlane.f32.xlu1 %v1353_v5  ;;  %5344 = vpow2.f32 %v1285_v11  ;;  %v1281_v13 = vmul.f32 1.442695, %v1235_v61 }
 0x3db   :  { %5346 = vpow2.f32 %v1293_v12 }
 0x3dc   :  { %v1178_v15 = vpop.xlane.xlu1 %1177  ;;  %5348 = vpow2.f32 %v1273_v9 }
 0x3dd   :  { %v1238_v14 = vsub.f32 %v6267_v33, %v1178_v15 }
 0x3de   :  { %v1160_v2 = vpop.xlane.xlu0 %1159 }
 0x3df   :  { %v1287_v59 = vmul.f32 1.442695, %v1238_v14  ;;  %v1232_v53 = vsub.f32 %v6270_v41, %v1160_v2  ;;  %v6411_v28 = vpop.eup %5344 }
 0x3e0   :  { %v1365_v11 = vsel %vm27_vm0, %v6411_v28, 0.0 }
 0x3e1   :  { %v6416_v4 = vpop.eup %5346  ;;  %5350 = vpow2.f32 %v1287_v59  ;;  %1339 = vadd.xlane.f32.xlu1 %v1338_v58  ;;  %1366 = vadd.xlane.f32.xlu2 %v1365_v11  ;;  %v1275_v41 = vmul.f32 1.442695, %v1232_v53 }
 0x3e2   :  { %v1377_v33 = vsel %vm27_vm0, %v6416_v4, 0.0  ;;  %v6422_v20 = vpop.eup %5348 }
 0x3e3   :  { %1378 = vadd.xlane.f32.xlu0 %v1377_v33  ;;  %5352 = vpow2.f32 %v1275_v41  ;;  %v1347_v14 = vsel %vm27_vm0, %v6422_v20, 0.0 }
 0x3e4   :  { %v1193_v47 = vpop.xlane.xlu1 %1192  ;;  %v1199_v5 = vpop.xlane.xlu2 %1198  ;;  %5354 = vpow2.f32 %v1281_v13 }
 0x3e6   :  { %v1172_v31 = vpop.xlane.xlu0 %1171 }
 0x3e7   :  { %v6424_v12 = vpop.eup %5350  ;;  %v1236_v9 = vsub.f32 %v6283_v3, %v1172_v31  ;;  %v1245_v3 = vsub.f32 %v6280_v1, %v1199_v5 }
 0x3e8   :  { %v1368_v15 = vsel %vm27_vm0, %v6424_v12, 0.0 }
 0x3e9   :  { %1369 = vadd.xlane.f32.xlu1 %v1368_v15  ;;  %1348 = vadd.xlane.f32.xlu2 %v1347_v14  ;;  %v1283_v2 = vmul.f32 1.442695, %v1236_v9  ;;  %v6431_v61 = vpop.eup %5352  ;;  %v1301_v31 = vmul.f32 1.442695, %v1245_v3 }
 0x3ea   :  { %v6434_v11 = vpop.eup %5354  ;;  %v1350_v41 = vsel %vm27_vm0, %v6431_v61, 0.0 }
 0x3eb   :  { %5356 = vpow2.f32 %v1283_v2  ;;  %v1359_v13 = vsel %vm27_vm0, %v6434_v11, 0.0 }
 0x3ec   :  { %v1190_v59 = vpop.xlane.xlu2 %1189  ;;  %v1202_v53 = vpop.xlane.xlu1 %1201 }
 0x3ed   :  { %v1242_v58 = vsub.f32 %v6292_v19, %v1190_v59  ;;  %v1246_v5 = vsub.f32 %v6295_v21, %v1202_v53 }
 0x3ef   :  { %v1295_v33 = vmul.f32 1.442695, %v1242_v58 }
 0x3f1   :  { %5358 = vpow2.f32 %v1295_v33  ;;  %1351 = vadd.xlane.f32.xlu1 %v1350_v41  ;;  %1360 = vadd.xlane.f32.xlu2 %v1359_v13  ;;  %v6443_v59 = vpop.eup %5356  ;;  %v1243_v33 = vsub.f32 %v6277_v63, %v1193_v47 }
 0x3f2   :  { %5360 = vpow2.f32 %v1301_v31 }
 0x3f3   :  { %v1297_v41 = vmul.f32 1.442695, %v1243_v33 }
 0x3f4   :  { %v1181_v9 = vpop.xlane.xlu2 %1180  ;;  %v1211_v15 = vpop.xlane.xlu1 %1210 }
 0x3f5   :  { %v1239_v19 = vsub.f32 %v6309_v49, %v1181_v9  ;;  %v1249_v14 = vsub.f32 %v6312_v34, %v1211_v15  ;;  %v1362_v49 = vsel %vm27_vm0, %v6443_v59, 0.0  ;;  %v1303_v34 = vmul.f32 1.442695, %v1246_v5 }
 0x3f7   :  { %v6445_v1 = vpop.eup %5358  ;;  %v1289_v2 = vmul.f32 1.442695, %v1239_v19  ;;  %v1309_v58 = vmul.f32 1.442695, %v1249_v14 }
 0x3f8   :  { %v1380_v3 = vsel %vm27_vm0, %v6445_v1, 0.0  ;;  %v6457_v53 = vpop.eup %5360 }
 0x3f9   :  { %5362 = vpow2.f32 %v1289_v2  ;;  %1381 = vadd.xlane.f32.xlu1 %v1380_v3  ;;  %1363 = vadd.xlane.f32.xlu2 %v1362_v49  ;;  %v1389_v15 = vsel %vm27_vm0, %v6457_v53, 0.0 }
 0x3fa   :  { %5364 = vpow2.f32 %v1309_v58 }
 0x3fb   :  { %5366 = vpow2.f32 %v1303_v34 }
 0x3fc   :  { %v6453_v13 = vpop.xlane.xlu2 %1195  ;;  %v6455_v21 = vpop.xlane.xlu1 %1204  ;;  %5368 = vpow2.f32 %v1297_v41 }
 0x3ff   :  { %v6459_v63 = vpop.eup %5362 }
 0x400   :  { %v6461_v47 = vpop.eup %5364  ;;  %v1371_v31 = vsel %vm27_vm0, %v6459_v63, 0.0 }
 0x401   :  { %1372 = vadd.xlane.f32.xlu0 %v1371_v31  ;;  %v1401_v9 = vsel %vm27_vm0, %v6461_v47, 0.0  ;;  %1390 = vadd.xlane.f32.xlu2 %v1389_v15  ;;  %v6473_v5 = vpop.eup %5366  ;;  %v5194_v31 = vunpack.i.l.bf16 %v6175_v55  ;;  %v1184_v15 = vpop.xlane.xlu0 %1183 }
 0x402   :  { %1402 = vadd.xlane.f32.xlu1 %v1401_v9  ;;  %v6475_v2 = vpop.eup %5368  ;;  %v1392_v58 = vsel %vm27_vm0, %v6473_v5, 0.0  ;;  %v5199_v9 = vunpack.i.l.bf16 %v6169_v54  ;;  %v5211_v54 = vpack.i.bf16 %v6040_v50, %v6006_v38 }
 0x403   :  { %v1383_v33 = vsel %vm27_vm0, %v6475_v2, 0.0 }
 0x404   :  { %v6469_v19 = vpop.xlane.xlu2 %1213  ;;  %v6471_v14 = vpop.xlane.xlu1 %1216 }
 0x409   :  { %1393 = vadd.xlane.f32.xlu0 %v1392_v58  ;;  %1384 = vadd.xlane.f32.xlu2 %v1383_v33  ;;  %v5206_v33 = vpack.i.bf16 %v5984_v32, %v6000_v37  ;;  %v5190_v37 = vunpack.i.h.bf16 %v6089_v62 }
 0x40c   :  { %v1319_v3 = vpop.xlane.xlu1 %1318  ;;  %v6481_v49 = vpop.xlane.xlu2 %1207 }
 0x40d   :  { %5370 = vrcp.f32 %v1319_v3  ;;  %v5221_v3 = vpack.i.bf16 %v6020_v43, %v6049_v52  ;;  %v5185_v43 = vunpack.i.h.bf16 %v6063_v60  ;;  %v1244_v60 = vsub.f32 %v6319_v8, %v6453_v13 }
 0x40e   :  { %v1248_v8 = vsub.f32 %v6340_v56, %v6481_v49 }
 0x413   :  { %v5371_v34 = vpop.eup %5370 }
 0x414   :  { %v1445_v41 = vmul.f32 %v5371_v34, %v6342_v57  ;;  %v6487_v58 = vpop.xlane.xlu2 %1219 }
 0x416   :  { %4902 = vmatmul.msk.f32.vlgmr.msrb.gmra.mxu1 %vm27_vm0, %v1445_v41 }
 0x417   :  { %1783 = vmatpush.msrb.mxu1 %v5194_v31  ;;  %v1343_v57 = vpop.xlane.xlu1 %1342 }
 0x419   :  { %1784 = vmatpush.msrb.mxu1 %v5199_v9 }
 0x41b   :  { %5207 = vrot.lane.b32.xlu1 %v5206_v33, %s5634_s20 }
 0x41d   :  { %5222 = vrot.lane.b32.xlu0 %v5221_v3, %s5634_s20 }
 0x41f   :  { %v1331_v55 = vpop.xlane.xlu0 %1330 }
 0x420   :  { %v1346_v34 = vpop.xlane.xlu2 %1345  ;;  %5372 = vrcp.f32 %v1331_v55  ;;  %v5204_v55 = vunpack.i.l.bf16 %v6306_v36 }
 0x421   :  { %5212 = vrot.lane.b32.xlu2 %v5211_v54, %s5634_s20 }
 0x426   :  { %v5373_v41 = vpop.eup %5372 }
 0x427   :  { %v1449_v31 = vmul.f32 %v5373_v41, %v6363_v29  ;;  %v1322_v32 = vpop.xlane.xlu0 %1321  ;;  %v1240_v41 = vsub.f32 %v6298_v23, %v1184_v15 }
 0x428   :  { %v1334_v9 = vpop.xlane.xlu2 %1333  ;;  %v1325_v33 = vpop.xlane.xlu1 %1324  ;;  %5374 = vrcp.f32 %v1322_v32 }
 0x429   :  { %5376 = vrcp.f32 %v1334_v9  ;;  %4906 = vmatmul.msk.f32.vlgmr.msra.gmra.mxu3 %vm27_vm0, %v1449_v31  ;;  %v1291_v9 = vmul.f32 1.442695, %v1240_v41 }
 0x42a   :  { %5378 = vrcp.f32 %v1325_v33  ;;  %1853 = vmatpush.msra.mxu3 %v5190_v37 }
 0x42b   :  { %5380 = vrcp.f32 %v1343_v57 }
 0x42c   :  { %1854 = vmatpush.msra.mxu3 %v5185_v43 }
 0x42e   :  { %v5375_v38 = vpop.eup %5374 }
 0x42f   :  { %v5377_v50 = vpop.eup %5376  ;;  %v1446_v52 = vmul.f32 %v5375_v38, %v6373_v26  ;;  %v1299_v26 = vmul.f32 1.442695, %v1244_v60 }
 0x430   :  { %v5379_v29 = vpop.eup %5378  ;;  %v1450_v3 = vmul.f32 %v5377_v50, %v6371_v17  ;;  %v1251_v17 = vsub.f32 %v6333_v44, %v6471_v14  ;;  %v1307_v44 = vmul.f32 1.442695, %v1248_v8 }
 0x431   :  { %v1447_v62 = vmul.f32 %v5379_v29, %v6375_v6  ;;  %4903 = vmatmul.msk.f32.gmra.mxu1 %vm27_vm0, %v1446_v52  ;;  %v5381_v54 = vpop.eup %5380 }
 0x432   :  { %4907 = vmatmul.msk.f32.gmra.mxu3 %vm27_vm0, %v1450_v3  ;;  %v1328_v57 = vpop.xlane.xlu0 %1327  ;;  %v1453_v6 = vmul.f32 %v5381_v54, %v6356_v51  ;;  %v1313_v31 = vmul.f32 1.442695, %v1251_v17  ;;  %v5226_v54 = vpack.i.bf16 %v6010_v40, %v6036_v48  ;;  %v5216_v48 = vpack.i.bf16 %v6018_v42, %v5994_v35 }
 0x433   :  { %4904 = vmatmul.msk.f32.vlgmr.msrb.gmra.mxu2 %vm27_vm0, %v1447_v62  ;;  %5382 = vrcp.f32 %v1328_v57 }
 0x434   :  { %1818 = vmatpush.msrb.mxu2 %v5204_v55  ;;  %5384 = vrcp.f32 %v1346_v34  ;;  %v5205_v55 = vunpack.i.h.bf16 %v6306_v36 }
 0x435   :  { %5386 = vpow2.f32 %v1299_v26 }
 0x436   :  { %5388 = vpow2.f32 %v1313_v31 }
 0x437   :  { %5390 = vpow2.f32 %v1291_v9 }
 0x438   :  { %5392 = vpow2.f32 %v1307_v44 }
 0x439   :  { %4910 = vmatmul.msk.f32.vlgmr.msra.gmra.mxu1 %vm27_vm0, %v1453_v6  ;;  %v5383_v32 = vpop.eup %5382 }
 0x43a   :  { %v1448_v13 = vmul.f32 %v5383_v32, %v6385_v45  ;;  %v5385_v37 = vpop.eup %5384  ;;  %v1358_v52 = vpop.xlane.xlu0 %1357 }
 0x43b   :  { %v1454_v51 = vmul.f32 %v5385_v37, %v6365_v7  ;;  %v6521_v14 = vpop.eup %5386 }
 0x43c   :  { %4905 = vmatmul.msk.f32.gmra.mxu2 %vm27_vm0, %v1448_v13  ;;  %v6524_v23 = vpop.eup %5388  ;;  %v1386_v56 = vsel %vm27_vm0, %v6521_v14, 0.0 }
 0x43d   :  { %v1407_v45 = vsel %vm27_vm0, %v6524_v23, 0.0  ;;  %v6530_v49 = vpop.eup %5390 }
 0x43e   :  { %v6532_v7 = vpop.eup %5392  ;;  %v1374_v34 = vsel %vm27_vm0, %v6530_v49, 0.0 }
 0x43f   :  { %v1398_v50 = vsel %vm27_vm0, %v6532_v7, 0.0 }
 0x441   :  { %4911 = vmatmul.msk.f32.gmra.mxu1 %vm27_vm0, %v1454_v51 }
 0x444   :  { %v1337_v15 = vpop.xlane.xlu1 %1336 }
 0x445   :  { %5394 = vrcp.f32 %v1337_v15  ;;  %1387 = vadd.xlane.f32.xlu1 %v1386_v56 }
 0x447   :  { %1408 = vadd.xlane.f32.xlu0 %v1407_v45 }
 0x44a   :  { %1375 = vadd.xlane.f32.xlu2 %v1374_v34 }
 0x44b   :  { %v5395_v33 = vpop.eup %5394 }
 0x44c   :  { %v1451_v43 = vmul.f32 %v5395_v33, %v6395_v16  ;;  %v1355_v38 = vpop.xlane.xlu1 %1354 }
 0x44d   :  { %5396 = vrcp.f32 %v1355_v38  ;;  %1399 = vadd.xlane.f32.xlu1 %v1398_v50 }
 0x44e   :  { %4908 = vmatmul.msk.f32.vlgmr.msrb.gmra.mxu0 %vm27_vm0, %v1451_v43  ;;  %5398 = vrcp.f32 %v1358_v52  ;;  %v1247_v43 = vsub.f32 %v6322_v10, %v6455_v21 }
 0x450   :  { %v1305_v50 = vmul.f32 1.442695, %v1247_v43 }
 0x453   :  { %v5397_v29 = vpop.eup %5396 }
 0x454   :  { %v1457_v3 = vmul.f32 %v5397_v29, %v6400_v46  ;;  %v1340_v62 = vpop.xlane.xlu1 %1339  ;;  %v1367_v60 = vpop.xlane.xlu2 %1366 }
 0x455   :  { %5400 = vrcp.f32 %v1340_v62  ;;  %v5399_v57 = vpop.eup %5398 }
 0x456   :  { %5402 = vrcp.f32 %v1367_v60  ;;  %4914 = vmatmul.msk.f32.vlgmr.msrb.gmra.mxu3 %vm27_vm0, %v1457_v3  ;;  %v1379_v16 = vpop.xlane.xlu0 %1378  ;;  %v1458_v36 = vmul.f32 %v5399_v57, %v6389_v18 }
 0x457   :  { %1993 = vmatpush.msrb.mxu3 %v5205_v55  ;;  %5404 = vrcp.f32 %v1379_v16 }
 0x45b   :  { %v5401_v17 = vpop.eup %5400  ;;  %5227 = vrot.lane.b32.xlu0 %v5226_v54, %s5634_s20 }
 0x45c   :  { %v5403_v26 = vpop.eup %5402  ;;  %v1370_v46 = vpop.xlane.xlu1 %1369  ;;  %v1452_v6 = vmul.f32 %v5401_v17, %v6407_v30 }
 0x45d   :  { %v1461_v41 = vmul.f32 %v5403_v26, %v6411_v28  ;;  %v1349_v31 = vpop.xlane.xlu2 %1348  ;;  %5406 = vrcp.f32 %v1370_v46  ;;  %v5405_v40 = vpop.eup %5404 }
 0x45e   :  { %5408 = vrcp.f32 %v1349_v31  ;;  %4909 = vmatmul.msk.f32.gmra.mxu0 %vm27_vm0, %v1452_v6  ;;  %4915 = vmatmul.msk.f32.gmra.mxu3 %vm27_vm0, %v1458_v36  ;;  %v1465_v18 = vmul.f32 %v5405_v40, %v6416_v4 }
 0x45f   :  { %4918 = vmatmul.msk.f32.vlgmr.msrb.gmra.mxu1 %vm27_vm0, %v1461_v41 }
 0x462   :  { %5217 = vrot.lane.b32.xlu2 %v5216_v48, %s5634_s20 }
 0x463   :  { %v5407_v32 = vpop.eup %5406 }
 0x464   :  { %v5409_v30 = vpop.eup %5408  ;;  %v1352_v28 = vpop.xlane.xlu1 %1351  ;;  %v1462_v8 = vmul.f32 %v5407_v32, %v6424_v12 }
 0x465   :  { %v1455_v13 = vmul.f32 %v5409_v30, %v6422_v20  ;;  %v1361_v37 = vpop.xlane.xlu2 %1360  ;;  %5410 = vrcp.f32 %v1352_v28 }
 0x466   :  { %5412 = vrcp.f32 %v1361_v37  ;;  %4922 = vmatmul.msk.f32.vlgmr.msra.gmra.mxu3 %vm27_vm0, %v1465_v18 }
 0x467   :  { %4912 = vmatmul.msk.f32.vlgmr.msra.gmra.mxu2 %vm27_vm0, %v1455_v13  ;;  %4919 = vmatmul.msk.f32.gmra.mxu1 %vm27_vm0, %v1462_v8 }
 0x46b   :  { %v5411_v35 = vpop.eup %5410 }
 0x46c   :  { %v5413_v42 = vpop.eup %5412  ;;  %v1382_v9 = vpop.xlane.xlu1 %1381  ;;  %v1456_v44 = vmul.f32 %v5411_v35, %v6431_v61  ;;  %v1250_v61 = vsub.f32 %v6330_v25, %v6469_v19  ;;  %v1252_v25 = vsub.f32 %v6350_v22, %v6487_v58 }
 0x46d   :  { %v1459_v4 = vmul.f32 %v5413_v42, %v6434_v11  ;;  %5414 = vrcp.f32 %v1382_v9  ;;  %v1364_v12 = vpop.xlane.xlu2 %1363 }
 0x46e   :  { %5416 = vrcp.f32 %v1364_v12  ;;  %v1311_v33 = vmul.f32 1.442695, %v1250_v61  ;;  %v1315_v55 = vmul.f32 1.442695, %v1252_v25 }
 0x46f   :  { %4913 = vmatmul.msk.f32.gmra.mxu2 %vm27_vm0, %v1456_v44  ;;  %4916 = vmatmul.msk.f32.vlgmr.msra.gmra.mxu0 %vm27_vm0, %v1459_v4 }
 0x470   :  { %5418 = vpow2.f32 %v1311_v33 }
 0x473   :  { %v5415_v20 = vpop.eup %5414 }
 0x474   :  { %v5417_v51 = vpop.eup %5416  ;;  %v1466_v15 = vmul.f32 %v5415_v20, %v6445_v1  ;;  %v1373_v11 = vpop.xlane.xlu0 %1372 }
 0x475   :  { %v1391_v56 = vpop.xlane.xlu2 %1390  ;;  %v1460_v45 = vmul.f32 %v5417_v51, %v6443_v59  ;;  %v1403_v38 = vpop.xlane.xlu1 %1402  ;;  %5420 = vrcp.f32 %v1373_v11 }
 0x476   :  { %4923 = vmatmul.msk.f32.gmra.mxu3 %vm27_vm0, %v1466_v15  ;;  %5422 = vrcp.f32 %v1403_v38  ;;  %v6573_v3 = vpop.eup %5418 }
 0x477   :  { %4917 = vmatmul.msk.f32.gmra.mxu0 %vm27_vm0, %v1460_v45  ;;  %5424 = vpow2.f32 %v1305_v50  ;;  %v1404_v10 = vsel %vm27_vm0, %v6573_v3, 0.0 }
 0x478   :  { %5426 = vpow2.f32 %v1315_v55 }
 0x479   :  { %5428 = vrcp.f32 %v1391_v56 }
 0x47b   :  { %v5421_v19 = vpop.eup %5420 }
 0x47c   :  { %v1394_v29 = vpop.xlane.xlu0 %1393  ;;  %v5423_v21 = vpop.eup %5422  ;;  %v1463_v54 = vmul.f32 %v5421_v19, %v6459_v63 }
 0x47d   :  { %v1385_v34 = vpop.xlane.xlu2 %1384  ;;  %v1473_v57 = vmul.f32 %v5423_v21, %v6461_v47  ;;  %v6581_v26 = vpop.eup %5424 }
 0x47e   :  { %v1395_v58 = vsel %vm27_vm0, %v6581_v26, 0.0  ;;  %v6587_v47 = vpop.eup %5426  ;;  %5430 = vrcp.f32 %v1385_v34 }
 0x47f   :  { %v1410_v63 = vsel %vm27_vm0, %v6587_v47, 0.0  ;;  %v5429_v32 = vpop.eup %5428 }
 0x480   :  { %v1469_v9 = vmul.f32 %v5429_v32, %v6457_v53 }
 0x484   :  { %v5431_v30 = vpop.eup %5430 }
 0x485   :  { %v5213_v1 = vpop.permute.xlu2 %5212  ;;  %v1467_v44 = vmul.f32 %v5431_v30, %v6475_v2 }
 0x486   :  { %v5215_v59 = vunpack.i.h.bf16 %v5213_v1  ;;  %v5214_v52 = vunpack.i.l.bf16 %v5213_v1 }
 0x488   :  { %1888 = vmatpush.msrb.mxu0 %v5215_v59  ;;  %1923 = vmatpush.msra.mxu1 %v5214_v52 }
 0x48b   :  { %1405 = vadd.xlane.f32.xlu2 %v1404_v10 }
 0x48d   :  { %v5208_v62 = vpop.permute.xlu1 %5207 }
 0x48e   :  { %v5210_v60 = vunpack.i.h.bf16 %v5208_v62  ;;  %v5209_v16 = vunpack.i.l.bf16 %v5208_v62 }
 0x48f   :  { %v5223_v17 = vpop.permute.xlu0 %5222 }
 0x490   :  { %v5224_v46 = vunpack.i.l.bf16 %v5223_v17  ;;  %1819 = vmatpush.msrb.mxu2 %v5209_v16  ;;  %1994 = vmatpush.msrb.mxu3 %v5210_v60  ;;  %v5225_v22 = vunpack.i.h.bf16 %v5223_v17 }
 0x491   :  { %4920 = vmatmul.msk.f32.vlgmr.msrb.gmra.mxu2 %vm27_vm0, %v1463_v54  ;;  %4930 = vmatmul.msk.f32.vlgmr.msrb.gmra.mxu3 %vm27_vm0, %v1473_v57 }
 0x492   :  { %1958 = vmatpush.msra.mxu2 %v5224_v46 }
 0x493   :  { %1396 = vadd.xlane.f32.xlu2 %v1395_v58  ;;  %v6591_v6 = vpop.f32.mrf.mxu1 }
 0x494   :  { %1959 = vmatpush.msra.mxu2 %v5225_v22 }
 0x49b   :  { %1411 = vadd.xlane.f32.xlu2 %v1410_v63 }
 0x4ac   :  { %v1576_v36 = vpop.f32.mrf.mxu3 }
 0x4ad   :  { %2041 = vrot.lane.b32.xlu1 %v1576_v36, %s5636_s21 }
 0x4ae   :  { %v6594_v41 = vpop.f32.mrf.mxu1 }
 0x4b5   :  { %v1579_v31 = vpop.f32.mrf.mxu3 }
 0x4b6   :  { %2043 = vrot.lane.b32.xlu2 %v1579_v31, %s5636_s21  ;;  %v1646_v40 = vpop.f32.mrf.mxu1 }
 0x4b7   :  { %2057 = vrot.lane.b32.xlu0 %v1646_v40, %s5637_s22 }
 0x4b8   :  { %v1388_v18 = vpop.xlane.xlu1 %1387 }
 0x4ba   :  { %v1409_v8 = vpop.xlane.xlu0 %1408 }
 0x4bd   :  { %v1376_v48 = vpop.xlane.xlu2 %1375 }
 0x4be   :  { %5432 = vrcp.f32 %v1376_v48  ;;  %v1649_v56 = vpop.f32.mrf.mxu1 }
 0x4bf   :  { %5434 = vrcp.f32 %v1394_v29 }
 0x4c0   :  { %5436 = vrcp.f32 %v1388_v18  ;;  %v1400_v10 = vpop.xlane.xlu1 %1399 }
 0x4c1   :  { %5438 = vrcp.f32 %v1409_v8  ;;  %v125_v8 = vld [vmem:[%s7919_s3 + $0x18] sm:$0xff] }
 0x4c4   :  { %v5433_v28 = vpop.eup %5432 }
 0x4c5   :  { %v5218_v13 = vpop.permute.xlu2 %5217  ;;  %v1464_v37 = vmul.f32 %v5433_v28, %v6530_v49  ;;  %v5435_v12 = vpop.eup %5434 }
 0x4c6   :  { %v5220_v35 = vunpack.i.h.bf16 %v5218_v13  ;;  %v5219_v42 = vunpack.i.l.bf16 %v5218_v13  ;;  %v5437_v49 = vpop.eup %5436  ;;  %v1470_v2 = vmul.f32 %v5435_v12, %v6473_v5  ;;  %v124_v13 = vld [vmem:[%s7919_s3 + $0x10] sm:$0xff] }
 0x4c7   :  { %4921 = vmatmul.msk.f32.gmra.mxu2 %vm27_vm0, %v1464_v37  ;;  %v1468_v53 = vmul.f32 %v5437_v49, %v6521_v14  ;;  %v5439_v45 = vpop.eup %5438  ;;  %v6613_v14 = vpop.f32.mrf.mxu2  ;;  %v123_v37 = vld [vmem:[%s7919_s3 + $0x8] sm:$0xff] }
 0x4c8   :  { %1889 = vmatpush.msrb.mxu0 %v5220_v35  ;;  %1924 = vmatpush.msra.mxu1 %v5219_v42  ;;  %v1475_v61 = vmul.f32 %v5439_v45, %v6524_v23  ;;  %v122_v42 = vld [vmem:[%s7919_s3] sm:$0xff] }
 0x4c9   :  { %4924 = vmatmul.msk.f32.vlgmr.msrb.gmra.mxu0 %vm27_vm0, %v1467_v44  ;;  %4926 = vmatmul.msk.f32.vlgmr.msra.gmra.mxu1 %vm27_vm0, %v1469_v9 }
 0x4ca   :  { %2206 = vmatpush.msrb.mxu1 %v125_v8  ;;  %v5601_v8 = vld [vmem:[%s7917_s1] sm:$0xff] }
 0x4cb   :  { %v1611_v4 = vpop.f32.mrf.mxu0 }
 0x4cc   :  { %2045 = vrot.lane.b32.xlu1 %v1611_v4, %s5636_s21  ;;  %2207 = vmatpush.msrb.mxu1 %v124_v13 }
 0x4cd   :  { %v5228_v20 = vpop.permute.xlu0 %5227 }
 0x4ce   :  { %v5229_v51 = vunpack.i.l.bf16 %v5228_v20  ;;  %v5230_v15 = vunpack.i.h.bf16 %v5228_v20  ;;  %2208 = vmatpush.msrb.mxu1 %v123_v37 }
 0x4cf   :  { %v6616_v34 = vpop.f32.mrf.mxu2 }
 0x4d0   :  { %2028 = vmatpush.msra.mxu0 %v5229_v51  ;;  %2209 = vmatpush.msrb.mxu1 %v122_v42 }
 0x4d1   :  { %4925 = vmatmul.msk.f32.gmra.mxu0 %vm27_vm0, %v1468_v53  ;;  %4927 = vmatmul.msk.f32.gmra.mxu1 %vm27_vm0, %v1470_v2 }
 0x4d2   :  { %2029 = vmatpush.msra.mxu0 %v5230_v15 }
 0x4d4   :  { %2059 = vrot.lane.b32.xlu1 %v1649_v56, %s5637_s22 }
 0x4d9   :  { %v1716_v11 = vpop.f32.mrf.mxu3  ;;  %4932 = vmatmul.msk.f32.vlgmr.msra.gmra.mxu0 %vm27_vm0, %v1475_v61 }
 0x4da   :  { %2073 = vrot.lane.b32.xlu2 %v1716_v11, %s5638_s23 }
 0x4db   :  { %v1614_v33 = vpop.f32.mrf.mxu0 }
 0x4dc   :  { %v1786_v5 = vpop.f32.mrf.mxu1 }
 0x4dd   :  { %2089 = vrot.lane.b32.xlu0 %v1786_v5, %s5639_s24 }
 0x4e1   :  { %v1719_v43 = vpop.f32.mrf.mxu3 }
 0x4e4   :  { %v1789_v1 = vpop.f32.mrf.mxu1 }
 0x4e5   :  { %2075 = vrot.lane.b32.xlu0 %v1719_v43, %s5638_s23 }
 0x4e9   :  { %v1856_v50 = vpop.f32.mrf.mxu3 }
 0x4ea   :  { %v1681_v38 = vpop.f32.mrf.mxu2 }
 0x4ec   :  { %v1751_v23 = vpop.f32.mrf.mxu0 }
 0x4ed   :  { %2077 = vrot.lane.b32.xlu2 %v1751_v23, %s5638_s23  ;;  %2061 = vrot.lane.b32.xlu0 %v1681_v38, %s5637_s22 }
 0x4f2   :  { %v1684_v59 = vpop.f32.mrf.mxu2 }
 0x4f5   :  { %2091 = vrot.lane.b32.xlu2 %v1789_v1, %s5639_s24  ;;  %2105 = vrot.lane.b32.xlu0 %v1856_v50, %s5640_s25 }
 0x4fd   :  { %2063 = vrot.lane.b32.xlu2 %v1684_v59, %s5637_s22 }
 0x4fe   :  { %v1406_v52 = vpop.xlane.xlu2 %1405 }
 0x4ff   :  { %5440 = vrcp.f32 %v1406_v52 }
 0x505   :  { %v5441_v29 = vpop.eup %5440 }
 0x506   :  { %v1397_v25 = vpop.xlane.xlu2 %1396  ;;  %v1474_v19 = vmul.f32 %v5441_v29, %v6573_v3  ;;  %v1754_v3 = vpop.f32.mrf.mxu0 }
 0x507   :  { %5442 = vrcp.f32 %v1397_v25 }
 0x508   :  { %4931 = vmatmul.msk.f32.gmra.mxu3 %vm27_vm0, %v1474_v19  ;;  %5444 = vrcp.f32 %v1400_v10 }
 0x50d   :  { %v5443_v21 = vpop.eup %5442 }
 0x50e   :  { %v1471_v62 = vmul.f32 %v5443_v21, %v6581_v26  ;;  %v1412_v55 = vpop.xlane.xlu2 %1411  ;;  %v5445_v60 = vpop.eup %5444 }
 0x50f   :  { %5446 = vrcp.f32 %v1412_v55  ;;  %v1472_v57 = vmul.f32 %v5445_v60, %v6532_v7  ;;  %v1859_v26 = vpop.f32.mrf.mxu3 }
 0x510   :  { %4928 = vmatmul.msk.f32.vlgmr.msra.gmra.mxu2 %vm27_vm0, %v1471_v62 }
 0x514   :  { %v1821_v7 = vpop.f32.mrf.mxu2 }
 0x515   :  { %v5447_v16 = vpop.eup %5446 }
 0x516   :  { %v1476_v54 = vmul.f32 %v5447_v16, %v6587_v47  ;;  %v2044_v49 = vpop.permute.xlu2 %2043 }
 0x517   :  { %v1996_v58 = vpop.f32.mrf.mxu3  ;;  %v2150_v50 = vsel %vm474_vm2, %v6594_v41, %v2044_v49 }
 0x518   :  { %4929 = vmatmul.msk.f32.gmra.mxu2 %vm27_vm0, %v1472_v57  ;;  %4933 = vmatmul.msk.f32.gmra.mxu0 %vm27_vm0, %v1476_v54 }
 0x51f   :  { %v2042_v9 = vpop.permute.xlu1 %2041 }
 0x520   :  { %v2149_v2 = vsel %vm474_vm2, %v6591_v6, %v2042_v9 }
 0x529   :  { %v2058_v31 = vpop.permute.xlu0 %2057 }
 0x52a   :  { %v2154_v15 = vsel %vm2153_vm4, %v2149_v2, %v2058_v31 }
 0x534   :  { %v2074_v51 = vpop.permute.xlu2 %2073 }
 0x535   :  { %v2159_v56 = vsel %vm2158_vm5, %v2154_v15, %v2074_v51 }
 0x53e   :  { %v2046_v4 = vpop.permute.xlu1 %2045 }
 0x53f   :  { %v2151_v21 = vsel %vm474_vm2, %v6613_v14, %v2046_v4 }
 0x546   :  { %v1891_v17 = vpop.f32.mrf.mxu0  ;;  %v1926_v46 = vpop.f32.mrf.mxu1 }
 0x547   :  { %2121 = vrot.lane.b32.xlu1 %v1926_v46, %s5641_s26  ;;  %2109 = vrot.lane.b32.xlu0 %v1891_v17, %s5640_s25  ;;  %v2060_v20 = vpop.permute.xlu1 %2059  ;;  %v2078_v5 = vpop.permute.xlu2 %2077 }
 0x548   :  { %v2155_v59 = vsel %vm2153_vm4, %v2150_v50, %v2060_v20 }
 0x54a   :  { %v1824_v36 = vpop.f32.mrf.mxu2 }
 0x54e   :  { %v1929_v22 = vpop.f32.mrf.mxu1  ;;  %v1894_v47 = vpop.f32.mrf.mxu0 }
 0x54f   :  { %2107 = vrot.lane.b32.xlu1 %v1859_v26, %s5640_s25  ;;  %2123 = vrot.lane.b32.xlu0 %v1929_v22, %s5641_s26  ;;  %v2090_v48 = vpop.permute.xlu0 %2089  ;;  %v2092_v23 = vpop.permute.xlu2 %2091 }
 0x550   :  { %v2163_v61 = vsel %vm27_vm0, %v2159_v56, %v2090_v48 }
 0x556   :  { %v2031_v63 = vpop.f32.mrf.mxu0 }
 0x557   :  { %2093 = vrot.lane.b32.xlu1 %v1821_v7, %s5639_s24  ;;  %2137 = vrot.lane.b32.xlu0 %v1996_v58, %s5642_s27  ;;  %v2076_v28 = vpop.permute.xlu0 %2075  ;;  %v2064_v52 = vpop.permute.xlu2 %2063 }
 0x558   :  { %v2160_v29 = vsel %vm2158_vm5, %v2155_v59, %v2076_v28  ;;  %v134_v59 = vld [vmem:[%s7920_s4] sm:$0xff] }
 0x559   :  { %v2164_v25 = vsel %vm27_vm0, %v2160_v29, %v2092_v23  ;;  %v135_v23 = vld [vmem:[%s7920_s4 + $0x8] sm:$0xff] }
 0x55f   :  { %2079 = vrot.lane.b32.xlu1 %v1754_v3, %s5638_s23  ;;  %2047 = vrot.lane.b32.xlu0 %v1614_v33, %s5636_s21  ;;  %v2062_v35 = vpop.permute.xlu0 %2061 }
 0x560   :  { %v2156_v60 = vsel %vm2153_vm4, %v2151_v21, %v2062_v35 }
 0x561   :  { %v2161_v16 = vsel %vm2158_vm5, %v2156_v60, %v2078_v5 }
 0x567   :  { %2141 = vrot.lane.b32.xlu1 %v2031_v63, %s5642_s27  ;;  %2095 = vrot.lane.b32.xlu0 %v1824_v36, %s5639_s24  ;;  %v2106_v44 = vpop.permute.xlu0 %2105 }
 0x568   :  { %v2168_v11 = vsel %vm2167_vm6, %v2163_v61, %v2106_v44 }
 0x58b   :  { %v1999_v40 = vpop.f32.mrf.mxu3 }
 0x58c   :  { %2139 = vrot.lane.b32.xlu2 %v1999_v40, %s5642_s27 }
 0x593   :  { %v1961_v32 = vpop.f32.mrf.mxu2 }
 0x594   :  { %2125 = vrot.lane.b32.xlu2 %v1961_v32, %s5641_s26 }
 0x595   :  { %v2034_v30 = vpop.f32.mrf.mxu0 }
 0x596   :  { %2143 = vrot.lane.b32.xlu0 %v2034_v30, %s5642_s27 }
 0x59b   :  { %v1964_v18 = vpop.f32.mrf.mxu2 }
 0x59c   :  { %2127 = vrot.lane.b32.xlu1 %v1964_v18, %s5641_s26  ;;  %2111 = vrot.lane.b32.xlu2 %v1894_v47, %s5640_s25 }
 0x5b9   :  { %v2110_v12 = vpop.permute.xlu0 %2109  ;;  %v2122_v45 = vpop.permute.xlu1 %2121 }
 0x5ba   :  { %v2173_v33 = vsel %vm2172_vm7, %v2168_v11, %v2122_v45 }
 0x5c1   :  { %v2124_v53 = vpop.permute.xlu0 %2123  ;;  %v2108_v6 = vpop.permute.xlu1 %2107 }
 0x5c2   :  { %v2169_v19 = vsel %vm2167_vm6, %v2164_v25, %v2108_v6  ;;  %v137_v6 = vld [vmem:[%s7920_s4 + $0x18] sm:$0xff] }
 0x5c3   :  { %v2174_v55 = vsel %vm2172_vm7, %v2169_v19, %v2124_v53  ;;  %2363 = vmatpush.msrb.mxu2 %v137_v6 }
 0x5c9   :  { %v2138_v43 = vpop.permute.xlu0 %2137  ;;  %v2094_v1 = vpop.permute.xlu1 %2093 }
 0x5ca   :  { %v2178_v38 = vsel %vm2177_vm8, %v2173_v33, %v2138_v43  ;;  %v2165_v57 = vsel %vm27_vm0, %v2161_v16, %v2094_v1 }
 0x5cb   :  { %4934 = vmatmul.msk.f32.vlgmr.msrb.gmra.mxu1 %vm139_vm1, %v2178_v38  ;;  %v2170_v54 = vsel %vm2167_vm6, %v2165_v57, %v2110_v12 }
 0x5d1   :  { %v2080_v10 = vpop.permute.xlu1 %2079  ;;  %v2048_v26 = vpop.permute.xlu0 %2047 }
 0x5d2   :  { %v2152_v22 = vsel %vm474_vm2, %v6616_v34, %v2048_v26  ;;  %v6698_v34 = vld [vmem:[%s7920_s4 + $0x20] sm:$0xff] }
 0x5d3   :  { %v2157_v58 = vsel %vm2153_vm4, %v2152_v22, %v2064_v52  ;;  %v2227_v18 = vperm.slane %v6698_v34, 4  ;;  %v6749_v16 = vperm.slane %v6698_v34, 2 }
 0x5d4   :  { %v2162_v63 = vsel %vm2158_vm5, %v2157_v58, %v2080_v10 }
 0x5d9   :  { %v2142_v17 = vpop.permute.xlu1 %2141  ;;  %v2096_v7 = vpop.permute.xlu0 %2095 }
 0x5da   :  { %v2166_v36 = vsel %vm27_vm0, %v2162_v63, %v2096_v7 }
 0x5e6   :  { %v2140_v62 = vpop.permute.xlu2 %2139 }
 0x5e7   :  { %v2179_v41 = vsel %vm2177_vm8, %v2174_v55, %v2140_v62 }
 0x5e8   :  { %4935 = vmatmul.msk.f32.gmra.mxu1 %vm139_vm1, %v2179_v41 }
 0x5ee   :  { %v2126_v3 = vpop.permute.xlu2 %2125 }
 0x5ef   :  { %v2175_v46 = vsel %vm2172_vm7, %v2170_v54, %v2126_v3 }
 0x5f0   :  { %v2180_v14 = vsel %vm2177_vm8, %v2175_v46, %v2142_v17  ;;  %v6753_v17 = vperm.slane %v6698_v34, 3 }
 0x5f1   :  { %4936 = vmatmul.msk.f32.gmra.mxu1 %vm139_vm1, %v2180_v14 }
 0x5f6   :  { %v2112_v47 = vpop.permute.xlu2 %2111 }
 0x5f7   :  { %v2171_v31 = vsel %vm2167_vm6, %v2166_v36, %v2112_v47 }
 0x608   :  { %v2144_v48 = vpop.permute.xlu0 %2143 }
 0x60e   :  { %v2128_v40 = vpop.permute.xlu1 %2127 }
 0x60f   :  { %v2176_v32 = vsel %vm2172_vm7, %v2171_v31, %v2128_v40 }
 0x610   :  { %v2181_v30 = vsel %vm2177_vm8, %v2176_v32, %v2144_v48 }
 0x611   :  { %4937 = vmatmul.msk.f32.gmra.mxu1 %vm139_vm1, %v2181_v30 }
 0x648   :  { %v2211_v28 = vpop.f32.mrf.mxu1 }
 0x649   :  { %v2223_v13 = vadd.f32 %v5601_v8, %v2211_v28 }
 0x64b   :  { %v6704_v37 = vadd.f32 %v2227_v18, %v2223_v13 }
 0x64d   :  { %v2232_v35 = vsel %vm139_vm1, %v6704_v37, 0.0  ;;  %v2248_v42 = vmul.f32 %v6704_v37, %v6704_v37 }
 0x64e   :  { %2233 = vadd.xlane.f32.xlu2 %v2232_v35 }
 0x64f   :  { %v2252_v9 = vsel %vm139_vm1, %v2248_v42, 0.0 }
 0x650   :  { %2253 = vadd.xlane.f32.xlu1 %v2252_v9 }
 0x665   :  { %v2214_v44 = vpop.f32.mrf.mxu1 }
 0x666   :  { %v2224_v4 = vadd.f32 %v2214_v44, %v5698_v24 }
 0x668   :  { %v6712_v12 = vadd.f32 %v2227_v18, %v2224_v4 }
 0x66a   :  { %v2235_v49 = vsel %vm139_vm1, %v6712_v12, 0.0  ;;  %v2249_v20 = vmul.f32 %v6712_v12, %v6712_v12 }
 0x66b   :  { %2236 = vadd.xlane.f32.xlu0 %v2235_v49 }
 0x66c   :  { %v2255_v51 = vsel %vm139_vm1, %v2249_v20, 0.0 }
 0x66d   :  { %2256 = vadd.xlane.f32.xlu2 %v2255_v51 }
 0x66e   :  { %v2217_v53 = vpop.f32.mrf.mxu1 }
 0x66f   :  { %v2225_v2 = vadd.f32 %v5601_v8, %v2217_v53 }
 0x671   :  { %v6719_v15 = vadd.f32 %v2227_v18, %v2225_v2 }
 0x673   :  { %v2238_v56 = vsel %vm139_vm1, %v6719_v15, 0.0  ;;  %v2250_v24 = vmul.f32 %v6719_v15, %v6719_v15 }
 0x674   :  { %2239 = vadd.xlane.f32.xlu1 %v2238_v56 }
 0x675   :  { %v2258_v45 = vsel %vm139_vm1, %v2250_v24, 0.0 }
 0x676   :  { %2259 = vadd.xlane.f32.xlu0 %v2258_v45 }
 0x68e   :  { %v2220_v61 = vpop.f32.mrf.mxu1 }
 0x68f   :  { %v2226_v11 = vadd.f32 %v2220_v61, %v5702_v27  ;;  %v136_v27 = vld [vmem:[%s7920_s4 + $0x10] sm:$0xff] }
 0x690   :  { %2364 = vmatpush.msrb.mxu2 %v136_v27 }
 0x691   :  { %v6727_v5 = vadd.f32 %v2227_v18, %v2226_v11 }
 0x692   :  { %2365 = vmatpush.msrb.mxu2 %v135_v23 }
 0x693   :  { %v2241_v33 = vsel %vm139_vm1, %v6727_v5, 0.0  ;;  %v2251_v43 = vmul.f32 %v6727_v5, %v6727_v5 }
 0x694   :  { %2242 = vadd.xlane.f32.xlu2 %v2241_v33  ;;  %2366 = vmatpush.msrb.mxu2 %v134_v59  ;;  %v133_v59 = vld [vmem:[%s7919_s3 + $0x58] sm:$0xff] }
 0x695   :  { %v2261_v38 = vsel %vm139_vm1, %v2251_v43, 0.0  ;;  %2406 = vmatpush.msra.mxu3 %v133_v59 }
 0x696   :  { %2262 = vadd.xlane.f32.xlu1 %v2261_v38 }
 0x6c1   :  { %v2234_v1 = vpop.xlane.xlu2 %2233 }
 0x6c2   :  { %v2244_v50 = vmul.f32 %v2234_v1, %v5712_v39 }
 0x6c3   :  { %v2254_v52 = vpop.xlane.xlu1 %2253 }
 0x6c4   :  { %v2268_v29 = vmul.f32 %v2244_v50, %v2244_v50  ;;  %v2264_v25 = vmul.f32 %v2254_v52, %v5712_v39  ;;  %v2320_v3 = vsub.f32 %v6704_v37, %v2244_v50  ;;  %v132_v52 = vld [vmem:[%s7919_s3 + $0x50] sm:$0xff] }
 0x6c5   :  { %2407 = vmatpush.msra.mxu3 %v132_v52  ;;  %v4949_v52 = vld [vmem:[%s7918_s2 + $0x118] sm:$0xff] }
 0x6c6   :  { %v2272_v19 = vsub.f32 %v2264_v25, %v2268_v29  ;;  %2613 = vmatpush.msrb.mxu0 %v4949_v52 }
 0x6c8   :  { %v2276_v10 = vadd.f32 1e-05, %v2272_v19 }
 0x6ca   :  { %5448 = vrsqrt.f32 %v2276_v10  ;;  %vm2286_vm10 = vweird.f32 %v2276_v10 }
 0x6d0   :  { %v5449_v21 = vpop.eup %5448 }
 0x6d1   :  { %v2281_v62 = vmul.f32 %v5449_v21, %v2276_v10  ;;  %vm2287_vm9 = vweird.f32 %v5449_v21  ;;  %v131_v10 = vld [vmem:[%s7919_s3 + $0x48] sm:$0xff] }
 0x6d2   :  { %vm2288_vm11 = vmor %vm2286_vm10, %vm2287_vm9  ;;  %2408 = vmatpush.msra.mxu3 %v131_v10  ;;  %v4952_v10 = vld [vmem:[%s7918_s2 + $0x130] sm:$0xff] }
 0x6d3   :  { %v2282_v55 = vmul.f32 %v5449_v21, %v2281_v62  ;;  %v130_v62 = vld [vmem:[%s7919_s3 + $0x40] sm:$0xff] }
 0x6d4   :  { %2409 = vmatpush.msra.mxu3 %v130_v62  ;;  %v4960_v62 = vld [vmem:[%s7918_s2 + $0x170] sm:$0xff] }
 0x6d5   :  { %v2283_v60 = vmul.f32 0.5, %v2282_v55 }
 0x6d7   :  { %v2284_v41 = vsub.f32 1.5, %v2283_v60  ;;  %v129_v60 = vld [vmem:[%s7919_s3 + $0x38] sm:$0xff] }
 0x6d8   :  { %2410 = vmatpush.msra.mxu3 %v129_v60  ;;  %v4951_v60 = vld [vmem:[%s7918_s2 + $0x128] sm:$0xff] }
 0x6d9   :  { %v2285_v57 = vmul.f32 %v5449_v21, %v2284_v41 }
 0x6db   :  { %v2289_v54 = vsel %vm2288_vm11, %v5449_v21, %v2285_v57 }
 0x6dc   :  { %v2325_v46 = vmul.f32 %v6749_v16, %v2289_v54 }
 0x6de   :  { %v2237_v14 = vpop.xlane.xlu0 %2236  ;;  %v2329_v26 = vmul.f32 %v2325_v46, %v2320_v3 }
 0x6df   :  { %v2245_v22 = vmul.f32 %v2237_v14, %v5712_v39 }
 0x6e0   :  { %v2257_v7 = vpop.xlane.xlu2 %2256  ;;  %v2334_v58 = vadd.f32 %v6753_v17, %v2329_v26 }
 0x6e1   :  { %v2269_v47 = vmul.f32 %v2245_v22, %v2245_v22  ;;  %v2265_v63 = vmul.f32 %v2257_v7, %v5712_v39  ;;  %v2321_v53 = vsub.f32 %v6712_v12, %v2245_v22 }
 0x6e2   :  { %4938 = vmatmul.msk.f32.vlgmr.msrb.gmra.mxu2 %vm139_vm1, %v2334_v58 }
 0x6e3   :  { %v2273_v36 = vsub.f32 %v2265_v63, %v2269_v47  ;;  %v128_v63 = vld [vmem:[%s7919_s3 + $0x30] sm:$0xff] }
 0x6e4   :  { %2411 = vmatpush.msra.mxu3 %v128_v63 }
 0x6e5   :  { %v2277_v31 = vadd.f32 1e-05, %v2273_v36  ;;  %v127_v36 = vld [vmem:[%s7919_s3 + $0x28] sm:$0xff] }
 0x6e6   :  { %2412 = vmatpush.msra.mxu3 %v127_v36 }
 0x6e7   :  { %5450 = vrsqrt.f32 %v2277_v31  ;;  %v2240_v40 = vpop.xlane.xlu1 %2239  ;;  %vm2296_vm13 = vweird.f32 %v2277_v31 }
 0x6e8   :  { %v2246_v48 = vmul.f32 %v2240_v40, %v5712_v39 }
 0x6e9   :  { %v2260_v32 = vpop.xlane.xlu0 %2259 }
 0x6ea   :  { %v2270_v30 = vmul.f32 %v2246_v48, %v2246_v48  ;;  %v2266_v18 = vmul.f32 %v2260_v32, %v5712_v39  ;;  %v2322_v38 = vsub.f32 %v6719_v15, %v2246_v48 }
 0x6ec   :  { %v2274_v28 = vsub.f32 %v2266_v18, %v2270_v30 }
 0x6ed   :  { %v5451_v8 = vpop.eup %5450 }
 0x6ee   :  { %v2291_v13 = vmul.f32 %v5451_v8, %v2277_v31  ;;  %v2278_v35 = vadd.f32 1e-05, %v2274_v28  ;;  %vm2297_vm12 = vweird.f32 %v5451_v8  ;;  %v126_v31 = vld [vmem:[%s7919_s3 + $0x20] sm:$0xff] }
 0x6ef   :  { %vm2298_vm14 = vmor %vm2296_vm13, %vm2297_vm12  ;;  %2413 = vmatpush.msra.mxu3 %v126_v31  ;;  %vm2385_vm13 = vcmask 523264  }
 0x6f0   :  { %v2292_v42 = vmul.f32 %v5451_v8, %v2291_v13  ;;  %5452 = vrsqrt.f32 %v2278_v35  ;;  %vm2306_vm3 = vweird.f32 %v2278_v35 }
 0x6f2   :  { %v2293_v9 = vmul.f32 0.5, %v2292_v42 }
 0x6f4   :  { %v2294_v44 = vsub.f32 1.5, %v2293_v9 }
 0x6f6   :  { %v5453_v4 = vpop.eup %5452  ;;  %v2295_v49 = vmul.f32 %v5451_v8, %v2294_v44  ;;  %v2384_v44 = vperm.slane %v6698_v34, 5 }
 0x6f7   :  { %v2301_v20 = vmul.f32 %v5453_v4, %v2278_v35  ;;  %vm2307_vm15 = vweird.f32 %v5453_v4 }
 0x6f8   :  { %v2299_v51 = vsel %vm2298_vm14, %v5451_v8, %v2295_v49  ;;  %vm2308_vm9 = vmor %vm2306_vm3, %vm2307_vm15 }
 0x6f9   :  { %v2302_v2 = vmul.f32 %v5453_v4, %v2301_v20  ;;  %v2326_v56 = vmul.f32 %v6749_v16, %v2299_v51 }
 0x6fb   :  { %v2303_v24 = vmul.f32 0.5, %v2302_v2  ;;  %v2330_v45 = vmul.f32 %v2326_v56, %v2321_v53 }
 0x6fd   :  { %v2304_v61 = vsub.f32 1.5, %v2303_v24  ;;  %v2335_v11 = vadd.f32 %v6753_v17, %v2330_v45 }
 0x6ff   :  { %v2305_v33 = vmul.f32 %v5453_v4, %v2304_v61  ;;  %4939 = vmatmul.msk.f32.gmra.mxu2 %vm139_vm1, %v2335_v11 }
 0x701   :  { %v2309_v43 = vsel %vm2308_vm9, %v5453_v4, %v2305_v33 }
 0x702   :  { %v2327_v6 = vmul.f32 %v6749_v16, %v2309_v43 }
 0x704   :  { %v2331_v27 = vmul.f32 %v2327_v6, %v2322_v38 }
 0x706   :  { %v2336_v23 = vadd.f32 %v6753_v17, %v2331_v27 }
 0x707   :  { %v2243_v1 = vpop.xlane.xlu2 %2242 }
 0x708   :  { %v2247_v50 = vmul.f32 %v2243_v1, %v5712_v39  ;;  %4940 = vmatmul.msk.f32.gmra.mxu2 %vm139_vm1, %v2336_v23 }
 0x709   :  { %v2263_v29 = vpop.xlane.xlu1 %2262 }
 0x70a   :  { %v2271_v25 = vmul.f32 %v2247_v50, %v2247_v50  ;;  %v2267_v19 = vmul.f32 %v2263_v29, %v5712_v39  ;;  %v2323_v22 = vsub.f32 %v6727_v5, %v2247_v50  ;;  %v4953_v29 = vld [vmem:[%s7918_s2 + $0x138] sm:$0xff] }
 0x70b   :  { %2642 = vmatpush.msra.mxu1 %v4953_v29 }
 0x70c   :  { %v2275_v21 = vsub.f32 %v2267_v19, %v2271_v25  ;;  %v4961_v25 = vld [vmem:[%s7918_s2 + $0x178] sm:$0xff]  ;;  %v4948_v19 = vld [vmem:[%s7918_s2 + $0x110] sm:$0xff] }
 0x70d   :  { %2700 = vmatpush.msrb.mxu3 %v4961_v25  ;;  %2614 = vmatpush.msrb.mxu0 %v4948_v19 }
 0x70e   :  { %v2279_v55 = vadd.f32 1e-05, %v2275_v21  ;;  %v4956_v21 = vld [vmem:[%s7918_s2 + $0x150] sm:$0xff]  ;;  %2643 = vmatpush.msra.mxu1 %v4952_v10 }
 0x70f   :  { %2701 = vmatpush.msrb.mxu3 %v4960_v62 }
 0x710   :  { %5454 = vrsqrt.f32 %v2279_v55  ;;  %vm2316_vm11 = vweird.f32 %v2279_v55  ;;  %2644 = vmatpush.msra.mxu1 %v4951_v60 }
 0x716   :  { %v5455_v41 = vpop.eup %5454 }
 0x717   :  { %v2311_v57 = vmul.f32 %v5455_v41, %v2279_v55  ;;  %vm2317_vm10 = vweird.f32 %v5455_v41  ;;  %v4947_v55 = vld [vmem:[%s7918_s2 + $0x108] sm:$0xff] }
 0x718   :  { %vm2318_vm12 = vmor %vm2316_vm11, %vm2317_vm10  ;;  %2615 = vmatpush.msrb.mxu0 %v4947_v55 }
 0x719   :  { %v2312_v54 = vmul.f32 %v5455_v41, %v2311_v57 }
 0x71b   :  { %v2313_v3 = vmul.f32 0.5, %v2312_v54  ;;  %v4959_v54 = vld [vmem:[%s7918_s2 + $0x168] sm:$0xff] }
 0x71c   :  { %2702 = vmatpush.msrb.mxu3 %v4959_v54 }
 0x71d   :  { %v2314_v46 = vsub.f32 1.5, %v2313_v3 }
 0x71f   :  { %v2315_v14 = vmul.f32 %v5455_v41, %v2314_v46  ;;  %v4946_v46 = vld [vmem:[%s7918_s2 + $0x100] sm:$0xff] }
 0x720   :  { %2616 = vmatpush.msrb.mxu0 %v4946_v46 }
 0x721   :  { %v2319_v26 = vsel %vm2318_vm12, %v5455_v41, %v2315_v14  ;;  %v4955_v41 = vld [vmem:[%s7918_s2 + $0x148] sm:$0xff]  ;;  %v4950_v14 = vld [vmem:[%s7918_s2 + $0x120] sm:$0xff] }
 0x722   :  { %v2328_v7 = vmul.f32 %v6749_v16, %v2319_v26  ;;  %v2338_v16 = vperm.slane %v6698_v34, 6  ;;  %v4954_v26 = vld [vmem:[%s7918_s2 + $0x140] sm:$0xff]  ;;  %2645 = vmatpush.msra.mxu1 %v4950_v14 }
 0x724   :  { %v2332_v58 = vmul.f32 %v2328_v7, %v2323_v22  ;;  %v4958_v7 = vld [vmem:[%s7918_s2 + $0x160] sm:$0xff] }
 0x725   :  { %2703 = vmatpush.msrb.mxu3 %v4958_v7  ;;  %v4965_v7 = vld [vmem:[%s7918_s2 + $0x198] sm:$0xff] }
 0x726   :  { %v2337_v47 = vadd.f32 %v6753_v17, %v2332_v58  ;;  %2729 = vmatpush.msra.mxu0 %v4965_v7 }
 0x728   :  { %4941 = vmatmul.msk.f32.gmra.mxu2 %vm139_vm1, %v2337_v47 }
 0x765   :  { %v2368_v17 = vpop.f32.mrf.mxu2 }
 0x766   :  { %v2369_v40 = vadd.f32 %v2368_v17, %v2338_v16 }
 0x768   :  { %v2380_v48 = vmax.f32 %v2369_v40, 0.0  ;;  %v4994_v40 = vld [vmem:[%s7920_s4 + $0x48] sm:$0xff] }
 0x76a   :  { %4942 = vmatmul.msk.f32.vlgmr.msra.gmra.mxu3 %vm2385_vm13, %v2380_v48 }
 0x782   :  { %v2371_v32 = vpop.f32.mrf.mxu2 }
 0x783   :  { %v2372_v30 = vadd.f32 %v2371_v32, %v2338_v16 }
 0x785   :  { %v2381_v18 = vmax.f32 %v2372_v30, 0.0  ;;  %v6891_v30 = vperm.slane %v4994_v40, 0 }
 0x787   :  { %4943 = vmatmul.msk.f32.gmra.mxu3 %vm2385_vm13, %v2381_v18 }
 0x78b   :  { %v2374_v28 = vpop.f32.mrf.mxu2 }
 0x78c   :  { %v2375_v8 = vadd.f32 %v2374_v28, %v2338_v16 }
 0x78e   :  { %v2382_v13 = vmax.f32 %v2375_v8, 0.0 }
 0x790   :  { %4944 = vmatmul.msk.f32.gmra.mxu3 %vm2385_vm13, %v2382_v13  ;;  %v6894_v13 = vperm.slane %v4994_v40, 1  ;;  %v4972_v40 = vld [vmem:[%s7918_s2 + $0x1d0] sm:$0xff] }
 0x7ab   :  { %v2377_v35 = vpop.f32.mrf.mxu2 }
 0x7ac   :  { %v2378_v42 = vadd.f32 %v2377_v35, %v2338_v16 }
 0x7ae   :  { %v2383_v9 = vmax.f32 %v2378_v42, 0.0 }
 0x7b0   :  { %4945 = vmatmul.msk.f32.gmra.mxu3 %vm2385_vm13, %v2383_v9 }
 0x7ed   :  { %v2415_v4 = vpop.f32.mrf.mxu3 }
 0x7ee   :  { %v2416_v49 = vadd.f32 %v2415_v4, %v2384_v44 }
 0x7f0   :  { %v6807_v20 = vadd.f32 %v2416_v49, %v6704_v37 }
 0x7f2   :  { %v2483_v51 = vsel %vm139_vm1, %v6807_v20, 0.0  ;;  %v2499_v53 = vmul.f32 %v6807_v20, %v6807_v20 }
 0x7f3   :  { %2484 = vadd.xlane.f32.xlu0 %v2483_v51 }
 0x7f4   :  { %v2503_v2 = vsel %vm139_vm1, %v2499_v53, 0.0 }
 0x7f5   :  { %2504 = vadd.xlane.f32.xlu2 %v2503_v2 }
 0x80a   :  { %v2418_v56 = vpop.f32.mrf.mxu3 }
 0x80b   :  { %v2419_v24 = vadd.f32 %v2418_v56, %v2384_v44 }
 0x80d   :  { %v6815_v45 = vadd.f32 %v2419_v24, %v6712_v12 }
 0x80f   :  { %v2486_v34 = vsel %vm139_vm1, %v6815_v45, 0.0  ;;  %v2500_v37 = vmul.f32 %v6815_v45, %v6815_v45 }
 0x810   :  { %2487 = vadd.xlane.f32.xlu1 %v2486_v34 }
 0x811   :  { %v2506_v61 = vsel %vm139_vm1, %v2500_v37, 0.0 }
 0x812   :  { %2507 = vadd.xlane.f32.xlu0 %v2506_v61 }
 0x813   :  { %v2421_v11 = vpop.f32.mrf.mxu3 }
 0x814   :  { %v2422_v33 = vadd.f32 %v2421_v11, %v2384_v44 }
 0x816   :  { %v6823_v43 = vadd.f32 %v2422_v33, %v6719_v15 }
 0x818   :  { %v2489_v38 = vsel %vm139_vm1, %v6823_v43, 0.0  ;;  %v2501_v12 = vmul.f32 %v6823_v43, %v6823_v43 }
 0x819   :  { %2490 = vadd.xlane.f32.xlu2 %v2489_v38 }
 0x81a   :  { %v2509_v6 = vsel %vm139_vm1, %v2501_v12, 0.0 }
 0x81b   :  { %2510 = vadd.xlane.f32.xlu1 %v2509_v6 }
 0x833   :  { %v2424_v27 = vpop.f32.mrf.mxu3 }
 0x834   :  { %v2425_v23 = vadd.f32 %v2424_v27, %v2384_v44 }
 0x836   :  { %v6831_v1 = vadd.f32 %v2425_v23, %v6727_v5  ;;  %v4957_v5 = vld [vmem:[%s7918_s2 + $0x158] sm:$0xff] }
 0x837   :  { %2671 = vmatpush.msra.mxu2 %v4957_v5 }
 0x838   :  { %v2492_v50 = vsel %vm139_vm1, %v6831_v1, 0.0  ;;  %v2502_v15 = vmul.f32 %v6831_v1, %v6831_v1 }
 0x839   :  { %2493 = vadd.xlane.f32.xlu0 %v2492_v50  ;;  %2672 = vmatpush.msra.mxu2 %v4956_v21 }
 0x83a   :  { %v2512_v59 = vsel %vm139_vm1, %v2502_v15, 0.0 }
 0x83b   :  { %2513 = vadd.xlane.f32.xlu2 %v2512_v59  ;;  %2673 = vmatpush.msra.mxu2 %v4955_v41 }
 0x83d   :  { %2674 = vmatpush.msra.mxu2 %v4954_v26 }
 0x866   :  { %v2485_v57 = vpop.xlane.xlu0 %2484 }
 0x867   :  { %v2495_v3 = vmul.f32 %v2485_v57, %v5712_v39 }
 0x868   :  { %v2505_v22 = vpop.xlane.xlu2 %2504 }
 0x869   :  { %v2519_v58 = vmul.f32 %v2495_v3, %v2495_v3  ;;  %v2515_v47 = vmul.f32 %v2505_v22, %v5712_v39  ;;  %v2571_v8 = vsub.f32 %v6807_v20, %v2495_v3 }
 0x86b   :  { %v2523_v63 = vsub.f32 %v2515_v47, %v2519_v58  ;;  %v4969_v58 = vld [vmem:[%s7918_s2 + $0x1b8] sm:$0xff] }
 0x86c   :  { %v4973_v47 = vld [vmem:[%s7918_s2 + $0x1d8] sm:$0xff]  ;;  %2758 = vmatpush.msrb.mxu1 %v4969_v58 }
 0x86d   :  { %v2527_v36 = vadd.f32 1e-05, %v2523_v63  ;;  %2787 = vmatpush.msrb.mxu2 %v4973_v47 }
 0x86f   :  { %5456 = vrsqrt.f32 %v2527_v36  ;;  %vm2537_vm15 = vweird.f32 %v2527_v36  ;;  %2788 = vmatpush.msrb.mxu2 %v4972_v40 }
 0x875   :  { %v5457_v31 = vpop.eup %5456 }
 0x876   :  { %v2532_v16 = vmul.f32 %v5457_v31, %v2527_v36  ;;  %vm2538_vm14 = vweird.f32 %v5457_v31 }
 0x877   :  { %vm2539_vm3 = vmor %vm2537_vm15, %vm2538_vm14 }
 0x878   :  { %v2533_v17 = vmul.f32 %v5457_v31, %v2532_v16  ;;  %v4964_v16 = vld [vmem:[%s7918_s2 + $0x190] sm:$0xff] }
 0x879   :  { %2730 = vmatpush.msra.mxu0 %v4964_v16 }
 0x87a   :  { %v2534_v48 = vmul.f32 0.5, %v2533_v17  ;;  %v4968_v17 = vld [vmem:[%s7918_s2 + $0x1b0] sm:$0xff] }
 0x87b   :  { %2759 = vmatpush.msrb.mxu1 %v4968_v17 }
 0x87c   :  { %v2535_v32 = vsub.f32 1.5, %v2534_v48  ;;  %v4976_v48 = vld [vmem:[%s7918_s2 + $0x1f0] sm:$0xff] }
 0x87e   :  { %v2536_v18 = vmul.f32 %v5457_v31, %v2535_v32  ;;  %v4963_v32 = vld [vmem:[%s7918_s2 + $0x188] sm:$0xff] }
 0x87f   :  { %2731 = vmatpush.msra.mxu0 %v4963_v32 }
 0x880   :  { %v2540_v28 = vsel %vm2539_vm3, %v5457_v31, %v2536_v18  ;;  %v4977_v31 = vld [vmem:[%s7918_s2 + $0x1f8] sm:$0xff] }
 0x881   :  { %v2576_v35 = vmul.f32 %v6891_v30, %v2540_v28  ;;  %2816 = vmatpush.msra.mxu3 %v4977_v31  ;;  %v4967_v28 = vld [vmem:[%s7918_s2 + $0x1a8] sm:$0xff] }
 0x882   :  { %2760 = vmatpush.msrb.mxu1 %v4967_v28 }
 0x883   :  { %v2488_v42 = vpop.xlane.xlu1 %2487  ;;  %v2580_v9 = vmul.f32 %v2576_v35, %v2571_v8  ;;  %v4971_v8 = vld [vmem:[%s7918_s2 + $0x1c8] sm:$0xff]  ;;  %2817 = vmatpush.msra.mxu3 %v4976_v48 }
 0x884   :  { %v2496_v44 = vmul.f32 %v2488_v42, %v5712_v39  ;;  %v4975_v35 = vld [vmem:[%s7918_s2 + $0x1e8] sm:$0xff]  ;;  %v4962_v42 = vld [vmem:[%s7918_s2 + $0x180] sm:$0xff]  ;;  %2789 = vmatpush.msrb.mxu2 %v4971_v8 }
 0x885   :  { %v2508_v4 = vpop.xlane.xlu0 %2507  ;;  %v6899_v49 = vadd.f32 %v6894_v13, %v2580_v9  ;;  %v4966_v9 = vld [vmem:[%s7918_s2 + $0x1a0] sm:$0xff]  ;;  %2818 = vmatpush.msra.mxu3 %v4975_v35  ;;  %2732 = vmatpush.msra.mxu0 %v4962_v42 }
 0x886   :  { %v2520_v51 = vmul.f32 %v2496_v44, %v2496_v44  ;;  %v2516_v53 = vmul.f32 %v2508_v4, %v5712_v39  ;;  %v2572_v5 = vsub.f32 %v6815_v45, %v2496_v44  ;;  %v4970_v4 = vld [vmem:[%s7918_s2 + $0x1c0] sm:$0xff]  ;;  %2761 = vmatpush.msrb.mxu1 %v4966_v9 }
 0x887   :  { %4995 = vmatmul.msk.f32.vlgmr.msrb.gmra.mxu0 %vm139_vm1, %v6899_v49  ;;  %4999 = vmatmul.msk.f32.vlgmr.msra.gmra.mxu1 %vm139_vm1, %v6899_v49 }
 0x888   :  { %v2524_v2 = vsub.f32 %v2516_v53, %v2520_v51  ;;  %5003 = vmatmul.msk.f32.vlgmr.msra.gmra.mxu2 %vm139_vm1, %v6899_v49  ;;  %5007 = vmatmul.msk.f32.vlgmr.msrb.gmra.mxu3 %vm139_vm1, %v6899_v49  ;;  %v4974_v51 = vld [vmem:[%s7918_s2 + $0x1e0] sm:$0xff] }
 0x889   :  { %2790 = vmatpush.msrb.mxu2 %v4970_v4  ;;  %2819 = vmatpush.msra.mxu3 %v4974_v51 }
 0x88a   :  { %v2528_v56 = vadd.f32 1e-05, %v2524_v2 }
 0x88c   :  { %5458 = vrsqrt.f32 %v2528_v56  ;;  %v2491_v24 = vpop.xlane.xlu2 %2490  ;;  %vm2547_vm10 = vweird.f32 %v2528_v56 }
 0x88d   :  { %v2497_v34 = vmul.f32 %v2491_v24, %v5712_v39 }
 0x88e   :  { %v2511_v37 = vpop.xlane.xlu1 %2510 }
 0x88f   :  { %v2521_v61 = vmul.f32 %v2497_v34, %v2497_v34  ;;  %v2517_v11 = vmul.f32 %v2511_v37, %v5712_v39  ;;  %v2573_v57 = vsub.f32 %v6823_v43, %v2497_v34 }
 0x891   :  { %v2525_v33 = vsub.f32 %v2517_v11, %v2521_v61 }
 0x892   :  { %v5459_v38 = vpop.eup %5458 }
 0x893   :  { %v2542_v12 = vmul.f32 %v5459_v38, %v2528_v56  ;;  %v2529_v6 = vadd.f32 1e-05, %v2525_v33  ;;  %vm2548_vm9 = vweird.f32 %v5459_v38 }
 0x894   :  { %vm2549_vm11 = vmor %vm2547_vm10, %vm2548_vm9 }
 0x895   :  { %v2543_v27 = vmul.f32 %v5459_v38, %v2542_v12  ;;  %5460 = vrsqrt.f32 %v2529_v6  ;;  %vm2557_vm14 = vweird.f32 %v2529_v6 }
 0x897   :  { %v2544_v23 = vmul.f32 0.5, %v2543_v27 }
 0x899   :  { %v2545_v50 = vsub.f32 1.5, %v2544_v23 }
 0x89b   :  { %v5461_v15 = vpop.eup %5460  ;;  %v2546_v59 = vmul.f32 %v5459_v38, %v2545_v50 }
 0x89c   :  { %v2552_v52 = vmul.f32 %v5461_v15, %v2529_v6  ;;  %vm2558_vm12 = vweird.f32 %v5461_v15 }
 0x89d   :  { %v2550_v29 = vsel %vm2549_vm11, %v5459_v38, %v2546_v59  ;;  %vm2559_vm15 = vmor %vm2557_vm14, %vm2558_vm12 }
 0x89e   :  { %v2577_v25 = vmul.f32 %v6891_v30, %v2550_v29  ;;  %v2553_v19 = vmul.f32 %v5461_v15, %v2552_v52 }
 0x8a0   :  { %v2581_v10 = vmul.f32 %v2577_v25, %v2572_v5  ;;  %v2554_v21 = vmul.f32 0.5, %v2553_v19 }
 0x8a2   :  { %v6915_v62 = vadd.f32 %v6894_v13, %v2581_v10  ;;  %v2555_v55 = vsub.f32 1.5, %v2554_v21 }
 0x8a4   :  { %v2556_v60 = vmul.f32 %v5461_v15, %v2555_v55  ;;  %4996 = vmatmul.msk.f32.gmra.mxu0 %vm139_vm1, %v6915_v62  ;;  %5000 = vmatmul.msk.f32.gmra.mxu1 %vm139_vm1, %v6915_v62 }
 0x8a5   :  { %5004 = vmatmul.msk.f32.gmra.mxu2 %vm139_vm1, %v6915_v62  ;;  %5008 = vmatmul.msk.f32.gmra.mxu3 %vm139_vm1, %v6915_v62 }
 0x8a6   :  { %v2560_v41 = vsel %vm2559_vm15, %v5461_v15, %v2556_v60 }
 0x8a7   :  { %v2578_v54 = vmul.f32 %v6891_v30, %v2560_v41 }
 0x8a9   :  { %v2582_v3 = vmul.f32 %v2578_v54, %v2573_v57 }
 0x8ab   :  { %v6928_v46 = vadd.f32 %v6894_v13, %v2582_v3 }
 0x8ac   :  { %v2494_v14 = vpop.xlane.xlu0 %2493 }
 0x8ad   :  { %v2498_v26 = vmul.f32 %v2494_v14, %v5712_v39  ;;  %4997 = vmatmul.msk.f32.gmra.mxu0 %vm139_vm1, %v6928_v46  ;;  %5001 = vmatmul.msk.f32.gmra.mxu1 %vm139_vm1, %v6928_v46 }
 0x8ae   :  { %5005 = vmatmul.msk.f32.gmra.mxu2 %vm139_vm1, %v6928_v46  ;;  %5009 = vmatmul.msk.f32.gmra.mxu3 %vm139_vm1, %v6928_v46  ;;  %v2514_v22 = vpop.xlane.xlu2 %2513 }
 0x8af   :  { %v2522_v63 = vmul.f32 %v2498_v26, %v2498_v26  ;;  %v2518_v36 = vmul.f32 %v2514_v22, %v5712_v39  ;;  %v2574_v11 = vsub.f32 %v6831_v1, %v2498_v26 }
 0x8b1   :  { %v2526_v18 = vsub.f32 %v2518_v36, %v2522_v63 }
 0x8b3   :  { %v2530_v44 = vadd.f32 1e-05, %v2526_v18 }
 0x8b5   :  { %5462 = vrsqrt.f32 %v2530_v44  ;;  %vm2567_vm9 = vweird.f32 %v2530_v44 }
 0x8bb   :  { %v5463_v53 = vpop.eup %5462 }
 0x8bc   :  { %v2562_v2 = vmul.f32 %v5463_v53, %v2530_v44  ;;  %vm2568_vm3 = vweird.f32 %v5463_v53 }
 0x8bd   :  { %vm2569_vm10 = vmor %vm2567_vm9, %vm2568_vm3 }
 0x8be   :  { %v2563_v56 = vmul.f32 %v5463_v53, %v2562_v2 }
 0x8c0   :  { %v2564_v24 = vmul.f32 0.5, %v2563_v56 }
 0x8c2   :  { %v2565_v34 = vsub.f32 1.5, %v2564_v24 }
 0x8c4   :  { %v2566_v37 = vmul.f32 %v5463_v53, %v2565_v34 }
 0x8c6   :  { %v2570_v61 = vsel %vm2569_vm10, %v5463_v53, %v2566_v37 }
 0x8c7   :  { %v2579_v33 = vmul.f32 %v6891_v30, %v2570_v61 }
 0x8c9   :  { %v2583_v38 = vmul.f32 %v2579_v33, %v2574_v11 }
 0x8cb   :  { %v2588_v12 = vadd.f32 %v6894_v13, %v2583_v38 }
 0x8cd   :  { %4998 = vmatmul.msk.f32.gmra.mxu0 %vm139_vm1, %v2588_v12  ;;  %5002 = vmatmul.msk.f32.gmra.mxu1 %vm139_vm1, %v2588_v12 }
 0x8ce   :  { %5006 = vmatmul.msk.f32.gmra.mxu2 %vm139_vm1, %v2588_v12  ;;  %5010 = vmatmul.msk.f32.gmra.mxu3 %vm139_vm1, %v2588_v12 }
 0x8d5   :  { %5011 = vmatmul.msk.f32.vlgmr.msra.gmra.mxu0 %vm139_vm1, %v6899_v49  ;;  %5015 = vmatmul.msk.f32.vlgmr.msrb.gmra.mxu1 %vm139_vm1, %v6899_v49 }
 0x8d6   :  { %5019 = vmatmul.msk.f32.vlgmr.msrb.gmra.mxu2 %vm139_vm1, %v6899_v49  ;;  %5023 = vmatmul.msk.f32.vlgmr.msra.gmra.mxu3 %vm139_vm1, %v6899_v49 }
 0x8dd   :  { %5012 = vmatmul.msk.f32.gmra.mxu0 %vm139_vm1, %v6915_v62  ;;  %5016 = vmatmul.msk.f32.gmra.mxu1 %vm139_vm1, %v6915_v62 }
 0x8de   :  { %5020 = vmatmul.msk.f32.gmra.mxu2 %vm139_vm1, %v6915_v62  ;;  %5024 = vmatmul.msk.f32.gmra.mxu3 %vm139_vm1, %v6915_v62 }
 0x8e5   :  { %5013 = vmatmul.msk.f32.gmra.mxu0 %vm139_vm1, %v6928_v46  ;;  %5017 = vmatmul.msk.f32.gmra.mxu1 %vm139_vm1, %v6928_v46 }
 0x8e6   :  { %5021 = vmatmul.msk.f32.gmra.mxu2 %vm139_vm1, %v6928_v46  ;;  %5025 = vmatmul.msk.f32.gmra.mxu3 %vm139_vm1, %v6928_v46 }
 0x8ed   :  { %5014 = vmatmul.msk.f32.gmra.mxu0 %vm139_vm1, %v2588_v12  ;;  %5018 = vmatmul.msk.f32.gmra.mxu1 %vm139_vm1, %v2588_v12 }
 0x8ee   :  { %5022 = vmatmul.msk.f32.gmra.mxu2 %vm139_vm1, %v2588_v12  ;;  %5026 = vmatmul.msk.f32.gmra.mxu3 %vm139_vm1, %v2588_v12 }
 0x904   :  { %v7023_v30 = vpop.f32.mrf.mxu0  ;;  %v7025_v13 = vpop.f32.mrf.mxu1 }
 0x905   :  { %2909 = vrot.lane.b32.xlu1 %v7025_v13, %s5633_s19  ;;  %2835 = vrot.lane.b32.xlu0 %v7023_v30, %s5633_s19 }
 0x90b   :  { %v7031_v49 = vpop.f32.mrf.mxu2  ;;  %v7035_v6 = vpop.f32.mrf.mxu3 }
 0x90d   :  { %2983 = vrot.lane.b32.xlu0 %v7031_v49, %s5633_s19 }
 0x915   :  { %3057 = vrot.lane.b32.xlu0 %v7035_v6, %s5633_s19 }
 0x921   :  { %v7039_v27 = vpop.f32.mrf.mxu0  ;;  %v7041_v23 = vpop.f32.mrf.mxu1 }
 0x922   :  { %2911 = vrot.lane.b32.xlu2 %v7041_v23, %s5633_s19  ;;  %2837 = vrot.lane.b32.xlu1 %v7039_v27, %s5633_s19  ;;  %v5236_v40 = vpack.i.bf16 %v7025_v13, %v7041_v23  ;;  %v5231_v48 = vpack.i.bf16 %v7023_v30, %v7039_v27 }
 0x928   :  { %v7047_v50 = vpop.f32.mrf.mxu2  ;;  %v7055_v59 = vpop.f32.mrf.mxu3 }
 0x929   :  { %2985 = vrot.lane.b32.xlu0 %v7047_v50, %s5633_s19 }
 0x92a   :  { %v7051_v15 = vpop.f32.mrf.mxu1  ;;  %v7059_v52 = vpop.f32.mrf.mxu0 }
 0x92b   :  { %2946 = vrot.lane.b32.xlu1 %v7051_v15, %s5633_s19  ;;  %v5246_v28 = vpack.i.bf16 %v7051_v15, %v7031_v49  ;;  %v5256_v44 = vpack.i.bf16 %v7035_v6, %v7059_v52 }
 0x931   :  { %3059 = vrot.lane.b32.xlu0 %v7055_v59, %s5633_s19  ;;  %v7063_v29 = vpop.f32.mrf.mxu3  ;;  %v7067_v5 = vpop.f32.mrf.mxu2 }
 0x933   :  { %2872 = vrot.lane.b32.xlu1 %v7059_v52, %s5633_s19 }
 0x939   :  { %3094 = vrot.lane.b32.xlu0 %v7063_v29, %s5633_s19 }
 0x941   :  { %3020 = vrot.lane.b32.xlu0 %v7067_v5, %s5633_s19 }
 0x94a   :  { %v7071_v25 = vpop.f32.mrf.mxu0  ;;  %v7073_v19 = vpop.f32.mrf.mxu1 }
 0x94b   :  { %2948 = vrot.lane.b32.xlu2 %v7073_v19, %s5633_s19  ;;  %v5241_v8 = vpack.i.bf16 %v7073_v19, %v7047_v50  ;;  %v5251_v4 = vpack.i.bf16 %v7055_v59, %v7071_v25 }
 0x951   :  { %v7077_v10 = vpop.f32.mrf.mxu3  ;;  %v7087_v55 = vpop.f32.mrf.mxu2 }
 0x952   :  { %3096 = vrot.lane.b32.xlu1 %v7077_v10, %s5633_s19  ;;  %v7081_v21 = vpop.f32.mrf.mxu1  ;;  %v7085_v62 = vpop.f32.mrf.mxu0 }
 0x953   :  { %2874 = vrot.lane.b32.xlu2 %v7071_v25, %s5633_s19  ;;  %v5276_v2 = vpack.i.bf16 %v7081_v21, %v7067_v5  ;;  %v5266_v56 = vpack.i.bf16 %v7063_v29, %v7085_v62 }
 0x959   :  { %v7097_v57 = vpop.f32.mrf.mxu2  ;;  %v7103_v3 = vpop.f32.mrf.mxu3 }
 0x95a   :  { %3022 = vrot.lane.b32.xlu1 %v7087_v55, %s5633_s19  ;;  %v7091_v60 = vpop.f32.mrf.mxu1  ;;  %v7095_v41 = vpop.f32.mrf.mxu0 }
 0x95b   :  { %3131 = vrot.lane.b32.xlu2 %v7085_v62, %s5633_s19  ;;  %v5261_v18 = vpack.i.bf16 %v7077_v10, %v7095_v41  ;;  %v5271_v9 = vpack.i.bf16 %v7091_v60, %v7087_v55 }
 0x961   :  { %v7109_v14 = vpop.f32.mrf.mxu2  ;;  %v7119_v22 = vpop.f32.mrf.mxu3 }
 0x962   :  { %3279 = vrot.lane.b32.xlu1 %v7097_v57, %s5633_s19  ;;  %v7101_v54 = vpop.f32.mrf.mxu1  ;;  %v7107_v46 = vpop.f32.mrf.mxu0 }
 0x963   :  { %3205 = vrot.lane.b32.xlu2 %v7081_v21, %s5633_s19  ;;  %v5286_v53 = vpack.i.bf16 %v7101_v54, %v7097_v57  ;;  %v5296_v12 = vpack.i.bf16 %v7103_v3, %v7107_v46 }
 0x969   :  { %v7129_v58 = vpop.f32.mrf.mxu3  ;;  %v7131_v47 = vpop.f32.mrf.mxu2 }
 0x96a   :  { %3281 = vrot.lane.b32.xlu1 %v7109_v14, %s5633_s19  ;;  %v7113_v26 = vpop.f32.mrf.mxu1  ;;  %v7121_v7 = vpop.f32.mrf.mxu0 }
 0x96b   :  { %3244 = vrot.lane.b32.xlu0 %v7113_v26, %s5633_s19  ;;  %3133 = vrot.lane.b32.xlu2 %v7095_v41, %s5633_s19  ;;  %v5291_v61 = vpack.i.bf16 %v7119_v22, %v7121_v7  ;;  %v5281_v11 = vpack.i.bf16 %v7113_v26, %v7109_v14 }
 0x971   :  { %v7140_v16 = vpop.f32.mrf.mxu3  ;;  %v7143_v17 = vpop.f32.mrf.mxu2 }
 0x972   :  { %3355 = vrot.lane.b32.xlu1 %v7119_v22, %s5633_s19 }
 0x973   :  { %3207 = vrot.lane.b32.xlu2 %v7091_v60, %s5633_s19  ;;  %3170 = vrot.lane.b32.xlu0 %v7121_v7, %s5633_s19 }
 0x977   :  { %v2836_v36 = vpop.permute.xlu0 %2835  ;;  %v2910_v31 = vpop.permute.xlu1 %2909 }
 0x97a   :  { %3316 = vrot.lane.b32.xlu1 %v7131_v47, %s5633_s19 }
 0x97b   :  { %3242 = vrot.lane.b32.xlu2 %v7101_v54, %s5633_s19  ;;  %3353 = vrot.lane.b32.xlu0 %v7103_v3, %s5633_s19 }
 0x97c   :  { %v2912_v63 = vpop.permute.xlu2 %2911 }
 0x97d   :  { %5035 = vmatpush.xpose.msk.msra.mxu1 %vm474_vm2, %v2912_v63 }
 0x97f   :  { %v2984_v32 = vpop.permute.xlu0 %2983 }
 0x981   :  { %5036 = vmatpush.xpose.msk.msra.mxu1 %vm474_vm2, %v2910_v31 }
 0x982   :  { %3392 = vrot.lane.b32.xlu1 %v7140_v16, %s5633_s19 }
 0x983   :  { %3168 = vrot.lane.b32.xlu2 %v7107_v46, %s5633_s19  ;;  %3318 = vrot.lane.b32.xlu0 %v7143_v17, %s5633_s19 }
 0x984   :  { %5037 = vmatmul.msk.f32.vlgmr.msra.gmra.mxu1 %vm474_vm2, %v7025_v13 }
 0x987   :  { %v3058_v35 = vpop.permute.xlu0 %3057 }
 0x98a   :  { %5237 = vrot.lane.b32.xlu1 %v5236_v40, %s5634_s20 }
 0x98b   :  { %3390 = vrot.lane.b32.xlu2 %v7129_v58, %s5633_s19  ;;  %5232 = vrot.lane.b32.xlu0 %v5231_v48, %s5634_s20 }
 0x98c   :  { %5038 = vmatmul.msk.f32.gmra.mxu1 %vm474_vm2, %v7041_v23 }
 0x992   :  { %5262 = vrot.lane.b32.xlu1 %v5261_v18, %s5634_s20 }
 0x993   :  { %5242 = vrot.lane.b32.xlu2 %v5241_v8, %s5634_s20  ;;  %5247 = vrot.lane.b32.xlu0 %v5246_v28, %s5634_s20 }
 0x994   :  { %v2838_v42 = vpop.permute.xlu1 %2837 }
 0x995   :  { %5027 = vmatpush.xpose.msk.msrb.mxu0 %vm474_vm2, %v2838_v42 }
 0x999   :  { %5028 = vmatpush.xpose.msk.msrb.mxu0 %vm474_vm2, %v2836_v36 }
 0x99a   :  { %5272 = vrot.lane.b32.xlu1 %v5271_v9, %s5634_s20 }
 0x99b   :  { %v2986_v51 = vpop.permute.xlu0 %2985  ;;  %5252 = vrot.lane.b32.xlu2 %v5251_v4, %s5634_s20  ;;  %5257 = vrot.lane.b32.xlu0 %v5256_v44, %s5634_s20 }
 0x99c   :  { %5043 = vmatpush.xpose.msk.msrb.mxu3 %vm474_vm2, %v2986_v51  ;;  %5029 = vmatmul.msk.f32.vlgmr.msrb.gmra.mxu0 %vm474_vm2, %v7023_v30 }
 0x99d   :  { %v2947_v37 = vpop.permute.xlu1 %2946 }
 0x9a0   :  { %5044 = vmatpush.xpose.msk.msrb.mxu3 %vm474_vm2, %v2984_v32 }
 0x9a2   :  { %5287 = vrot.lane.b32.xlu1 %v5286_v53, %s5634_s20 }
 0x9a3   :  { %v3060_v24 = vpop.permute.xlu0 %3059  ;;  %5045 = vmatmul.msk.f32.vlgmr.msrb.gmra.mxu3 %vm474_vm2, %v7031_v49  ;;  %5277 = vrot.lane.b32.xlu2 %v5276_v2, %s5634_s20 }
 0x9a4   :  { %5267 = vrot.lane.b32.xlu0 %v5266_v56, %s5634_s20  ;;  %5051 = vmatpush.xpose.msk.msrb.mxu1 %vm474_vm2, %v3060_v24 }
 0x9a5   :  { %5030 = vmatmul.msk.f32.gmra.mxu0 %vm474_vm2, %v7039_v27  ;;  %v2949_v34 = vpop.permute.xlu2 %2948  ;;  %v2873_v38 = vpop.permute.xlu1 %2872 }
 0x9a6   :  { %5039 = vmatpush.xpose.msk.msra.mxu2 %vm474_vm2, %v2949_v34 }
 0x9a8   :  { %5052 = vmatpush.xpose.msk.msrb.mxu1 %vm474_vm2, %v3058_v35 }
 0x9aa   :  { %5040 = vmatpush.xpose.msk.msra.mxu2 %vm474_vm2, %v2947_v37 }
 0x9ab   :  { %5046 = vmatmul.msk.f32.gmra.mxu3 %vm474_vm2, %v7047_v50  ;;  %5053 = vmatmul.msk.f32.vlgmr.msrb.gmra.mxu1 %vm474_vm2, %v7035_v6  ;;  %v3095_v27 = vpop.permute.xlu0 %3094 }
 0x9ac   :  { %5292 = vrot.lane.b32.xlu2 %v5291_v61, %s5634_s20  ;;  %5282 = vrot.lane.b32.xlu0 %v5281_v11, %s5634_s20 }
 0x9ad   :  { %5041 = vmatmul.msk.f32.vlgmr.msra.gmra.mxu2 %vm474_vm2, %v7051_v15  ;;  %v2875_v33 = vpop.permute.xlu2 %2874 }
 0x9ae   :  { %5031 = vmatpush.xpose.msk.msra.mxu0 %vm474_vm2, %v2875_v33 }
 0x9b2   :  { %5032 = vmatpush.xpose.msk.msra.mxu0 %vm474_vm2, %v2873_v38 }
 0x9b3   :  { %5054 = vmatmul.msk.f32.gmra.mxu1 %vm474_vm2, %v7055_v59  ;;  %v3021_v15 = vpop.permute.xlu0 %3020 }
 0x9b4   :  { %5297 = vrot.lane.b32.xlu2 %v5296_v12, %s5634_s20 }
 0x9b5   :  { %5033 = vmatmul.msk.f32.vlgmr.msra.gmra.mxu0 %vm474_vm2, %v7059_v52  ;;  %5042 = vmatmul.msk.f32.gmra.mxu2 %vm474_vm2, %v7073_v19  ;;  %v3132_v30 = vpop.permute.xlu2 %3131 }
 0x9bd   :  { %5034 = vmatmul.msk.f32.gmra.mxu0 %vm474_vm2, %v7071_v25  ;;  %v3206_v13 = vpop.permute.xlu2 %3205 }
 0x9c4   :  { %v3097_v49 = vpop.permute.xlu1 %3096 }
 0x9c5   :  { %5055 = vmatpush.xpose.msk.msrb.mxu2 %vm474_vm2, %v3097_v49  ;;  %v3134_v6 = vpop.permute.xlu2 %3133 }
 0x9c6   :  { %5059 = vmatpush.xpose.msk.msra.mxu3 %vm474_vm2, %v3134_v6 }
 0x9c9   :  { %5056 = vmatpush.xpose.msk.msrb.mxu2 %vm474_vm2, %v3095_v27 }
 0x9ca   :  { %5060 = vmatpush.xpose.msk.msra.mxu3 %vm474_vm2, %v3132_v30 }
 0x9cc   :  { %v3023_v23 = vpop.permute.xlu1 %3022  ;;  %5057 = vmatmul.msk.f32.vlgmr.msrb.gmra.mxu2 %vm474_vm2, %v7063_v29 }
 0x9cd   :  { %5047 = vmatpush.xpose.msk.msrb.mxu0 %vm474_vm2, %v3023_v23  ;;  %5061 = vmatmul.msk.f32.vlgmr.msra.gmra.mxu3 %vm474_vm2, %v7085_v62  ;;  %v3208_v50 = vpop.permute.xlu2 %3207 }
 0x9ce   :  { %5067 = vmatpush.xpose.msk.msra.mxu1 %vm474_vm2, %v3208_v50 }
 0x9d1   :  { %5048 = vmatpush.xpose.msk.msrb.mxu0 %vm474_vm2, %v3021_v15 }
 0x9d2   :  { %5068 = vmatpush.xpose.msk.msra.mxu1 %vm474_vm2, %v3206_v13 }
 0x9d4   :  { %v3280_v59 = vpop.permute.xlu1 %3279  ;;  %5049 = vmatmul.msk.f32.vlgmr.msrb.gmra.mxu0 %vm474_vm2, %v7067_v5  ;;  %5058 = vmatmul.msk.f32.gmra.mxu2 %vm474_vm2, %v7077_v10 }
 0x9d5   :  { %5062 = vmatmul.msk.f32.gmra.mxu3 %vm474_vm2, %v7095_v41  ;;  %5069 = vmatmul.msk.f32.vlgmr.msra.gmra.mxu1 %vm474_vm2, %v7081_v21  ;;  %v3243_v52 = vpop.permute.xlu2 %3242 }
 0x9dc   :  { %v3282_v29 = vpop.permute.xlu1 %3281  ;;  %5050 = vmatmul.msk.f32.gmra.mxu0 %vm474_vm2, %v7087_v55 }
 0x9dd   :  { %5075 = vmatpush.xpose.msk.msrb.mxu3 %vm474_vm2, %v3282_v29  ;;  %v3245_v25 = vpop.permute.xlu0 %3244  ;;  %5070 = vmatmul.msk.f32.gmra.mxu1 %vm474_vm2, %v7091_v60  ;;  %v3169_v5 = vpop.permute.xlu2 %3168 }
 0x9de   :  { %5071 = vmatpush.xpose.msk.msra.mxu2 %vm474_vm2, %v3245_v25 }
 0x9e1   :  { %5076 = vmatpush.xpose.msk.msrb.mxu3 %vm474_vm2, %v3280_v59 }
 0x9e2   :  { %5072 = vmatpush.xpose.msk.msra.mxu2 %vm474_vm2, %v3243_v52 }
 0x9e4   :  { %v3356_v19 = vpop.permute.xlu1 %3355  ;;  %5077 = vmatmul.msk.f32.vlgmr.msrb.gmra.mxu3 %vm474_vm2, %v7097_v57 }
 0x9e5   :  { %5083 = vmatpush.xpose.msk.msrb.mxu1 %vm474_vm2, %v3356_v19  ;;  %v3171_v10 = vpop.permute.xlu0 %3170  ;;  %5073 = vmatmul.msk.f32.vlgmr.msra.gmra.mxu2 %vm474_vm2, %v7101_v54  ;;  %v3391_v21 = vpop.permute.xlu2 %3390 }
 0x9e6   :  { %5063 = vmatpush.xpose.msk.msra.mxu0 %vm474_vm2, %v3171_v10 }
 0x9ea   :  { %5064 = vmatpush.xpose.msk.msra.mxu0 %vm474_vm2, %v3169_v5 }
 0x9ec   :  { %v3317_v62 = vpop.permute.xlu1 %3316  ;;  %5078 = vmatmul.msk.f32.gmra.mxu3 %vm474_vm2, %v7109_v14 }
 0x9ed   :  { %v3354_v55 = vpop.permute.xlu0 %3353  ;;  %5065 = vmatmul.msk.f32.vlgmr.msra.gmra.mxu0 %vm474_vm2, %v7107_v46  ;;  %5074 = vmatmul.msk.f32.gmra.mxu2 %vm474_vm2, %v7113_v26  ;;  %v5243_v60 = vpop.permute.xlu2 %5242 }
 0x9ee   :  { %5084 = vmatpush.xpose.msk.msrb.mxu1 %vm474_vm2, %v3354_v55  ;;  %v5245_v46 = vunpack.i.h.bf16 %v5243_v60 }
 0x9f1   :  { %5085 = vmatmul.msk.f32.vlgmr.msrb.gmra.mxu1 %vm474_vm2, %v7103_v3 }
 0x9f4   :  { %v3393_v41 = vpop.permute.xlu1 %3392 }
 0x9f5   :  { %5087 = vmatpush.xpose.msk.msrb.mxu2 %vm474_vm2, %v3393_v41  ;;  %v3319_v57 = vpop.permute.xlu0 %3318  ;;  %5066 = vmatmul.msk.f32.gmra.mxu0 %vm474_vm2, %v7121_v7  ;;  %v5253_v54 = vpop.permute.xlu2 %5252 }
 0x9f6   :  { %5079 = vmatpush.xpose.msk.msrb.mxu0 %vm474_vm2, %v3319_v57  ;;  %v5254_v14 = vunpack.i.l.bf16 %v5253_v54  ;;  %v5255_v31 = vunpack.i.h.bf16 %v5253_v54 }
 0x9f9   :  { %5088 = vmatpush.xpose.msk.msrb.mxu2 %vm474_vm2, %v3391_v21  ;;  %5086 = vmatmul.msk.f32.gmra.mxu1 %vm474_vm2, %v7119_v22  ;;  %v5244_v22 = vunpack.i.l.bf16 %v5243_v60 }
 0x9fa   :  { %5080 = vmatpush.xpose.msk.msrb.mxu0 %vm474_vm2, %v3317_v62 }
 0x9fc   :  { %v5238_v3 = vpop.permute.xlu1 %5237  ;;  %5089 = vmatmul.msk.f32.vlgmr.msrb.gmra.mxu2 %vm474_vm2, %v7129_v58 }
 0x9fd   :  { %3972 = vmatpush.msra.mxu2 %v5245_v46  ;;  %v5239_v26 = vunpack.i.l.bf16 %v5238_v3  ;;  %v5233_v7 = vpop.permute.xlu0 %5232  ;;  %5081 = vmatmul.msk.f32.vlgmr.msrb.gmra.mxu0 %vm474_vm2, %v7131_v47  ;;  %v5240_v36 = vunpack.i.h.bf16 %v5238_v3  ;;  %v7299_v53 = vpop.permute.xlu2 %5277 }
 0x9fe   :  { %3902 = vmatpush.msra.mxu0 %v5254_v14  ;;  %v5234_v63 = vunpack.i.l.bf16 %v5233_v7  ;;  %v5235_v40 = vunpack.i.h.bf16 %v5233_v7  ;;  %v5279_v34 = vunpack.i.l.bf16 %v7299_v53 }
 0x9ff   :  { %3937 = vmatpush.msra.mxu1 %v5239_v26 }
 0xa00   :  { %3867 = vmatpush.msra.mxu3 %v5234_v63 }
 0xa01   :  { %3938 = vmatpush.msra.mxu1 %v5240_v36  ;;  %v2938_v48 = vpop.f32.mrf.mxu1 }
 0xa02   :  { %v3429_v32 = vmul.f32 0.5, %v2938_v48  ;;  %3868 = vmatpush.msra.mxu3 %v5235_v40 }
 0xa03   :  { %4077 = vmatpush.msrb.mxu1 %v5255_v31 }
 0xa04   :  { %4007 = vmatpush.msrb.mxu3 %v5244_v22  ;;  %v7286_v18 = vadd.f32 %v3429_v32, %v6180_v0  ;;  %v7288_v28 = vpop.permute.xlu1 %5262  ;;  %5090 = vmatmul.msk.f32.gmra.mxu2 %vm474_vm2, %v7140_v16 }
 0xa05   :  { %v5248_v8 = vpop.permute.xlu0 %5247  ;;  %5082 = vmatmul.msk.f32.gmra.mxu0 %vm474_vm2, %v7143_v17  ;;  %v5265_v44 = vunpack.i.h.bf16 %v7288_v28 }
 0xa06   :  { %v5250_v35 = vunpack.i.h.bf16 %v5248_v8  ;;  %v5249_v42 = vunpack.i.l.bf16 %v5248_v8  ;;  %v3501_v9 = vsel %vm27_vm0, %v7286_v18, -inf }
 0xa07   :  { %3502 = vmax.xlane.f32.xlu0 %v3501_v9 }
 0xa08   :  { %3973 = vmatpush.msra.mxu2 %v5250_v35  ;;  %4008 = vmatpush.msrb.mxu3 %v5249_v42 }
 0xa09   :  { %v2941_v38 = vpop.f32.mrf.mxu1 }
 0xa0a   :  { %4112 = vmatpush.msrb.mxu2 %v5265_v44  ;;  %v3430_v30 = vmul.f32 0.5, %v2941_v38 }
 0xa0c   :  { %v7297_v4 = vpop.permute.xlu1 %5272  ;;  %v7312_v49 = vadd.f32 %v3430_v30, %v6180_v0 }
 0xa0d   :  { %v5258_v51 = vpop.permute.xlu0 %5257  ;;  %v5274_v24 = vunpack.i.l.bf16 %v7297_v4 }
 0xa0e   :  { %v5260_v2 = vunpack.i.h.bf16 %v5258_v51  ;;  %v5259_v56 = vunpack.i.l.bf16 %v5258_v51  ;;  %v3504_v15 = vsel %vm27_vm0, %v7312_v49, -inf }
 0xa10   :  { %3903 = vmatpush.msra.mxu0 %v5259_v56  ;;  %4078 = vmatpush.msrb.mxu1 %v5260_v2 }
 0xa12   :  { %4042 = vmatpush.msrb.mxu0 %v5274_v24 }
 0xa14   :  { %4043 = vmatpush.msrb.mxu0 %v5279_v34 }
 0xa16   :  { %v7303_v37 = vpop.permute.xlu0 %5267 }
 0xa17   :  { %v5270_v61 = vunpack.i.h.bf16 %v7303_v37 }
 0xa19   :  { %4113 = vmatpush.msrb.mxu2 %v5270_v61  ;;  %v2864_v11 = vpop.f32.mrf.mxu0 }
 0xa1a   :  { %v3425_v33 = vmul.f32 0.5, %v2864_v11 }
 0xa1c   :  { %v7307_v12 = vadd.f32 %v3425_v33, %v6180_v0 }
 0xa1e   :  { %v3489_v13 = vsel %vm27_vm0, %v7307_v12, -inf }
 0xa1f   :  { %3490 = vmax.xlane.f32.xlu2 %v3489_v13 }
 0xa22   :  { %v2867_v6 = vpop.f32.mrf.mxu0 }
 0xa23   :  { %v3426_v27 = vmul.f32 0.5, %v2867_v6 }
 0xa25   :  { %v7315_v23 = vadd.f32 %v3426_v27, %v6180_v0 }
 0xa26   :  { %v3012_v50 = vpop.f32.mrf.mxu3 }
 0xa27   :  { %v3433_v59 = vmul.f32 0.5, %v3012_v50  ;;  %v3492_v52 = vsel %vm27_vm0, %v7315_v23, -inf  ;;  %3505 = vmax.xlane.f32.xlu2 %v3504_v15 }
 0xa28   :  { %3493 = vmax.xlane.f32.xlu1 %v3492_v52  ;;  %v3086_v29 = vpop.f32.mrf.mxu1 }
 0xa29   :  { %v7322_v25 = vadd.f32 %v3433_v59, %v6180_v0  ;;  %v3437_v5 = vmul.f32 0.5, %v3086_v29 }
 0xa2b   :  { %v3513_v19 = vsel %vm27_vm0, %v7322_v25, -inf  ;;  %v7327_v21 = vadd.f32 %v3437_v5, %v6180_v0 }
 0xa2c   :  { %3514 = vmax.xlane.f32.xlu0 %v3513_v19 }
 0xa2d   :  { %v3525_v14 = vsel %vm27_vm0, %v7327_v21, -inf }
 0xa2e   :  { %v3015_v10 = vpop.f32.mrf.mxu3 }
 0xa2f   :  { %v3434_v62 = vmul.f32 0.5, %v3015_v10 }
 0xa30   :  { %v2975_v55 = vpop.f32.mrf.mxu2  ;;  %v3089_v63 = vpop.f32.mrf.mxu1 }
 0xa31   :  { %v7330_v60 = vadd.f32 %v3434_v62, %v6180_v0  ;;  %v3431_v57 = vmul.f32 0.5, %v2975_v55  ;;  %v3438_v22 = vmul.f32 0.5, %v3089_v63 }
 0xa32   :  { %v2901_v41 = vpop.f32.mrf.mxu0 }
 0xa33   :  { %v3427_v54 = vmul.f32 0.5, %v2901_v41  ;;  %v3516_v46 = vsel %vm27_vm0, %v7330_v60, -inf  ;;  %v7340_v26 = vadd.f32 %v3431_v57, %v6180_v0  ;;  %v7353_v42 = vadd.f32 %v3438_v22, %v6180_v0 }
 0xa34   :  { %3517 = vmax.xlane.f32.xlu1 %v3516_v46  ;;  %3526 = vmax.xlane.f32.xlu0 %v3525_v14 }
 0xa35   :  { %v7337_v3 = vadd.f32 %v3427_v54, %v6180_v0  ;;  %v3507_v8 = vsel %vm27_vm0, %v7340_v26, -inf  ;;  %v3528_v51 = vsel %vm27_vm0, %v7353_v42, -inf }
 0xa37   :  { %v3495_v7 = vsel %vm27_vm0, %v7337_v3, -inf }
 0xa38   :  { %v2978_v36 = vpop.f32.mrf.mxu2  ;;  %3496 = vmax.xlane.f32.xlu2 %v3495_v7 }
 0xa39   :  { %v3432_v31 = vmul.f32 0.5, %v2978_v36 }
 0xa3a   :  { %v2904_v40 = vpop.f32.mrf.mxu0 }
 0xa3b   :  { %v7345_v48 = vadd.f32 %v3432_v31, %v6180_v0  ;;  %v3428_v32 = vmul.f32 0.5, %v2904_v40 }
 0xa3c   :  { %3508 = vmax.xlane.f32.xlu1 %v3507_v8 }
 0xa3d   :  { %v7350_v35 = vadd.f32 %v3428_v32, %v6180_v0  ;;  %v3510_v9 = vsel %vm27_vm0, %v7345_v48, -inf }
 0xa3f   :  { %v3498_v44 = vsel %vm27_vm0, %v7350_v35, -inf }
 0xa40   :  { %3511 = vmax.xlane.f32.xlu2 %v3510_v9  ;;  %3499 = vmax.xlane.f32.xlu0 %v3498_v44 }
 0xa44   :  { %3529 = vmax.xlane.f32.xlu1 %v3528_v51 }
 0xa4f   :  { %v3123_v2 = vpop.f32.mrf.mxu2 }
 0xa50   :  { %v3439_v56 = vmul.f32 0.5, %v3123_v2  ;;  %v3160_v11 = vpop.f32.mrf.mxu3 }
 0xa51   :  { %v3049_v24 = vpop.f32.mrf.mxu0  ;;  %v3441_v50 = vmul.f32 0.5, %v3160_v11 }
 0xa52   :  { %v7362_v34 = vadd.f32 %v3439_v56, %v6180_v0  ;;  %v3435_v61 = vmul.f32 0.5, %v3049_v24  ;;  %v3234_v33 = vpop.f32.mrf.mxu1 }
 0xa53   :  { %v3445_v38 = vmul.f32 0.5, %v3234_v33  ;;  %v7380_v19 = vadd.f32 %v3441_v50, %v6180_v0 }
 0xa54   :  { %v7365_v30 = vadd.f32 %v3435_v61, %v6180_v0  ;;  %v3531_v13 = vsel %vm27_vm0, %v7362_v34, -inf }
 0xa55   :  { %v7370_v6 = vadd.f32 %v3445_v38, %v6180_v0  ;;  %3532 = vmax.xlane.f32.xlu0 %v3531_v13  ;;  %v3537_v14 = vsel %vm27_vm0, %v7380_v19, -inf }
 0xa56   :  { %v3519_v27 = vsel %vm27_vm0, %v7365_v30, -inf }
 0xa57   :  { %v3126_v15 = vpop.f32.mrf.mxu2  ;;  %3520 = vmax.xlane.f32.xlu1 %v3519_v27  ;;  %v3549_v59 = vsel %vm27_vm0, %v7370_v6, -inf }
 0xa58   :  { %v3440_v52 = vmul.f32 0.5, %v3126_v15  ;;  %3550 = vmax.xlane.f32.xlu2 %v3549_v59  ;;  %v3163_v55 = vpop.f32.mrf.mxu3 }
 0xa59   :  { %v3052_v62 = vpop.f32.mrf.mxu0  ;;  %v3442_v46 = vmul.f32 0.5, %v3163_v55 }
 0xa5a   :  { %v7377_v29 = vadd.f32 %v3440_v52, %v6180_v0  ;;  %v3237_v5 = vpop.f32.mrf.mxu1  ;;  %v3436_v54 = vmul.f32 0.5, %v3052_v62 }
 0xa5b   :  { %v3446_v10 = vmul.f32 0.5, %v3237_v5  ;;  %v7395_v36 = vadd.f32 %v3442_v46, %v6180_v0 }
 0xa5c   :  { %v3534_v57 = vsel %vm27_vm0, %v7377_v29, -inf  ;;  %v7392_v63 = vadd.f32 %v3436_v54, %v6180_v0 }
 0xa5d   :  { %v7383_v41 = vadd.f32 %v3446_v10, %v6180_v0  ;;  %v3540_v22 = vsel %vm27_vm0, %v7395_v36, -inf }
 0xa5e   :  { %v3522_v40 = vsel %vm27_vm0, %v7392_v63, -inf }
 0xa5f   :  { %3535 = vmax.xlane.f32.xlu1 %v3534_v57  ;;  %v3552_v7 = vsel %vm27_vm0, %v7383_v41, -inf }
 0xa60   :  { %3538 = vmax.xlane.f32.xlu2 %v3537_v14  ;;  %3553 = vmax.xlane.f32.xlu0 %v3552_v7  ;;  %v7429_v7 = vpop.permute.xlu0 %5282 }
 0xa67   :  { %v3308_v31 = vpop.f32.mrf.mxu3 }
 0xa68   :  { %3523 = vmax.xlane.f32.xlu2 %v3522_v40  ;;  %3541 = vmax.xlane.f32.xlu0 %v3540_v22  ;;  %v3449_v51 = vmul.f32 0.5, %v3308_v31  ;;  %v3271_v61 = vpop.f32.mrf.mxu2 }
 0xa69   :  { %v3447_v50 = vmul.f32 0.5, %v3271_v61 }
 0xa6a   :  { %v3197_v32 = vpop.f32.mrf.mxu0  ;;  %v7413_v27 = vadd.f32 %v3449_v51, %v6180_v0 }
 0xa6b   :  { %v3443_v8 = vmul.f32 0.5, %v3197_v32  ;;  %v7420_v5 = vadd.f32 %v3447_v50, %v6180_v0  ;;  %v7436_v32 = vpop.permute.xlu2 %5292 }
 0xa6c   :  { %v3561_v62 = vsel %vm27_vm0, %v7413_v27, -inf }
 0xa6d   :  { %v7402_v9 = vadd.f32 %v3443_v8, %v6180_v0  ;;  %v3555_v14 = vsel %vm27_vm0, %v7420_v5, -inf }
 0xa6e   :  { %v3382_v44 = vpop.f32.mrf.mxu1 }
 0xa6f   :  { %v3311_v2 = vpop.f32.mrf.mxu3  ;;  %v3453_v56 = vmul.f32 0.5, %v3382_v44  ;;  %v3543_v24 = vsel %vm27_vm0, %v7402_v9, -inf }
 0xa70   :  { %v3450_v11 = vmul.f32 0.5, %v3311_v2  ;;  %3544 = vmax.xlane.f32.xlu1 %v3543_v24  ;;  %v3274_v55 = vpop.f32.mrf.mxu2 }
 0xa71   :  { %v7407_v33 = vadd.f32 %v3453_v56, %v6180_v0  ;;  %v3448_v31 = vmul.f32 0.5, %v3274_v55 }
 0xa72   :  { %v7410_v38 = vadd.f32 %v3450_v11, %v6180_v0  ;;  %v3200_v13 = vpop.f32.mrf.mxu0 }
 0xa73   :  { %v3573_v15 = vsel %vm27_vm0, %v7407_v33, -inf  ;;  %v3444_v54 = vmul.f32 0.5, %v3200_v13  ;;  %v7439_v44 = vadd.f32 %v3448_v31, %v6180_v0  ;;  %v7448_v50 = vpop.permute.xlu2 %5297  ;;  %v7461_v31 = vpop.permute.xlu1 %5287 }
 0xa74   :  { %v3564_v59 = vsel %vm27_vm0, %v7410_v38, -inf  ;;  %3574 = vmax.xlane.f32.xlu2 %v3573_v15 }
 0xa75   :  { %3565 = vmax.xlane.f32.xlu0 %v3564_v59  ;;  %v7432_v40 = vadd.f32 %v3444_v54, %v6180_v0  ;;  %v3558_v13 = vsel %vm27_vm0, %v7439_v44, -inf }
 0xa76   :  { %v3385_v52 = vpop.f32.mrf.mxu1 }
 0xa77   :  { %v3454_v10 = vmul.f32 0.5, %v3385_v52  ;;  %v3546_v2 = vsel %vm27_vm0, %v7432_v40, -inf }
 0xa78   :  { %3562 = vmax.xlane.f32.xlu1 %v3561_v62 }
 0xa79   :  { %v7425_v46 = vadd.f32 %v3454_v10, %v6180_v0 }
 0xa7a   :  { %v3345_v57 = vpop.f32.mrf.mxu0  ;;  %v3503_v24 = vpop.xlane.xlu0 %3502 }
 0xa7b   :  { %v3576_v22 = vsel %vm27_vm0, %v7425_v46, -inf  ;;  %v3451_v51 = vmul.f32 0.5, %v3345_v57  ;;  %v3589_v15 = vsub.f32 %v7286_v18, %v3503_v24 }
 0xa7c   :  { %3556 = vmax.xlane.f32.xlu2 %v3555_v14 }
 0xa7d   :  { %v7444_v61 = vadd.f32 %v3451_v51, %v6180_v0  ;;  %v3625_v55 = vmul.f32 1.442695, %v3589_v15 }
 0xa7f   :  { %v3419_v8 = vpop.f32.mrf.mxu2  ;;  %v3567_v10 = vsel %vm27_vm0, %v7444_v61, -inf  ;;  %5464 = vpow2.f32 %v3625_v55 }
 0xa80   :  { %3577 = vmax.xlane.f32.xlu1 %v3576_v22  ;;  %v3455_v59 = vmul.f32 0.5, %v3419_v8 }
 0xa82   :  { %v3348_v56 = vpop.f32.mrf.mxu0  ;;  %v7457_v57 = vadd.f32 %v3455_v59, %v6180_v0 }
 0xa83   :  { %v3452_v11 = vmul.f32 0.5, %v3348_v56 }
 0xa84   :  { %3547 = vmax.xlane.f32.xlu2 %v3546_v2  ;;  %v3579_v51 = vsel %vm27_vm0, %v7457_v57, -inf }
 0xa85   :  { %v7452_v52 = vadd.f32 %v3452_v11, %v6180_v0  ;;  %v7471_v24 = vpop.eup %5464 }
 0xa87   :  { %v3422_v62 = vpop.f32.mrf.mxu2  ;;  %v3570_v14 = vsel %vm27_vm0, %v7452_v52, -inf }
 0xa88   :  { %3559 = vmax.xlane.f32.xlu1 %v3558_v13  ;;  %v3456_v54 = vmul.f32 0.5, %v3422_v62 }
 0xa8a   :  { %v7464_v22 = vadd.f32 %v3456_v54, %v6180_v0  ;;  %v3693_v0 = vsel %vm27_vm0, %v7471_v24, 0.0 }
 0xa8c   :  { %3568 = vmax.xlane.f32.xlu2 %v3567_v10  ;;  %v3582_v56 = vsel %vm27_vm0, %v7464_v22, -inf }
 0xa90   :  { %3571 = vmax.xlane.f32.xlu1 %v3570_v14 }
 0xa92   :  { %v3491_v18 = vpop.xlane.xlu2 %3490 }
 0xa93   :  { %v3585_v8 = vsub.f32 %v7307_v12, %v3491_v18 }
 0xa94   :  { %3580 = vmax.xlane.f32.xlu2 %v3579_v51 }
 0xa95   :  { %v3617_v2 = vmul.f32 1.442695, %v3585_v8 }
 0xa97   :  { %5466 = vpow2.f32 %v3617_v2 }
 0xa98   :  { %3583 = vmax.xlane.f32.xlu1 %v3582_v56 }
 0xa9a   :  { %v3506_v11 = vpop.xlane.xlu2 %3505 }
 0xa9b   :  { %v3494_v13 = vpop.xlane.xlu1 %3493  ;;  %v3590_v15 = vsub.f32 %v7312_v49, %v3506_v11 }
 0xa9c   :  { %v3586_v12 = vsub.f32 %v7315_v23, %v3494_v13  ;;  %3694 = vadd.xlane.f32.xlu2 %v3693_v0 }
 0xa9d   :  { %v7477_v59 = vpop.eup %5466  ;;  %v3627_v10 = vmul.f32 1.442695, %v3590_v15 }
 0xa9e   :  { %v3619_v62 = vmul.f32 1.442695, %v3586_v12  ;;  %v3681_v55 = vsel %vm27_vm0, %v7477_v59, 0.0 }
 0xa9f   :  { %5468 = vpow2.f32 %v3627_v10  ;;  %v3515_v54 = vpop.xlane.xlu0 %3514  ;;  %3682 = vadd.xlane.f32.xlu0 %v3681_v55 }
 0xaa0   :  { %5470 = vpow2.f32 %v3619_v62  ;;  %v3593_v14 = vsub.f32 %v7322_v25, %v3515_v54 }
 0xaa2   :  { %v3633_v49 = vmul.f32 1.442695, %v3593_v14 }
 0xaa4   :  { %5472 = vpow2.f32 %v3633_v49 }
 0xaa5   :  { %v7482_v18 = vpop.eup %5468 }
 0xaa6   :  { %v7484_v8 = vpop.eup %5470  ;;  %v3696_v23 = vsel %vm27_vm0, %v7482_v18, 0.0 }
 0xaa7   :  { %v3518_v51 = vpop.xlane.xlu1 %3517  ;;  %v3684_v2 = vsel %vm27_vm0, %v7484_v8, 0.0  ;;  %3697 = vadd.xlane.f32.xlu2 %v3696_v23  ;;  %v3527_v13 = vpop.xlane.xlu0 %3526 }
 0xaa8   :  { %v3594_v56 = vsub.f32 %v7330_v60, %v3518_v51  ;;  %3685 = vadd.xlane.f32.xlu1 %v3684_v2  ;;  %v3597_v10 = vsub.f32 %v7327_v21, %v3527_v13 }
 0xaaa   :  { %v7491_v11 = vpop.eup %5472  ;;  %v3635_v25 = vmul.f32 1.442695, %v3594_v56  ;;  %v3641_v60 = vmul.f32 1.442695, %v3597_v10 }
 0xaab   :  { %v3705_v15 = vsel %vm27_vm0, %v7491_v11, 0.0  ;;  %v3497_v0 = vpop.xlane.xlu2 %3496 }
 0xaac   :  { %5474 = vpow2.f32 %v3635_v25  ;;  %3706 = vadd.xlane.f32.xlu0 %v3705_v15  ;;  %v3587_v12 = vsub.f32 %v7337_v3, %v3497_v0 }
 0xaae   :  { %v3621_v62 = vmul.f32 1.442695, %v3587_v12 }
 0xaaf   :  { %v3509_v55 = vpop.xlane.xlu1 %3508 }
 0xab0   :  { %5476 = vpow2.f32 %v3621_v62  ;;  %v3591_v21 = vsub.f32 %v7340_v26, %v3509_v55 }
 0xab1   :  { %5478 = vpow2.f32 %v3641_v60 }
 0xab2   :  { %v7497_v54 = vpop.eup %5474  ;;  %v3629_v15 = vmul.f32 1.442695, %v3591_v21 }
 0xab3   :  { %v3500_v14 = vpop.xlane.xlu0 %3499  ;;  %v3708_v49 = vsel %vm27_vm0, %v7497_v54, 0.0  ;;  %v3512_v23 = vpop.xlane.xlu2 %3511 }
 0xab4   :  { %v3588_v51 = vsub.f32 %v7350_v35, %v3500_v14  ;;  %3709 = vadd.xlane.f32.xlu0 %v3708_v49  ;;  %v3592_v2 = vsub.f32 %v7345_v48, %v3512_v23 }
 0xab6   :  { %v7503_v56 = vpop.eup %5476  ;;  %v3623_v3 = vmul.f32 1.442695, %v3588_v51  ;;  %v3631_v25 = vmul.f32 1.442695, %v3592_v2 }
 0xab7   :  { %v3687_v13 = vsel %vm27_vm0, %v7503_v56, 0.0  ;;  %v3530_v0 = vpop.xlane.xlu1 %3529  ;;  %v7508_v12 = vpop.eup %5478 }
 0xab8   :  { %5480 = vpow2.f32 %v3623_v3  ;;  %3688 = vadd.xlane.f32.xlu2 %v3687_v13  ;;  %v3598_v48 = vsub.f32 %v7353_v42, %v3530_v0  ;;  %v3717_v62 = vsel %vm27_vm0, %v7508_v12, 0.0 }
 0xab9   :  { %5482 = vpow2.f32 %v3631_v25 }
 0xaba   :  { %5484 = vpow2.f32 %v3629_v15  ;;  %v3643_v60 = vmul.f32 1.442695, %v3598_v48 }
 0xabc   :  { %5486 = vpow2.f32 %v3643_v60 }
 0xabe   :  { %v7510_v35 = vpop.eup %5480 }
 0xabf   :  { %v7513_v10 = vpop.eup %5482  ;;  %v3690_v26 = vsel %vm27_vm0, %v7510_v35, 0.0 }
 0xac0   :  { %3691 = vadd.xlane.f32.xlu1 %v3690_v26  ;;  %3718 = vadd.xlane.f32.xlu2 %v3717_v62  ;;  %v3702_v55 = vsel %vm27_vm0, %v7513_v10, 0.0  ;;  %v7521_v14 = vpop.eup %5484 }
 0xac1   :  { %3703 = vadd.xlane.f32.xlu0 %v3702_v55  ;;  %v3699_v42 = vsel %vm27_vm0, %v7521_v14, 0.0 }
 0xac2   :  { %v7527_v25 = vpop.eup %5486 }
 0xac3   :  { %v3720_v0 = vsel %vm27_vm0, %v7527_v25, 0.0 }
 0xac8   :  { %v3533_v49 = vpop.xlane.xlu0 %3532  ;;  %3700 = vadd.xlane.f32.xlu2 %v3699_v42 }
 0xac9   :  { %v3599_v23 = vsub.f32 %v7362_v34, %v3533_v49 }
 0xaca   :  { %v3521_v51 = vpop.xlane.xlu1 %3520 }
 0xacb   :  { %v3645_v2 = vmul.f32 1.442695, %v3599_v23  ;;  %v3595_v21 = vsub.f32 %v7365_v30, %v3521_v51  ;;  %v3551_v3 = vpop.xlane.xlu2 %3550 }
 0xacc   :  { %v3605_v15 = vsub.f32 %v7370_v6, %v3551_v3 }
 0xacd   :  { %5488 = vpow2.f32 %v3645_v2  ;;  %v3637_v13 = vmul.f32 1.442695, %v3595_v21 }
 0xace   :  { %v3657_v48 = vmul.f32 1.442695, %v3605_v15 }
 0xacf   :  { %5490 = vpow2.f32 %v3637_v13 }
 0xad0   :  { %3721 = vadd.xlane.f32.xlu2 %v3720_v0  ;;  %5492 = vpow2.f32 %v3657_v48 }
 0xad2   :  { %v3536_v23 = vpop.xlane.xlu1 %3535 }
 0xad3   :  { %v7532_v26 = vpop.eup %5488  ;;  %v3554_v34 = vpop.xlane.xlu0 %3553 }
 0xad4   :  { %v3539_v62 = vpop.xlane.xlu2 %3538  ;;  %v3723_v30 = vsel %vm27_vm0, %v7532_v26, 0.0  ;;  %v3606_v3 = vsub.f32 %v7383_v41, %v3554_v34  ;;  %v3600_v34 = vsub.f32 %v7377_v29, %v3536_v23 }
 0xad5   :  { %v7536_v55 = vpop.eup %5490  ;;  %v3601_v60 = vsub.f32 %v7380_v19, %v3539_v62  ;;  %3724 = vadd.xlane.f32.xlu0 %v3723_v30 }
 0xad6   :  { %v3711_v6 = vsel %vm27_vm0, %v7536_v55, 0.0  ;;  %v7541_v49 = vpop.eup %5492  ;;  %v3659_v0 = vmul.f32 1.442695, %v3606_v3 }
 0xad7   :  { %3712 = vadd.xlane.f32.xlu1 %v3711_v6  ;;  %v3649_v42 = vmul.f32 1.442695, %v3601_v60  ;;  %v3741_v19 = vsel %vm27_vm0, %v7541_v49, 0.0 }
 0xad9   :  { %5494 = vpow2.f32 %v3649_v42 }
 0xadb   :  { %v3542_v2 = vpop.xlane.xlu0 %3541 }
 0xadc   :  { %v3524_v51 = vpop.xlane.xlu2 %3523  ;;  %v3602_v15 = vsub.f32 %v7395_v36, %v3542_v2  ;;  %v3647_v2 = vmul.f32 1.442695, %v3600_v34 }
 0xadd   :  { %v3596_v21 = vsub.f32 %v7392_v63, %v3524_v51 }
 0xade   :  { %v3651_v62 = vmul.f32 1.442695, %v3602_v15 }
 0xadf   :  { %v3639_v13 = vmul.f32 1.442695, %v3596_v21  ;;  %3742 = vadd.xlane.f32.xlu1 %v3741_v19  ;;  %v7548_v48 = vpop.eup %5494 }
 0xae0   :  { %v3729_v41 = vsel %vm27_vm0, %v7548_v48, 0.0 }
 0xae1   :  { %5496 = vpow2.f32 %v3639_v13 }
 0xae2   :  { %5498 = vpow2.f32 %v3659_v0 }
 0xae3   :  { %v3545_v30 = vpop.xlane.xlu1 %3544  ;;  %5500 = vpow2.f32 %v3651_v62 }
 0xae4   :  { %v3603_v60 = vsub.f32 %v7402_v9, %v3545_v30 }
 0xae6   :  { %v3653_v42 = vmul.f32 1.442695, %v3603_v60 }
 0xae7   :  { %v7553_v63 = vpop.eup %5496  ;;  %3730 = vadd.xlane.f32.xlu1 %v3729_v41  ;;  %v3575_v36 = vpop.xlane.xlu2 %3574 }
 0xae8   :  { %v3714_v6 = vsel %vm27_vm0, %v7553_v63, 0.0  ;;  %v7558_v51 = vpop.eup %5498  ;;  %5502 = vpow2.f32 %v3653_v42  ;;  %v3613_v13 = vsub.f32 %v7407_v33, %v3575_v36 }
 0xae9   :  { %3715 = vadd.xlane.f32.xlu2 %v3714_v6  ;;  %v7561_v3 = vpop.eup %5500  ;;  %v3744_v23 = vsel %vm27_vm0, %v7558_v51, 0.0  ;;  %5504 = vpow2.f32 %v3647_v2 }
 0xaea   :  { %v3732_v0 = vsel %vm27_vm0, %v7561_v3, 0.0  ;;  %v3673_v62 = vmul.f32 1.442695, %v3613_v13 }
 0xaeb   :  { %v3563_v21 = vpop.xlane.xlu1 %3562 }
 0xaec   :  { %v3609_v9 = vsub.f32 %v7413_v27, %v3563_v21 }
 0xaee   :  { %v3665_v29 = vmul.f32 1.442695, %v3609_v9  ;;  %v7569_v27 = vpop.eup %5502 }
 0xaef   :  { %3745 = vadd.xlane.f32.xlu1 %v3744_v23  ;;  %v3557_v19 = vpop.xlane.xlu2 %3556  ;;  %v7571_v33 = vpop.eup %5504  ;;  %v3735_v36 = vsel %vm27_vm0, %v7569_v27, 0.0 }
 0xaf0   :  { %5506 = vpow2.f32 %v3665_v29  ;;  %v3607_v15 = vsub.f32 %v7420_v5, %v3557_v19  ;;  %v3726_v2 = vsel %vm27_vm0, %v7571_v33, 0.0 }
 0xaf1   :  { %3733 = vadd.xlane.f32.xlu2 %v3732_v0  ;;  %5508 = vpow2.f32 %v3673_v62 }
 0xaf2   :  { %v3661_v30 = vmul.f32 1.442695, %v3607_v15 }
 0xaf3   :  { %v3578_v60 = vpop.xlane.xlu1 %3577 }
 0xaf4   :  { %v3614_v41 = vsub.f32 %v7425_v46, %v3578_v60  ;;  %5510 = vpow2.f32 %v3661_v30  ;;  %v3566_v46 = vpop.xlane.xlu0 %3565 }
 0xaf5   :  { %v3610_v15 = vsub.f32 %v7410_v38, %v3566_v46 }
 0xaf6   :  { %v7574_v34 = vpop.eup %5506  ;;  %v3675_v21 = vmul.f32 1.442695, %v3614_v41 }
 0xaf7   :  { %3736 = vadd.xlane.f32.xlu1 %v3735_v36  ;;  %v3548_v5 = vpop.xlane.xlu2 %3547  ;;  %v3753_v6 = vsel %vm27_vm0, %v7574_v34, 0.0  ;;  %v7583_v13 = vpop.eup %5508  ;;  %v3667_v41 = vmul.f32 1.442695, %v3610_v15 }
 0xaf8   :  { %v3604_v42 = vsub.f32 %v7432_v40, %v3548_v5  ;;  %3754 = vadd.xlane.f32.xlu0 %v3753_v6  ;;  %v3765_v0 = vsel %vm27_vm0, %v7583_v13, 0.0 }
 0xaf9   :  { %3727 = vadd.xlane.f32.xlu2 %v3726_v2 }
 0xafa   :  { %v3655_v9 = vmul.f32 1.442695, %v3604_v42  ;;  %v7586_v19 = vpop.eup %5510 }
 0xafb   :  { %v3560_v29 = vpop.xlane.xlu1 %3559  ;;  %v3747_v60 = vsel %vm27_vm0, %v7586_v19, 0.0 }
 0xafc   :  { %5512 = vpow2.f32 %v3655_v9  ;;  %v3608_v23 = vsub.f32 %v7439_v44, %v3560_v29 }
 0xafd   :  { %5514 = vpow2.f32 %v3675_v21 }
 0xafe   :  { %v3663_v40 = vmul.f32 1.442695, %v3608_v23 }
 0xaff   :  { %3766 = vadd.xlane.f32.xlu1 %v3765_v0  ;;  %v3569_v62 = vpop.xlane.xlu2 %3568 }
 0xb00   :  { %5516 = vpow2.f32 %v3663_v40  ;;  %v3611_v30 = vsub.f32 %v7444_v61, %v3569_v62 }
 0xb01   :  { %3748 = vadd.xlane.f32.xlu2 %v3747_v60 }
 0xb02   :  { %v7594_v44 = vpop.eup %5512  ;;  %v3669_v36 = vmul.f32 1.442695, %v3611_v30 }
 0xb03   :  { %v7596_v5 = vpop.eup %5514  ;;  %v7598_v38 = vpop.xlane.xlu1 %3571  ;;  %v3738_v6 = vsel %vm27_vm0, %v7594_v44, 0.0 }
 0xb04   :  { %5518 = vpow2.f32 %v3669_v36  ;;  %3739 = vadd.xlane.f32.xlu0 %v3738_v6  ;;  %v3768_v61 = vsel %vm27_vm0, %v7596_v5, 0.0 }
 0xb05   :  { %5520 = vpow2.f32 %v3667_v41 }
 0xb06   :  { %v7602_v42 = vpop.eup %5516 }
 0xb07   :  { %3769 = vadd.xlane.f32.xlu1 %v3768_v61  ;;  %v3581_v2 = vpop.xlane.xlu2 %3580  ;;  %v3750_v21 = vsel %vm27_vm0, %v7602_v42, 0.0 }
 0xb08   :  { %v3615_v46 = vsub.f32 %v7457_v57, %v3581_v2 }
 0xb09   :  { %3751 = vadd.xlane.f32.xlu2 %v3750_v21 }
 0xb0a   :  { %v7609_v9 = vpop.eup %5518  ;;  %v3677_v29 = vmul.f32 1.442695, %v3615_v46  ;;  %v5275_v46 = vunpack.i.h.bf16 %v7297_v4  ;;  %v5301_v4 = vpack.i.bf16 %v7129_v58, %v7140_v16 }
 0xb0b   :  { %v7611_v23 = vpop.eup %5520  ;;  %v3584_v15 = vpop.xlane.xlu1 %3583  ;;  %v3759_v40 = vsel %vm27_vm0, %v7609_v9, 0.0 }
 0xb0c   :  { %5522 = vpow2.f32 %v3677_v29  ;;  %v3616_v0 = vsub.f32 %v7464_v22, %v3584_v15  ;;  %3760 = vadd.xlane.f32.xlu0 %v3759_v40  ;;  %v3756_v30 = vsel %vm27_vm0, %v7611_v23, 0.0  ;;  %v5280_v40 = vunpack.i.h.bf16 %v7299_v53 }
 0xb0e   :  { %v3679_v62 = vmul.f32 1.442695, %v3616_v0  ;;  %v5264_v0 = vunpack.i.l.bf16 %v7288_v28 }
 0xb0f   :  { %3757 = vadd.xlane.f32.xlu1 %v3756_v30  ;;  %v3695_v57 = vpop.xlane.xlu2 %3694 }
 0xb10   :  { %5524 = vpow2.f32 %v3679_v62 }
 0xb11   :  { %5526 = vrcp.f32 %v3695_v57 }
 0xb12   :  { %v7618_v60 = vpop.eup %5522  ;;  %v3683_v41 = vpop.xlane.xlu0 %3682 }
 0xb13   :  { %5528 = vrcp.f32 %v3683_v41  ;;  %v3771_v36 = vsel %vm27_vm0, %v7618_v60, 0.0 }
 0xb14   :  { %3772 = vadd.xlane.f32.xlu2 %v3771_v36  ;;  %v5284_v36 = vunpack.i.l.bf16 %v7429_v7 }
 0xb16   :  { %v7622_v6 = vpop.eup %5524 }
 0xb17   :  { %v5527_v22 = vpop.eup %5526  ;;  %v3774_v61 = vsel %vm27_vm0, %v7622_v6, 0.0 }
 0xb18   :  { %v3813_v2 = vmul.f32 %v5527_v22, %v7471_v24  ;;  %3775 = vadd.xlane.f32.xlu1 %v3774_v61  ;;  %v5269_v24 = vunpack.i.l.bf16 %v7303_v37  ;;  %v5289_v22 = vunpack.i.l.bf16 %v7461_v31 }
 0xb19   :  { %v5529_v21 = vpop.eup %5528 }
 0xb1a   :  { %v3809_v29 = vmul.f32 %v5529_v21, %v7477_v59  ;;  %5095 = vmatmul.msk.f32.vlgmr.msra.gmra.mxu1 %vm27_vm0, %v3813_v2  ;;  %v3698_v15 = vpop.xlane.xlu2 %3697 }
 0xb1b   :  { %4217 = vmatpush.msra.mxu1 %v5275_v46  ;;  %v3686_v62 = vpop.xlane.xlu1 %3685  ;;  %5530 = vrcp.f32 %v3698_v15 }
 0xb1c   :  { %5532 = vrcp.f32 %v3686_v62  ;;  %5091 = vmatmul.msk.f32.vlgmr.msra.gmra.mxu3 %vm27_vm0, %v3809_v29  ;;  %v5294_v29 = vunpack.i.l.bf16 %v7436_v32 }
 0xb1d   :  { %4218 = vmatpush.msra.mxu1 %v5280_v40  ;;  %4147 = vmatpush.msra.mxu3 %v5264_v0 }
 0xb1f   :  { %v3707_v59 = vpop.xlane.xlu0 %3706  ;;  %4148 = vmatpush.msra.mxu3 %v5269_v24  ;;  %v5295_v24 = vunpack.i.h.bf16 %v7436_v32  ;;  %v5290_v32 = vunpack.i.h.bf16 %v7461_v31 }
 0xb20   :  { %5302 = vrot.lane.b32.xlu0 %v5301_v4, %s5634_s20  ;;  %5534 = vrcp.f32 %v3707_v59  ;;  %v5300_v59 = vunpack.i.h.bf16 %v7448_v50 }
 0xb21   :  { %v5531_v53 = vpop.eup %5530 }
 0xb22   :  { %v5533_v30 = vpop.eup %5532  ;;  %v3814_v28 = vmul.f32 %v5531_v53, %v7482_v18  ;;  %v5306_v18 = vpack.i.bf16 %v7131_v47, %v7143_v17  ;;  %v5299_v47 = vunpack.i.l.bf16 %v7448_v50  ;;  %v3612_v17 = vsub.f32 %v7452_v52, %v7598_v38 }
 0xb23   :  { %v3810_v57 = vmul.f32 %v5533_v30, %v7484_v8  ;;  %v5285_v53 = vunpack.i.h.bf16 %v7429_v7 }
 0xb24   :  { %5096 = vmatmul.msk.f32.gmra.mxu1 %vm27_vm0, %v3814_v28  ;;  %v3671_v0 = vmul.f32 1.442695, %v3612_v17 }
 0xb25   :  { %5092 = vmatmul.msk.f32.gmra.mxu3 %vm27_vm0, %v3810_v57 }
 0xb26   :  { %v5535_v41 = vpop.eup %5534 }
 0xb27   :  { %v3710_v37 = vpop.xlane.xlu0 %3709  ;;  %v3817_v58 = vmul.f32 %v5535_v41, %v7491_v11 }
 0xb28   :  { %5536 = vrcp.f32 %v3710_v37 }
 0xb2b   :  { %v3689_v16 = vpop.xlane.xlu2 %3688 }
 0xb2c   :  { %5538 = vrcp.f32 %v3689_v16 }
 0xb2d   :  { %5099 = vmatmul.msk.f32.vlgmr.msrb.gmra.mxu3 %vm27_vm0, %v3817_v58 }
 0xb2e   :  { %4287 = vmatpush.msrb.mxu3 %v5284_v36  ;;  %v5537_v8 = vpop.eup %5536 }
 0xb2f   :  { %v3818_v46 = vmul.f32 %v5537_v8, %v7497_v54 }
 0xb30   :  { %4288 = vmatpush.msrb.mxu3 %v5289_v22 }
 0xb31   :  { %5307 = vrot.lane.b32.xlu1 %v5306_v18, %s5634_s20 }
 0xb32   :  { %v5539_v61 = vpop.eup %5538 }
 0xb33   :  { %v3811_v2 = vmul.f32 %v5539_v61, %v7503_v56  ;;  %v3692_v11 = vpop.xlane.xlu1 %3691  ;;  %v3719_v21 = vpop.xlane.xlu2 %3718 }
 0xb34   :  { %5540 = vrcp.f32 %v3692_v11  ;;  %v3704_v4 = vpop.xlane.xlu0 %3703 }
 0xb35   :  { %5100 = vmatmul.msk.f32.gmra.mxu3 %vm27_vm0, %v3818_v46  ;;  %5093 = vmatmul.msk.f32.vlgmr.msra.gmra.mxu0 %vm27_vm0, %v3811_v2  ;;  %5542 = vrcp.f32 %v3719_v21 }
 0xb36   :  { %4182 = vmatpush.msra.mxu0 %v5294_v29 }
 0xb38   :  { %4183 = vmatpush.msra.mxu0 %v5299_v47 }
 0xb3a   :  { %v5541_v56 = vpop.eup %5540 }
 0xb3b   :  { %v3701_v15 = vpop.xlane.xlu2 %3700  ;;  %v3812_v40 = vmul.f32 %v5541_v56, %v7510_v35  ;;  %v5543_v54 = vpop.eup %5542 }
 0xb3c   :  { %5544 = vrcp.f32 %v3701_v15  ;;  %v3821_v62 = vmul.f32 %v5543_v54, %v7508_v12 }
 0xb3d   :  { %5094 = vmatmul.msk.f32.gmra.mxu0 %vm27_vm0, %v3812_v40  ;;  %5546 = vpow2.f32 %v3671_v0 }
 0xb3e   :  { %5103 = vmatmul.msk.f32.vlgmr.msrb.gmra.mxu1 %vm27_vm0, %v3821_v62  ;;  %5548 = vrcp.f32 %v3704_v4 }
 0xb3f   :  { %4357 = vmatpush.msrb.mxu1 %v5295_v24 }
 0xb41   :  { %4358 = vmatpush.msrb.mxu1 %v5300_v59 }
 0xb42   :  { %v5545_v52 = vpop.eup %5544 }
 0xb43   :  { %v3815_v35 = vmul.f32 %v5545_v52, %v7521_v14  ;;  %v3722_v38 = vpop.xlane.xlu2 %3721  ;;  %v7665_v12 = vpop.eup %5546 }
 0xb44   :  { %5550 = vrcp.f32 %v3722_v38  ;;  %v5549_v30 = vpop.eup %5548  ;;  %v3762_v28 = vsel %vm27_vm0, %v7665_v12, 0.0 }
 0xb45   :  { %5097 = vmatmul.msk.f32.vlgmr.msra.gmra.mxu2 %vm27_vm0, %v3815_v35  ;;  %v3816_v7 = vmul.f32 %v5549_v30, %v7513_v10 }
 0xb46   :  { %4252 = vmatpush.msra.mxu2 %v5285_v53 }
 0xb48   :  { %v3725_v50 = vpop.xlane.xlu0 %3724  ;;  %4253 = vmatpush.msra.mxu2 %v5290_v32 }
 0xb49   :  { %5552 = vrcp.f32 %v3725_v50 }
 0xb4a   :  { %v5551_v57 = vpop.eup %5550  ;;  %v3713_v14 = vpop.xlane.xlu1 %3712  ;;  %3763 = vadd.xlane.f32.xlu0 %v3762_v28 }
 0xb4b   :  { %5554 = vrcp.f32 %v3713_v14  ;;  %v3822_v37 = vmul.f32 %v5551_v57, %v7527_v25 }
 0xb4d   :  { %5098 = vmatmul.msk.f32.gmra.mxu2 %vm27_vm0, %v3816_v7  ;;  %5104 = vmatmul.msk.f32.gmra.mxu1 %vm27_vm0, %v3822_v37 }
 0xb4f   :  { %v5553_v31 = vpop.eup %5552 }
 0xb50   :  { %v3823_v36 = vmul.f32 %v5553_v31, %v7532_v26 }
 0xb51   :  { %v5555_v41 = vpop.eup %5554 }
 0xb52   :  { %v3819_v58 = vmul.f32 %v5555_v41, %v7536_v55  ;;  %v3743_v16 = vpop.xlane.xlu1 %3742 }
 0xb53   :  { %5556 = vrcp.f32 %v3743_v16 }
 0xb54   :  { %5101 = vmatmul.msk.f32.vlgmr.msrb.gmra.mxu0 %vm27_vm0, %v3819_v58 }
 0xb55   :  { %5105 = vmatmul.msk.f32.vlgmr.msrb.gmra.mxu2 %vm27_vm0, %v3823_v36 }
 0xb59   :  { %v5557_v22 = vpop.eup %5556 }
 0xb5a   :  { %v3829_v10 = vmul.f32 %v5557_v22, %v7541_v49  ;;  %v3731_v25 = vpop.xlane.xlu1 %3730 }
 0xb5b   :  { %5558 = vrcp.f32 %v3731_v25 }
 0xb5c   :  { %v3716_v18 = vpop.xlane.xlu2 %3715  ;;  %5111 = vmatmul.msk.f32.vlgmr.msra.gmra.mxu1 %vm27_vm0, %v3829_v10 }
 0xb5d   :  { %5560 = vrcp.f32 %v3716_v18 }
 0xb61   :  { %v5559_v8 = vpop.eup %5558 }
 0xb62   :  { %v3825_v55 = vmul.f32 %v5559_v8, %v7548_v48  ;;  %v3746_v61 = vpop.xlane.xlu1 %3745 }
 0xb63   :  { %v5561_v2 = vpop.eup %5560  ;;  %5562 = vrcp.f32 %v3746_v61 }
 0xb64   :  { %v3734_v26 = vpop.xlane.xlu2 %3733  ;;  %5107 = vmatmul.msk.f32.vlgmr.msra.gmra.mxu3 %vm27_vm0, %v3825_v55  ;;  %v3820_v11 = vmul.f32 %v5561_v2, %v7553_v63 }
 0xb65   :  { %5564 = vrcp.f32 %v3734_v26 }
 0xb66   :  { %5102 = vmatmul.msk.f32.gmra.mxu0 %vm27_vm0, %v3820_v11 }
 0xb69   :  { %v5563_v49 = vpop.eup %5562 }
 0xb6a   :  { %v3737_v21 = vpop.xlane.xlu1 %3736  ;;  %v3830_v46 = vmul.f32 %v5563_v49, %v7558_v51 }
 0xb6b   :  { %v5565_v29 = vpop.eup %5564  ;;  %5566 = vrcp.f32 %v3737_v21  ;;  %v3755_v47 = vpop.xlane.xlu0 %3754 }
 0xb6c   :  { %5568 = vrcp.f32 %v3755_v47  ;;  %v3728_v48 = vpop.xlane.xlu2 %3727  ;;  %5112 = vmatmul.msk.f32.gmra.mxu1 %vm27_vm0, %v3830_v46  ;;  %v3826_v17 = vmul.f32 %v5565_v29, %v7561_v3 }
 0xb6d   :  { %5570 = vrcp.f32 %v3728_v48 }
 0xb6e   :  { %5108 = vmatmul.msk.f32.gmra.mxu3 %vm27_vm0, %v3826_v17 }
 0xb71   :  { %v5567_v63 = vpop.eup %5566 }
 0xb72   :  { %v5569_v56 = vpop.eup %5568  ;;  %v3827_v15 = vmul.f32 %v5567_v63, %v7569_v27  ;;  %v3767_v40 = vpop.xlane.xlu1 %3766 }
 0xb73   :  { %v5571_v54 = vpop.eup %5570  ;;  %v3833_v51 = vmul.f32 %v5569_v56, %v7574_v34  ;;  %5572 = vrcp.f32 %v3767_v40 }
 0xb74   :  { %v3749_v0 = vpop.xlane.xlu2 %3748  ;;  %5109 = vmatmul.msk.f32.vlgmr.msra.gmra.mxu0 %vm27_vm0, %v3827_v15  ;;  %v3824_v62 = vmul.f32 %v5571_v54, %v7571_v33 }
 0xb75   :  { %5574 = vrcp.f32 %v3749_v0 }
 0xb76   :  { %5106 = vmatmul.msk.f32.gmra.mxu2 %vm27_vm0, %v3824_v62  ;;  %5115 = vmatmul.msk.f32.vlgmr.msrb.gmra.mxu3 %vm27_vm0, %v3833_v51 }
 0xb77   :  { %v3740_v3 = vpop.xlane.xlu0 %3739 }
 0xb78   :  { %5576 = vrcp.f32 %v3740_v3 }
 0xb79   :  { %v5573_v24 = vpop.eup %5572 }
 0xb7a   :  { %v3837_v27 = vmul.f32 %v5573_v24, %v7583_v13  ;;  %v3770_v4 = vpop.xlane.xlu1 %3769 }
 0xb7b   :  { %v5575_v59 = vpop.eup %5574  ;;  %5578 = vrcp.f32 %v3770_v4 }
 0xb7c   :  { %v3831_v34 = vmul.f32 %v5575_v59, %v7586_v19  ;;  %v3752_v52 = vpop.xlane.xlu2 %3751  ;;  %5119 = vmatmul.msk.f32.vlgmr.msrb.gmra.mxu1 %vm27_vm0, %v3837_v27 }
 0xb7d   :  { %5580 = vrcp.f32 %v3752_v52 }
 0xb7e   :  { %v5577_v33 = vpop.eup %5576  ;;  %5113 = vmatmul.msk.f32.vlgmr.msra.gmra.mxu2 %vm27_vm0, %v3831_v34 }
 0xb7f   :  { %v3828_v35 = vmul.f32 %v5577_v33, %v7594_v44  ;;  %v3761_v50 = vpop.xlane.xlu0 %3760 }
 0xb81   :  { %v5579_v38 = vpop.eup %5578  ;;  %5110 = vmatmul.msk.f32.gmra.mxu0 %vm27_vm0, %v3828_v35 }
 0xb82   :  { %v3758_v53 = vpop.xlane.xlu1 %3757  ;;  %v3838_v13 = vmul.f32 %v5579_v38, %v7596_v5 }
 0xb83   :  { %v5581_v32 = vpop.eup %5580  ;;  %5582 = vrcp.f32 %v3758_v53 }
 0xb84   :  { %5120 = vmatmul.msk.f32.gmra.mxu1 %vm27_vm0, %v3838_v13  ;;  %v3832_v19 = vmul.f32 %v5581_v32, %v7602_v42  ;;  %v4981_v13 = vld [vmem:[%s7919_s3 + $0x78] sm:$0xff]  ;;  %v4980_v32 = vld [vmem:[%s7919_s3 + $0x70] sm:$0xff] }
 0xb85   :  { %4565 = vmatpush.msra.mxu3 %v4981_v13 }
 0xb86   :  { %5114 = vmatmul.msk.f32.gmra.mxu2 %vm27_vm0, %v3832_v19  ;;  %v4979_v19 = vld [vmem:[%s7919_s3 + $0x68] sm:$0xff] }
 0xb87   :  { %v3773_v28 = vpop.xlane.xlu2 %3772  ;;  %4566 = vmatpush.msra.mxu3 %v4980_v32 }
 0xb88   :  { %5584 = vrcp.f32 %v3773_v28  ;;  %v4978_v28 = vld [vmem:[%s7919_s3 + $0x60] sm:$0xff] }
 0xb89   :  { %v5583_v30 = vpop.eup %5582  ;;  %4567 = vmatpush.msra.mxu3 %v4979_v19 }
 0xb8a   :  { %v3834_v57 = vmul.f32 %v5583_v30, %v7611_v23 }
 0xb8b   :  { %v3776_v44 = vpop.xlane.xlu1 %3775  ;;  %4568 = vmatpush.msra.mxu3 %v4978_v28 }
 0xb8c   :  { %5116 = vmatmul.msk.f32.gmra.mxu3 %vm27_vm0, %v3834_v57  ;;  %5586 = vrcp.f32 %v3776_v44 }
 0xb8d   :  { %5588 = vrcp.f32 %v3761_v50 }
 0xb8e   :  { %v5585_v7 = vpop.eup %5584 }
 0xb8f   :  { %v3839_v31 = vmul.f32 %v5585_v7, %v7618_v60 }
 0xb92   :  { %v5303_v14 = vpop.permute.xlu0 %5302  ;;  %v5587_v41 = vpop.eup %5586 }
 0xb93   :  { %v5304_v5 = vunpack.i.l.bf16 %v5303_v14  ;;  %v5305_v37 = vunpack.i.h.bf16 %v5303_v14  ;;  %v3840_v23 = vmul.f32 %v5587_v41, %v7622_v6  ;;  %v5589_v22 = vpop.eup %5588 }
 0xb94   :  { %v3835_v25 = vmul.f32 %v5589_v22, %v7609_v9 }
 0xb95   :  { %4392 = vmatpush.msrb.mxu2 %v5304_v5 }
 0xb97   :  { %v3940_v42 = vpop.f32.mrf.mxu1  ;;  %4393 = vmatpush.msrb.mxu2 %v5305_v37 }
 0xb98   :  { %4405 = vrot.lane.b32.xlu2 %v3940_v42, %s5636_s21  ;;  %5121 = vmatmul.msk.f32.vlgmr.msrb.gmra.mxu2 %vm27_vm0, %v3839_v31 }
 0xb9f   :  { %v7710_v58 = vpop.f32.mrf.mxu3 }
 0xba0   :  { %5122 = vmatmul.msk.f32.gmra.mxu2 %vm27_vm0, %v3840_v23 }
 0xba1   :  { %v3943_v16 = vpop.f32.mrf.mxu1 }
 0xba2   :  { %4407 = vrot.lane.b32.xlu2 %v3943_v16, %s5636_s21 }
 0xba3   :  { %v5308_v36 = vpop.permute.xlu1 %5307 }
 0xba4   :  { %v5309_v60 = vunpack.i.l.bf16 %v5308_v36  ;;  %v5310_v10 = vunpack.i.h.bf16 %v5308_v36 }
 0xba6   :  { %4322 = vmatpush.msrb.mxu0 %v5309_v60 }
 0xba8   :  { %v7715_v18 = vpop.f32.mrf.mxu3  ;;  %4323 = vmatpush.msrb.mxu0 %v5310_v10 }
 0xba9   :  { %5117 = vmatmul.msk.f32.vlgmr.msrb.gmra.mxu0 %vm27_vm0, %v3835_v25 }
 0xbb0   :  { %v4010_v6 = vpop.f32.mrf.mxu3 }
 0xbb1   :  { %4421 = vrot.lane.b32.xlu1 %v4010_v6, %s5637_s22 }
 0xbb2   :  { %v7721_v2 = vpop.f32.mrf.mxu0 }
 0xbb8   :  { %v4013_v8 = vpop.f32.mrf.mxu3 }
 0xbb9   :  { %4423 = vrot.lane.b32.xlu1 %v4013_v8, %s5637_s22 }
 0xbba   :  { %v7725_v11 = vpop.f32.mrf.mxu0 }
 0xbbb   :  { %v4080_v55 = vpop.f32.mrf.mxu1 }
 0xbbc   :  { %4437 = vrot.lane.b32.xlu2 %v4080_v55, %s5638_s23 }
 0xbbd   :  { %v3764_v61 = vpop.xlane.xlu0 %3763 }
 0xbbe   :  { %5590 = vrcp.f32 %v3764_v61 }
 0xbc4   :  { %v5591_v26 = vpop.eup %5590 }
 0xbc5   :  { %v3836_v9 = vmul.f32 %v5591_v26, %v7665_v12 }
 0xbc7   :  { %5118 = vmatmul.msk.f32.gmra.mxu0 %vm27_vm0, %v3836_v9 }
 0xbc8   :  { %v3975_v46 = vpop.f32.mrf.mxu2 }
 0xbca   :  { %v4083_v49 = vpop.f32.mrf.mxu1 }
 0xbcb   :  { %4439 = vrot.lane.b32.xlu2 %v4083_v49, %s5638_s23 }
 0xbd0   :  { %v3978_v47 = vpop.f32.mrf.mxu2 }
 0xbd1   :  { %v4045_v21 = vpop.f32.mrf.mxu0 }
 0xbd2   :  { %4425 = vrot.lane.b32.xlu0 %v4045_v21, %s5637_s22 }
 0xbd3   :  { %4409 = vrot.lane.b32.xlu2 %v3975_v46, %s5636_s21 }
 0xbd8   :  { %v4115_v63 = vpop.f32.mrf.mxu2 }
 0xbd9   :  { %v4220_v29 = vpop.f32.mrf.mxu1 }
 0xbdb   :  { %4469 = vrot.lane.b32.xlu2 %v4220_v29, %s5640_s25 }
 0xbe3   :  { %v4048_v12 = vpop.f32.mrf.mxu0 }
 0xbe7   :  { %v4150_v48 = vpop.f32.mrf.mxu3 }
 0xbe8   :  { %4453 = vrot.lane.b32.xlu1 %v4150_v48, %s5639_s24 }
 0xbe9   :  { %v4223_v17 = vpop.f32.mrf.mxu1 }
 0xbea   :  { %4471 = vrot.lane.b32.xlu2 %v4223_v17, %s5640_s25 }
 0xbf0   :  { %4441 = vrot.lane.b32.xlu1 %v4115_v63, %s5638_s23 }
 0xbf1   :  { %v4185_v56 = vpop.f32.mrf.mxu0  ;;  %v4153_v15 = vpop.f32.mrf.mxu3 }
 0xbf2   :  { %4457 = vrot.lane.b32.xlu2 %v4185_v56, %s5639_s24  ;;  %v4406_v35 = vpop.permute.xlu2 %4405 }
 0xbf3   :  { %v4513_v31 = vsel %vm474_vm2, %v7710_v58, %v4406_v35 }
 0xbf8   :  { %4455 = vrot.lane.b32.xlu1 %v4153_v15, %s5639_s24 }
 0xbf9   :  { %v4118_v40 = vpop.f32.mrf.mxu2  ;;  %v4360_v54 = vpop.f32.mrf.mxu1 }
 0xbfa   :  { %4443 = vrot.lane.b32.xlu2 %v4118_v40, %s5638_s23  ;;  %4501 = vrot.lane.b32.xlu0 %v4360_v54, %s5642_s27  ;;  %v4290_v62 = vpop.f32.mrf.mxu3 }
 0xbfc   :  { %v4408_v38 = vpop.permute.xlu2 %4407 }
 0xbfd   :  { %v4514_v60 = vsel %vm474_vm2, %v7715_v18, %v4408_v38 }
 0xbfe   :  { %v4188_v4 = vpop.f32.mrf.mxu0 }
 0xc01   :  { %v4255_v51 = vpop.f32.mrf.mxu2  ;;  %v4363_v0 = vpop.f32.mrf.mxu1 }
 0xc02   :  { %4473 = vrot.lane.b32.xlu0 %v4255_v51, %s5640_s25  ;;  %4503 = vrot.lane.b32.xlu1 %v4363_v0, %s5642_s27 }
 0xc09   :  { %v4258_v24 = vpop.f32.mrf.mxu2 }
 0xc0a   :  { %4485 = vrot.lane.b32.xlu1 %v4290_v62, %s5641_s26 }
 0xc0f   :  { %v4293_v3 = vpop.f32.mrf.mxu3 }
 0xc10   :  { %4487 = vrot.lane.b32.xlu0 %v4293_v3, %s5641_s26 }
 0xc16   :  { %v4438_v30 = vpop.permute.xlu2 %4437 }
 0xc18   :  { %4411 = vrot.lane.b32.xlu0 %v3978_v47, %s5636_s21 }
 0xc1b   :  { %v4395_v27 = vpop.f32.mrf.mxu2 }
 0xc1c   :  { %4505 = vrot.lane.b32.xlu2 %v4395_v27, %s5642_s27 }
 0xc20   :  { %4459 = vrot.lane.b32.xlu0 %v4188_v4, %s5639_s24 }
 0xc23   :  { %v4398_v34 = vpop.f32.mrf.mxu2  ;;  %v4422_v33 = vpop.permute.xlu1 %4421 }
 0xc24   :  { %v4517_v41 = vsel %vm2153_vm4, %v4513_v31, %v4422_v33 }
 0xc25   :  { %v4440_v57 = vpop.permute.xlu2 %4439  ;;  %v4521_v16 = vsel %vm2158_vm5, %v4517_v41, %v4438_v30 }
 0xc26   :  { %v4325_v59 = vpop.f32.mrf.mxu0 }
 0xc27   :  { %4489 = vrot.lane.b32.xlu1 %v4325_v59, %s5641_s26 }
 0xc28   :  { %4507 = vrot.lane.b32.xlu0 %v4398_v34, %s5642_s27  ;;  %s5643_s27 = smov [#allocation2]  }
 0xc29   :  { %s4791_s1 = sshll.u32 %s5643_s27, 4  ;;  %s4792_s1 = int_to_ptr.vmem [resolvable:$true] %s4791_s1 }
 0xc2b   :  { %v4424_v53 = vpop.permute.xlu1 %4423 }
 0xc2c   :  { %v4518_v10 = vsel %vm2153_vm4, %v4514_v60, %v4424_v53 }
 0xc2d   :  { %v4410_v7 = vpop.permute.xlu2 %4409  ;;  %v4522_v55 = vsel %vm2158_vm5, %v4518_v10, %v4440_v57  ;;  %v4993_v10 = vld [vmem:[%s7920_s4 + $0x40] sm:$0xff] }
 0xc2e   :  { %v4515_v47 = vsel %vm474_vm2, %v7721_v2, %v4410_v7  ;;  %4722 = vmatpush.msra.mxu0 %v4993_v10 }
 0xc2f   :  { %4427 = vrot.lane.b32.xlu1 %v4048_v12, %s5637_s22 }
 0xc35   :  { %v4470_v23 = vpop.permute.xlu2 %4469 }
 0xc37   :  { %4475 = vrot.lane.b32.xlu1 %v4258_v24, %s5640_s25 }
 0xc44   :  { %v4328_v52 = vpop.f32.mrf.mxu0  ;;  %v4426_v14 = vpop.permute.xlu0 %4425 }
 0xc45   :  { %4491 = vrot.lane.b32.xlu2 %v4328_v52, %s5641_s26  ;;  %v4472_v8 = vpop.permute.xlu2 %4471  ;;  %v4519_v48 = vsel %vm2153_vm4, %v4515_v47, %v4426_v14  ;;  %s4793_s26 = sshll.u32 %s7921_s5, 4  ;;  %s4794_s26 = int_to_ptr.hbm [resolvable:$true] %s4793_s26 }
 0xc4d   :  { %v4458_v46 = vpop.permute.xlu2 %4457 }
 0xc55   :  { %v4444_v29 = vpop.permute.xlu2 %4443 }
 0xc5a   :  { %v4454_v50 = vpop.permute.xlu1 %4453 }
 0xc5b   :  { %v4525_v36 = vsel %vm27_vm0, %v4521_v16, %v4454_v50 }
 0xc5c   :  { %v4529_v25 = vsel %vm2167_vm6, %v4525_v36, %v4470_v23 }
 0xc62   :  { %v4442_v44 = vpop.permute.xlu1 %4441 }
 0xc63   :  { %v4523_v12 = vsel %vm2158_vm5, %v4519_v48, %v4442_v44 }
 0xc64   :  { %v4527_v63 = vsel %vm27_vm0, %v4523_v12, %v4458_v46 }
 0xc6a   :  { %v4456_v5 = vpop.permute.xlu1 %4455 }
 0xc6b   :  { %v4526_v26 = vsel %vm27_vm0, %v4522_v55, %v4456_v5 }
 0xc6c   :  { %v4502_v37 = vpop.permute.xlu0 %4501  ;;  %v4530_v49 = vsel %vm2167_vm6, %v4526_v26, %v4472_v8  ;;  %v4990_v8 = vld [vmem:[%s7920_s4 + $0x28] sm:$0xff] }
 0xc74   :  { %v4504_v42 = vpop.permute.xlu1 %4503  ;;  %v4474_v22 = vpop.permute.xlu0 %4473 }
 0xc75   :  { %v4531_v56 = vsel %vm2167_vm6, %v4527_v63, %v4474_v22 }
 0xc76   :  { %v4506_v40 = vpop.permute.xlu2 %4505 }
 0xc7c   :  { %v4486_v6 = vpop.permute.xlu1 %4485 }
 0xc7d   :  { %v4533_v58 = vsel %vm2172_vm7, %v4529_v25, %v4486_v6  ;;  %v4991_v25 = vld [vmem:[%s7920_s4 + $0x30] sm:$0xff] }
 0xc7e   :  { %v4537_v61 = vsel %vm2177_vm8, %v4533_v58, %v4502_v37 }
 0xc7f   :  { %5123 = vmatmul.msk.f32.vlgmr.msra.gmra.mxu3 %vm139_vm1, %v4537_v61 }
 0xc82   :  { %v4488_v9 = vpop.permute.xlu0 %4487 }
 0xc83   :  { %v4534_v18 = vsel %vm2172_vm7, %v4530_v49, %v4488_v9 }
 0xc84   :  { %v4538_v21 = vsel %vm2177_vm8, %v4534_v18, %v4504_v42 }
 0xc87   :  { %5124 = vmatmul.msk.f32.gmra.mxu3 %vm139_vm1, %v4538_v21 }
 0xc8a   :  { %v4412_v17 = vpop.permute.xlu0 %4411 }
 0xc8b   :  { %v4516_v2 = vsel %vm474_vm2, %v7725_v11, %v4412_v17  ;;  %v7801_v11 = vld [vmem:[%s7920_s4 + $0x48] sm:$0xff] }
 0xc8c   :  { %v4586_v38 = vperm.slane %v7801_v11, 4 }
 0xc92   :  { %v4460_v0 = vpop.permute.xlu0 %4459 }
 0xc99   :  { %v4490_v15 = vpop.permute.xlu1 %4489 }
 0xc9a   :  { %v4535_v54 = vsel %vm2172_vm7, %v4531_v56, %v4490_v15  ;;  %v4508_v52 = vpop.permute.xlu0 %4507 }
 0xc9b   :  { %v4539_v51 = vsel %vm2177_vm8, %v4535_v54, %v4506_v40 }
 0xc9c   :  { %5125 = vmatmul.msk.f32.gmra.mxu3 %vm139_vm1, %v4539_v51  ;;  %v7853_v51 = vperm.slane %v7801_v11, 2 }
 0xc9f   :  { %v4492_v59 = vpop.permute.xlu2 %4491 }
 0xca1   :  { %v4428_v62 = vpop.permute.xlu1 %4427 }
 0xca2   :  { %v4520_v3 = vsel %vm2153_vm4, %v4516_v2, %v4428_v62 }
 0xca3   :  { %v4524_v24 = vsel %vm2158_vm5, %v4520_v3, %v4444_v29 }
 0xca4   :  { %v4528_v4 = vsel %vm27_vm0, %v4524_v24, %v4460_v0 }
 0xca9   :  { %v4476_v27 = vpop.permute.xlu1 %4475 }
 0xcaa   :  { %v4532_v34 = vsel %vm2167_vm6, %v4528_v4, %v4476_v27  ;;  %v7857_v27 = vperm.slane %v7801_v11, 3 }
 0xcab   :  { %v4536_v33 = vsel %vm2172_vm7, %v4532_v34, %v4492_v59 }
 0xcac   :  { %v4540_v35 = vsel %vm2177_vm8, %v4536_v33, %v4508_v52 }
 0xcad   :  { %5126 = vmatmul.msk.f32.gmra.mxu3 %vm139_vm1, %v4540_v35 }
 0xd02   :  { %v4570_v53 = vpop.f32.mrf.mxu3 }
 0xd03   :  { %v4582_v13 = vadd.f32 %v4570_v53, %v6807_v20 }
 0xd05   :  { %v7805_v32 = vadd.f32 %v4586_v38, %v4582_v13 }
 0xd07   :  { %v4591_v19 = vsel %vm139_vm1, %v7805_v32, 0.0  ;;  %v4607_v30 = vmul.f32 %v7805_v32, %v7805_v32 }
 0xd08   :  { %4592 = vadd.xlane.f32.xlu1 %v4591_v19 }
 0xd09   :  { %v4611_v50 = vsel %vm139_vm1, %v4607_v30, 0.0 }
 0xd0a   :  { %4612 = vadd.xlane.f32.xlu2 %v4611_v50  ;;  %v4573_v28 = vpop.f32.mrf.mxu3 }
 0xd0b   :  { %v4583_v57 = vadd.f32 %v4573_v28, %v6815_v45 }
 0xd0d   :  { %v7813_v44 = vadd.f32 %v4586_v38, %v4583_v57 }
 0xd0f   :  { %v4594_v20 = vsel %vm139_vm1, %v7813_v44, 0.0  ;;  %v4608_v14 = vmul.f32 %v7813_v44, %v7813_v44 }
 0xd10   :  { %4595 = vadd.xlane.f32.xlu0 %v4594_v20 }
 0xd11   :  { %v4614_v7 = vsel %vm139_vm1, %v4608_v14, 0.0 }
 0xd12   :  { %4615 = vadd.xlane.f32.xlu1 %v4614_v7 }
 0xd1f   :  { %v4576_v5 = vpop.f32.mrf.mxu3 }
 0xd20   :  { %v4584_v37 = vadd.f32 %v4576_v5, %v6823_v43 }
 0xd22   :  { %v7821_v31 = vadd.f32 %v4586_v38, %v4584_v37 }
 0xd24   :  { %v4597_v45 = vsel %vm139_vm1, %v7821_v31, 0.0  ;;  %v4609_v42 = vmul.f32 %v7821_v31, %v7821_v31 }
 0xd25   :  { %4598 = vadd.xlane.f32.xlu2 %v4597_v45 }
 0xd26   :  { %v4617_v41 = vsel %vm139_vm1, %v4609_v42, 0.0 }
 0xd27   :  { %4618 = vadd.xlane.f32.xlu0 %v4617_v41 }
 0xd30   :  { %v4579_v23 = vpop.f32.mrf.mxu3 }
 0xd31   :  { %v4585_v16 = vadd.f32 %v4579_v23, %v6831_v1  ;;  %v4992_v1 = vld [vmem:[%s7920_s4 + $0x38] sm:$0xff] }
 0xd32   :  { %4723 = vmatpush.msra.mxu0 %v4992_v1  ;;  %v4987_v1 = vld [vmem:[%s7919_s3 + $0xa8] sm:$0xff] }
 0xd33   :  { %v7829_v36 = vadd.f32 %v4586_v38, %v4585_v16  ;;  %v4989_v16 = vld [vmem:[%s7919_s3 + $0xb8] sm:$0xff] }
 0xd34   :  { %4724 = vmatpush.msra.mxu0 %v4991_v25  ;;  %4764 = vmatpush.msra.mxu1 %v4989_v16 }
 0xd35   :  { %v4600_v43 = vsel %vm139_vm1, %v7829_v36, 0.0  ;;  %v4610_v22 = vmul.f32 %v7829_v36, %v7829_v36 }
 0xd36   :  { %4601 = vadd.xlane.f32.xlu1 %v4600_v43  ;;  %4725 = vmatpush.msra.mxu0 %v4990_v8  ;;  %v4986_v8 = vld [vmem:[%s7919_s3 + $0xa0] sm:$0xff] }
 0xd37   :  { %v4620_v60 = vsel %vm139_vm1, %v4610_v22, 0.0 }
 0xd38   :  { %4621 = vadd.xlane.f32.xlu2 %v4620_v60 }
 0xd7b   :  { %v4593_v6 = vpop.xlane.xlu1 %4592 }
 0xd7c   :  { %v4603_v58 = vmul.f32 %v4593_v6, %v5712_v39 }
 0xd7d   :  { %v4613_v55 = vpop.xlane.xlu2 %4612 }
 0xd7e   :  { %v4627_v61 = vmul.f32 %v4603_v58, %v4603_v58  ;;  %v4623_v26 = vmul.f32 %v4613_v55, %v5712_v39  ;;  %v4679_v24 = vsub.f32 %v7805_v32, %v4603_v58 }
 0xd80   :  { %v4631_v9 = vsub.f32 %v4623_v26, %v4627_v61 }
 0xd82   :  { %v4635_v49 = vadd.f32 1e-05, %v4631_v9 }
 0xd83   :  { %v4596_v18 = vpop.xlane.xlu0 %4595 }
 0xd84   :  { %5592 = vrsqrt.f32 %v4635_v49  ;;  %v4604_v21 = vmul.f32 %v4596_v18, %v5712_v39  ;;  %vm4645_vm2 = vweird.f32 %v4635_v49 }
 0xd85   :  { %v4616_v46 = vpop.xlane.xlu1 %4615 }
 0xd86   :  { %v4628_v29 = vmul.f32 %v4604_v21, %v4604_v21  ;;  %v4624_v47 = vmul.f32 %v4616_v46, %v5712_v39  ;;  %v4680_v57 = vsub.f32 %v7813_v44, %v4604_v21  ;;  %v4988_v44 = vld [vmem:[%s7919_s3 + $0xb0] sm:$0xff] }
 0xd87   :  { %4765 = vmatpush.msra.mxu1 %v4988_v44 }
 0xd88   :  { %v4632_v48 = vsub.f32 %v4624_v47, %v4628_v29 }
 0xd89   :  { %4766 = vmatpush.msra.mxu1 %v4987_v1 }
 0xd8a   :  { %v5593_v12 = vpop.eup %5592  ;;  %v4636_v17 = vadd.f32 1e-05, %v4632_v48 }
 0xd8b   :  { %v4640_v63 = vmul.f32 %v5593_v12, %v4635_v49  ;;  %vm4646_vm0 = vweird.f32 %v5593_v12  ;;  %4767 = vmatpush.msra.mxu1 %v4986_v8 }
 0xd8c   :  { %5594 = vrsqrt.f32 %v4636_v17  ;;  %vm4647_vm4 = vmor %vm4645_vm2, %vm4646_vm0  ;;  %vm4655_vm6 = vweird.f32 %v4636_v17 }
 0xd8d   :  { %v4641_v56 = vmul.f32 %v5593_v12, %v4640_v63 }
 0xd8f   :  { %v4642_v15 = vmul.f32 0.5, %v4641_v56 }
 0xd91   :  { %v4643_v40 = vsub.f32 1.5, %v4642_v15 }
 0xd92   :  { %v5595_v54 = vpop.eup %5594 }
 0xd93   :  { %v4644_v0 = vmul.f32 %v5593_v12, %v4643_v40  ;;  %v4650_v62 = vmul.f32 %v5595_v54, %v4636_v17  ;;  %vm4656_vm5 = vweird.f32 %v5595_v54 }
 0xd94   :  { %vm4657_vm7 = vmor %vm4655_vm6, %vm4656_vm5 }
 0xd95   :  { %v4648_v2 = vsel %vm4647_vm4, %v5593_v12, %v4644_v0  ;;  %v4651_v3 = vmul.f32 %v5595_v54, %v4650_v62  ;;  %v4983_v0 = vld [vmem:[%s7919_s3 + $0x88] sm:$0xff] }
 0xd96   :  { %v4684_v4 = vmul.f32 %v7853_v51, %v4648_v2 }
 0xd97   :  { %v4652_v59 = vmul.f32 0.5, %v4651_v3 }
 0xd98   :  { %v4599_v34 = vpop.xlane.xlu2 %4598  ;;  %v4688_v52 = vmul.f32 %v4684_v4, %v4679_v24 }
 0xd99   :  { %v4605_v33 = vmul.f32 %v4599_v34, %v5712_v39  ;;  %v4653_v35 = vsub.f32 1.5, %v4652_v59 }
 0xd9a   :  { %v4619_v38 = vpop.xlane.xlu0 %4618  ;;  %v4693_v53 = vadd.f32 %v7857_v27, %v4688_v52 }
 0xd9b   :  { %v4629_v13 = vmul.f32 %v4605_v33, %v4605_v33  ;;  %v4625_v19 = vmul.f32 %v4619_v38, %v5712_v39  ;;  %v4654_v30 = vmul.f32 %v5595_v54, %v4653_v35  ;;  %v4681_v26 = vsub.f32 %v7821_v31, %v4605_v33 }
 0xd9c   :  { %5127 = vmatmul.msk.f32.vlgmr.msra.gmra.mxu0 %vm139_vm1, %v4693_v53  ;;  %v4743_v53 = vperm.slane %v7801_v11, 5 }
 0xd9d   :  { %v4633_v50 = vsub.f32 %v4625_v19, %v4629_v13  ;;  %v4658_v28 = vsel %vm4657_vm7, %v5595_v54, %v4654_v30  ;;  %v4984_v54 = vld [vmem:[%s7919_s3 + $0x90] sm:$0xff] }
 0xd9e   :  { %v4685_v14 = vmul.f32 %v7853_v51, %v4658_v28 }
 0xd9f   :  { %v4637_v20 = vadd.f32 1e-05, %v4633_v50 }
 0xda0   :  { %v4689_v7 = vmul.f32 %v4685_v14, %v4680_v57 }
 0xda1   :  { %5596 = vrsqrt.f32 %v4637_v20  ;;  %vm4665_vm11 = vweird.f32 %v4637_v20 }
 0xda2   :  { %v4694_v5 = vadd.f32 %v7857_v27, %v4689_v7 }
 0xda4   :  { %5128 = vmatmul.msk.f32.gmra.mxu0 %vm139_vm1, %v4694_v5 }
 0xda7   :  { %v5597_v37 = vpop.eup %5596 }
 0xda8   :  { %v4660_v45 = vmul.f32 %v5597_v37, %v4637_v20  ;;  %vm4666_vm8 = vweird.f32 %v5597_v37 }
 0xda9   :  { %v4602_v42 = vpop.xlane.xlu1 %4601  ;;  %vm4667_vm12 = vmor %vm4665_vm11, %vm4666_vm8 }
 0xdaa   :  { %v4661_v41 = vmul.f32 %v5597_v37, %v4660_v45  ;;  %v4606_v23 = vmul.f32 %v4602_v42, %v5712_v39 }
 0xdab   :  { %v4622_v43 = vpop.xlane.xlu2 %4621 }
 0xdac   :  { %v4662_v22 = vmul.f32 0.5, %v4661_v41  ;;  %v4630_v60 = vmul.f32 %v4606_v23, %v4606_v23  ;;  %v4626_v10 = vmul.f32 %v4622_v43, %v5712_v39  ;;  %v4985_v39 = vld [vmem:[%s7919_s3 + $0x98] sm:$0xff]  ;;  %v4682_v63 = vsub.f32 %v7829_v36, %v4606_v23  ;;  %v4982_v36 = vld [vmem:[%s7919_s3 + $0x80] sm:$0xff] }
 0xdad   :  { %4768 = vmatpush.msra.mxu1 %v4985_v39 }
 0xdae   :  { %v4663_v25 = vsub.f32 1.5, %v4662_v22  ;;  %v4634_v6 = vsub.f32 %v4626_v10, %v4630_v60 }
 0xdaf   :  { %4769 = vmatpush.msra.mxu1 %v4984_v54 }
 0xdb0   :  { %v4664_v58 = vmul.f32 %v5597_v37, %v4663_v25  ;;  %v4638_v55 = vadd.f32 1e-05, %v4634_v6 }
 0xdb1   :  { %4770 = vmatpush.msra.mxu1 %v4983_v0 }
 0xdb2   :  { %v4668_v61 = vsel %vm4667_vm12, %v5597_v37, %v4664_v58  ;;  %5598 = vrsqrt.f32 %v4638_v55  ;;  %vm4675_vm15 = vweird.f32 %v4638_v55 }
 0xdb3   :  { %v4686_v9 = vmul.f32 %v7853_v51, %v4668_v61  ;;  %4771 = vmatpush.msra.mxu1 %v4982_v36 }
 0xdb5   :  { %v4690_v49 = vmul.f32 %v4686_v9, %v4681_v26 }
 0xdb7   :  { %v4695_v18 = vadd.f32 %v7857_v27, %v4690_v49 }
 0xdb8   :  { %v5599_v21 = vpop.eup %5598 }
 0xdb9   :  { %v4670_v46 = vmul.f32 %v5599_v21, %v4638_v55  ;;  %5129 = vmatmul.msk.f32.gmra.mxu0 %vm139_vm1, %v4695_v18  ;;  %vm4676_vm14 = vweird.f32 %v5599_v21 }
 0xdba   :  { %vm4677_vm3 = vmor %vm4675_vm15, %vm4676_vm14 }
 0xdbb   :  { %v4671_v29 = vmul.f32 %v5599_v21, %v4670_v46 }
 0xdbd   :  { %v4672_v47 = vmul.f32 0.5, %v4671_v29 }
 0xdbf   :  { %v4673_v48 = vsub.f32 1.5, %v4672_v47 }
 0xdc1   :  { %v4674_v12 = vmul.f32 %v5599_v21, %v4673_v48 }
 0xdc3   :  { %v4678_v17 = vsel %vm4677_vm3, %v5599_v21, %v4674_v12 }
 0xdc4   :  { %v4687_v56 = vmul.f32 %v7853_v51, %v4678_v17  ;;  %v4697_v51 = vperm.slane %v7801_v11, 6 }
 0xdc6   :  { %v4691_v15 = vmul.f32 %v4687_v56, %v4682_v63 }
 0xdc8   :  { %v4696_v40 = vadd.f32 %v7857_v27, %v4691_v15 }
 0xdca   :  { %5130 = vmatmul.msk.f32.gmra.mxu0 %vm139_vm1, %v4696_v40 }
 0xe19   :  { %v4727_v62 = vpop.f32.mrf.mxu0 }
 0xe1a   :  { %v4728_v2 = vadd.f32 %v4727_v62, %v4697_v51 }
 0xe1c   :  { %v4739_v3 = vmax.f32 %v4728_v2, 0.0 }
 0xe1e   :  { %5131 = vmatmul.msk.f32.vlgmr.msra.gmra.mxu1 %vm2385_vm13, %v4739_v3 }
 0xe21   :  { %v4730_v24 = vpop.f32.mrf.mxu0 }
 0xe22   :  { %v4731_v27 = vadd.f32 %v4730_v24, %v4697_v51 }
 0xe24   :  { %v4740_v4 = vmax.f32 %v4731_v27, 0.0 }
 0xe26   :  { %5132 = vmatmul.msk.f32.gmra.mxu1 %vm2385_vm13, %v4740_v4 }
 0xe36   :  { %v4733_v59 = vpop.f32.mrf.mxu0 }
 0xe37   :  { %v4734_v34 = vadd.f32 %v4733_v59, %v4697_v51 }
 0xe39   :  { %v4741_v52 = vmax.f32 %v4734_v34, 0.0 }
 0xe3b   :  { %5133 = vmatmul.msk.f32.gmra.mxu1 %vm2385_vm13, %v4741_v52 }
 0xe47   :  { %v4736_v33 = vpop.f32.mrf.mxu0 }
 0xe48   :  { %v4737_v35 = vadd.f32 %v4736_v33, %v4697_v51 }
 0xe4a   :  { %v4742_v38 = vmax.f32 %v4737_v35, 0.0 }
 0xe4c   :  { %5134 = vmatmul.msk.f32.gmra.mxu1 %vm2385_vm13, %v4742_v38 }
 0xe9b   :  { %v4773_v13 = vpop.f32.mrf.mxu1 }
 0xe9c   :  { %v4774_v19 = vadd.f32 %v4773_v13, %v4743_v53 }
 0xe9e   :  { %v4783_v30 = vadd.f32 %v4774_v19, %v7805_v32 }
 0xea0   :  { %4785 = vst.msk [vmem:[#allocation2] sm:$0xff] %vm139_vm1, %v4783_v30 }
 0xea3   :  { %v4776_v50 = vpop.f32.mrf.mxu1 }
 0xeb8   :  { %v4778_v28 = vpop.f32.mrf.mxu1 }
 0xeb9   :  { %v4779_v57 = vadd.f32 %v4778_v28, %v4743_v53 }
 0xebb   :  { %v4784_v20 = vadd.f32 %v4779_v57, %v7821_v31 }
 0xebd   :  { %4786 = vst.msk [vmem:[#allocation2 + $0x8] sm:$0xff] %vm139_vm1, %v4784_v20 }
 0xebe   :  { %4799 = dma.vmem_to_hbm [thread:$0]  %s4792_s1, 256, %s4794_s26, [#allocation3], %s5644_s14, %s5644_s14, %s5637_s22  }
 0xec9   :  { %v4781_v11 = vpop.f32.mrf.mxu1 }
 0xeca   :  { %5627 = dma.done.wait [#allocation3], 256  }
 0xecb   :  { %5628 = vsyncadd [#allocation3], 4294967040 }
 0xecc   :  { %4804 = vsyncpa [#allocation3], 1 }

</bundles_post_ra>
